<compile_context>
chip_gen: v5e
topology: v5e:2x2
jax: 0.10.0
libtpu: 0.0.40
codegen_flags: <defaults>
</compile_context>

<pallas_src>
import functools
import math

import jax
import jax.numpy as jnp
from jax.experimental import pallas as pl
from jax.experimental.pallas import tpu as pltpu


# ----------------------------------------------------------------------------- fused ViT block

def _block_kernel(x_ref, ln1g, ln1b, wqkv, bqkv, wproj, bproj,
                  ln2g, ln2b, wfc1, bfc1, wfc2, bfc2, o_ref,
                  *, num_heads, eps):
    """One pre-norm ViT block for a single batch element, fully VMEM-resident."""
    x = x_ref[0].astype(jnp.float32)                       # (T, D)
    T, D = x.shape
    Dh = D // num_heads
    scale = 1.0 / math.sqrt(Dh)

    def layer_norm(v, g_ref, b_ref):
        mu = jnp.mean(v, axis=-1, keepdims=True)
        vc = v - mu
        var = jnp.mean(vc * vc, axis=-1, keepdims=True)
        return vc * jax.lax.rsqrt(var + eps) * g_ref[...] + b_ref[...]

    def matmul(a, w_ref, b_ref):
        # bf16 operands on the MXU, f32 accumulation.
        return jnp.dot(a.astype(jnp.bfloat16), w_ref[...].astype(jnp.bfloat16),
                       preferred_element_type=jnp.float32) + b_ref[...]

    # ---- attention sub-block ----
    h = layer_norm(x, ln1g, ln1b)
    qkv = matmul(h, wqkv, bqkv)                            # (T, 3D)
    heads = []
    for hd in range(num_heads):                            # static unroll (num_heads small)
        q = qkv[:, hd * Dh:(hd + 1) * Dh]
        k = qkv[:, D + hd * Dh:D + (hd + 1) * Dh]
        v = qkv[:, 2 * D + hd * Dh:2 * D + (hd + 1) * Dh]
        s = jax.lax.dot_general(q.astype(jnp.bfloat16), k.astype(jnp.bfloat16),
                                (((1,), (1,)), ((), ())),
                                preferred_element_type=jnp.float32) * scale
        s = s - jnp.max(s, axis=-1, keepdims=True)
        e = jnp.exp(s)
        pr = e * pl.reciprocal(jnp.sum(e, axis=-1, keepdims=True), approx=True)
        heads.append(jnp.dot(pr.astype(jnp.bfloat16), v.astype(jnp.bfloat16),
                             preferred_element_type=jnp.float32))
    attn = jnp.concatenate(heads, axis=-1)                 # (T, D)
    x = x + matmul(attn, wproj, bproj)                     # residual folded in-kernel

    # ---- MLP sub-block ----
    h = layer_norm(x, ln2g, ln2b)
    # TODO(synk): PyTorch nn.GELU defaults to exact erf; tanh approximation used here
    # for guaranteed Mosaic lowering.
    h = jax.nn.gelu(matmul(h, wfc1, bfc1))
    x = x + matmul(h, wfc2, bfc2)

    o_ref[0] = x.astype(o_ref.dtype)


def transformer_block_pallas(x, p, num_heads, eps=1e-5):
    """x: (B, T, D) -> (B, T, D), one fused Pallas call per block."""
    B, T, D = x.shape
    Dm = p["w_fc1"].shape[1]
    kernel = functools.partial(_block_kernel, num_heads=num_heads, eps=eps)

    in_specs = [
        pl.BlockSpec((1, T, D), lambda b: (b, 0, 0)),      # x
        pl.BlockSpec((1, D), lambda b: (0, 0)),            # ln1_g
        pl.BlockSpec((1, D), lambda b: (0, 0)),            # ln1_b
        pl.BlockSpec((D, 3 * D), lambda b: (0, 0)),        # w_qkv
        pl.BlockSpec((1, 3 * D), lambda b: (0, 0)),        # b_qkv
        pl.BlockSpec((D, D), lambda b: (0, 0)),            # w_proj
        pl.BlockSpec((1, D), lambda b: (0, 0)),            # b_proj
        pl.BlockSpec((1, D), lambda b: (0, 0)),            # ln2_g
        pl.BlockSpec((1, D), lambda b: (0, 0)),            # ln2_b
        pl.BlockSpec((D, Dm), lambda b: (0, 0)),           # w_fc1
        pl.BlockSpec((1, Dm), lambda b: (0, 0)),           # b_fc1
        pl.BlockSpec((Dm, D), lambda b: (0, 0)),           # w_fc2
        pl.BlockSpec((1, D), lambda b: (0, 0)),            # b_fc2
    ]
    return pl.pallas_call(
        kernel,
        out_shape=jax.ShapeDtypeStruct((B, T, D), jnp.float32),
        grid=(B,),
        in_specs=in_specs,
        out_specs=pl.BlockSpec((1, T, D), lambda b: (b, 0, 0)),
        compiler_params=pltpu.CompilerParams(dimension_semantics=("parallel",)),
    )(x,
      p["ln1_g"].reshape(1, D), p["ln1_b"].reshape(1, D),
      p["w_qkv"], p["b_qkv"].reshape(1, 3 * D),
      p["w_proj"], p["b_proj"].reshape(1, D),
      p["ln2_g"].reshape(1, D), p["ln2_b"].reshape(1, D),
      p["w_fc1"], p["b_fc1"].reshape(1, Dm),
      p["w_fc2"], p["b_fc2"].reshape(1, D))


# ----------------------------------------------------------------------------- small kernels

def linear_pallas(x, w, b, act=None):
    """y = act(x @ w + b); bf16 MXU operands, f32 accumulate, parallel M split."""
    M, K = x.shape
    _, N = w.shape
    split = 2 if (M >= 128 and M % 16 == 0) else 1         # use both TCs on v7x
    bm = M // split

    def kernel(x_ref, w_ref, b_ref, o_ref):
        y = jnp.dot(x_ref[...].astype(jnp.bfloat16), w_ref[...].astype(jnp.bfloat16),
                    preferred_element_type=jnp.float32) + b_ref[...]
        if act == "gelu":
            y = jax.nn.gelu(y)
        o_ref[...] = y.astype(o_ref.dtype)

    return pl.pallas_call(
        kernel,
        out_shape=jax.ShapeDtypeStruct((M, N), jnp.float32),
        grid=(split,),
        in_specs=[pl.BlockSpec((bm, K), lambda i: (i, 0)),
                  pl.BlockSpec((K, N), lambda i: (0, 0)),
                  pl.BlockSpec((1, N), lambda i: (0, 0))],
        out_specs=pl.BlockSpec((bm, N), lambda i: (i, 0)),
        compiler_params=pltpu.CompilerParams(dimension_semantics=("parallel",)),
    )(x, w, b.reshape(1, N))


def layernorm_pallas(x, g, b, eps=1e-5):
    """LayerNorm over last dim. x:(M,D) g,b:(D,)."""
    M, D = x.shape

    def kernel(x_ref, g_ref, b_ref, o_ref):
        xf = x_ref[...].astype(jnp.float32)
        mu = jnp.mean(xf, axis=-1, keepdims=True)
        xc = xf - mu
        var = jnp.mean(xc * xc, axis=-1, keepdims=True)
        inv = jax.lax.rsqrt(var + eps)
        o_ref[...] = (xc * inv * g_ref[...] + b_ref[...]).astype(o_ref.dtype)

    return pl.pallas_call(
        kernel,
        out_shape=jax.ShapeDtypeStruct((M, D), jnp.float32),
        grid=(1,),
        in_specs=[pl.BlockSpec((M, D), lambda i: (0, 0)),
                  pl.BlockSpec((1, D), lambda i: (0, 0)),
                  pl.BlockSpec((1, D), lambda i: (0, 0))],
        out_specs=pl.BlockSpec((M, D), lambda i: (0, 0)),
    )(x, g.reshape(1, D), b.reshape(1, D))


def sensor_embed_pallas(rf_flat, gfeat, enc):
    """Fused rf-MLP + gsd-MLP sensor-parameter embedding: (B*C, D)."""
    M, RL = rf_flat.shape
    GF = gfeat.shape[1]
    HID = enc["rf_w1"].shape[1]
    D = enc["rf_w2"].shape[1]

    def kernel(rf_ref, g_ref, rw1, rb1, rw2, rb2, gw1, gb1, gw2, gb2, o_ref):
        def mlp(a, w1, b1, w2, b2):
            h = jnp.dot(a.astype(jnp.bfloat16), w1[...].astype(jnp.bfloat16),
                        preferred_element_type=jnp.float32) + b1[...]
            h = jax.nn.gelu(h)
            return jnp.dot(h.astype(jnp.bfloat16), w2[...].astype(jnp.bfloat16),
                           preferred_element_type=jnp.float32) + b2[...]
        out = (mlp(rf_ref[...].astype(jnp.float32), rw1, rb1, rw2, rb2)
               + mlp(g_ref[...].astype(jnp.float32), gw1, gb1, gw2, gb2))
        o_ref[...] = out.astype(o_ref.dtype)

    def spec(shape):
        return pl.BlockSpec(shape, lambda i: (0, 0))

    return pl.pallas_call(
        kernel,
        out_shape=jax.ShapeDtypeStruct((M, D), jnp.float32),
        grid=(1,),
        in_specs=[spec((M, RL)), spec((M, GF)),
                  spec((RL, HID)), spec((1, HID)), spec((HID, D)), spec((1, D)),
                  spec((GF, HID)), spec((1, HID)), spec((HID, D)), spec((1, D))],
        out_specs=spec((M, D)),
    )(rf_flat, gfeat,
      enc["rf_w1"], enc["rf_b1"].reshape(1, HID), enc["rf_w2"], enc["rf_b2"].reshape(1, D),
      enc["gsd_w1"], enc["gsd_b1"].reshape(1, HID), enc["gsd_w2"], enc["gsd_b2"].reshape(1, D))


# ----------------------------------------------------------------------------- JAX glue

def take_indexes(seq, idx):
    """seq:(T,B,D), idx:(T',B) -> gather along token axis, per batch column."""
    Tp, Bp = idx.shape
    Dp = seq.shape[-1]
    idx3 = jnp.broadcast_to(idx[:, :, None].astype(jnp.int32), (Tp, Bp, Dp))
    return jnp.take_along_axis(seq, idx3, axis=0)


def patch2img(patches, B, C, gh, gw, p):
    """patches:(C*gh*gw, B, p*p) ordered (c, gh, gw) -> image (B, C, H, W)."""
    x = patches.reshape(C, gh, gw, B, p, p)
    x = jnp.transpose(x, (3, 0, 1, 4, 2, 5))
    return x.reshape(B, C, gh * p, gw * p)


# ----------------------------------------------------------------------------- parameters

def _dense_init(key, fan_in, fan_out, scale=0.02):
    return scale * jax.random.normal(key, (fan_in, fan_out), jnp.float32)


def init_block_params(key, D, mlp_ratio=4):
    ks = jax.random.split(key, 4)
    H = D * mlp_ratio
    return dict(
        ln1_g=jnp.ones((D,), jnp.float32), ln1_b=jnp.zeros((D,), jnp.float32),
        w_qkv=_dense_init(ks[0], D, 3 * D), b_qkv=jnp.zeros((3 * D,), jnp.float32),
        w_proj=_dense_init(ks[1], D, D), b_proj=jnp.zeros((D,), jnp.float32),
        ln2_g=jnp.ones((D,), jnp.float32), ln2_b=jnp.zeros((D,), jnp.float32),
        w_fc1=_dense_init(ks[2], D, H), b_fc1=jnp.zeros((H,), jnp.float32),
        w_fc2=_dense_init(ks[3], H, D), b_fc2=jnp.zeros((D,), jnp.float32),
    )


def init_params(key, cfg, C, T0):
    D, p, rf_len = cfg["emb_dim"], cfg["patch_size"], cfg["rf_len"]
    ks = jax.random.split(key, 16)
    enc = dict(
        cls_token=0.02 * jax.random.normal(ks[0], (1, 1, D), jnp.float32),
        pos_emb=0.02 * jax.random.normal(ks[1], (T0, 1, D), jnp.float32),
        patch_w=_dense_init(ks[2], p * p, D), patch_b=jnp.zeros((D,), jnp.float32),
        rf_w1=_dense_init(ks[3], rf_len, 64), rf_b1=jnp.zeros((64,), jnp.float32),
        rf_w2=_dense_init(ks[4], 64, D), rf_b2=jnp.zeros((D,), jnp.float32),
        gsd_w1=_dense_init(ks[5], 8, 64), gsd_b1=jnp.zeros((64,), jnp.float32),
        gsd_w2=_dense_init(ks[6], 64, D), gsd_b2=jnp.zeros((D,), jnp.float32),
        blocks=[init_block_params(k, D, cfg["mlp_ratio"])
                for k in jax.random.split(ks[7], cfg["enc_layers"])],
        ln_g=jnp.ones((D,), jnp.float32), ln_b=jnp.zeros((D,), jnp.float32),
    )
    dec = dict(
        mask_token=0.02 * jax.random.normal(ks[8], (1, 1, D), jnp.float32),
        pos_emb=0.02 * jax.random.normal(ks[9], (T0 + 1, 1, D), jnp.float32),
        blocks=[init_block_params(k, D, cfg["mlp_ratio"])
                for k in jax.random.split(ks[10], cfg["dec_layers"])],
        head_w=_dense_init(ks[11], D, p * p), head_b=jnp.zeros((p * p,), jnp.float32),
    )
    return dict(enc=enc, dec=dec)


# ----------------------------------------------------------------------------- SenPaMAE forward

def senpamae_forward(params, img, rf, gsd, shuffle_key, cfg):
    """Returns (predicted_img, mask, len(features)) like the PyTorch module."""
    B, C, H, W = img.shape
    p, D, nh = cfg["patch_size"], cfg["emb_dim"], cfg["num_heads"]
    gh, gw = H // p, W // p
    npatch = gh * gw
    T0 = C * npatch
    enc, dec = params["enc"], params["dec"]

    # ---------- encoder ----------
    # per-channel patchify (Conv2d(1, D, p, stride=p)) as one Pallas matmul
    x = img.reshape(B, C, gh, p, gw, p)
    x = jnp.transpose(x, (1, 2, 4, 0, 3, 5)).reshape(T0, B, p * p)       # 't b c'
    tokens = linear_pallas(x.reshape(T0 * B, p * p), enc["patch_w"],
                           enc["patch_b"]).reshape(T0, B, D)

    # fused sensor response-function + GSD embedding, added per channel
    freqs = 2.0 ** jnp.arange(4, dtype=jnp.float32)
    g = gsd.reshape(B * C, 1)
    gfeat = jnp.concatenate([jnp.sin(g * freqs), jnp.cos(g * freqs)], axis=-1)   # (B*C, 8)
    chan = sensor_embed_pallas(rf.reshape(B * C, -1), gfeat, enc)                # (B*C, D)
    chan_e = jnp.transpose(chan.reshape(B, C, D), (1, 0, 2))             # (C, B, D)
    chan_e = jnp.repeat(chan_e, npatch, axis=0)                          # (T0, B, D)
    tokens = tokens + enc["pos_emb"] + chan_e

    # patch shuffle + masking (PatchShuffle): random per-batch permutation (vmapped)
    remain = int(T0 * (1.0 - cfg["mask_ratio"]))
    keys = jax.random.split(shuffle_key, B)
    fwd = jax.vmap(lambda k: jax.random.permutation(k, T0))(keys).T      # (T0, B)
    bwd = jnp.argsort(fwd, axis=0)                                       # (T0, B)
    vis = take_indexes(tokens, fwd)[:remain]                             # (remain, B, D)

    cls = jnp.broadcast_to(enc["cls_token"], (1, B, D))
    feat = jnp.concatenate([cls, vis], axis=0)                           # (remain+1, B, D)
    xb = jnp.transpose(feat, (1, 0, 2))                                  # (B, T, D)
    for bp in enc["blocks"]:
        xb = transformer_block_pallas(xb, bp, nh)
    Bx, Tx, _ = xb.shape
    xb = layernorm_pallas(xb.reshape(Bx * Tx, D), enc["ln_g"], enc["ln_b"]).reshape(Bx, Tx, D)
    features = jnp.transpose(xb, (1, 0, 2))                              # (T, B, D)
    backward_indexes = bwd

    # ---------- decoder ----------
    T = features.shape[0]
    bwd_full = jnp.concatenate(
        [jnp.zeros((1, B), jnp.int32), backward_indexes.astype(jnp.int32) + 1], axis=0)  # (T0+1, B)
    n_mask = (T0 + 1) - T
    mask_tok = jnp.broadcast_to(dec["mask_token"], (n_mask, B, D))
    f = jnp.concatenate([features, mask_tok], axis=0)                    # (T0+1, B, D)
    f = take_indexes(f, bwd_full)
    f = f + dec["pos_emb"]
    xb = jnp.transpose(f, (1, 0, 2))                                     # (B, T0+1, D)
    for bp in dec["blocks"]:
        xb = transformer_block_pallas(xb, bp, nh)
    f = jnp.transpose(xb, (1, 0, 2))[1:]                                 # drop cls -> (T0, B, D)
    patches = linear_pallas(f.reshape(T0 * B, D), dec["head_w"],
                            dec["head_b"]).reshape(T0, B, p * p)

    mask = jnp.concatenate(
        [jnp.zeros((T - 1, B, p * p), jnp.float32),
         jnp.ones((T0 - (T - 1), B, p * p), jnp.float32)], axis=0)
    mask = take_indexes(mask, backward_indexes)

    predicted_img = patch2img(patches, B, C, gh, gw, p)
    mask_img = patch2img(mask, B, C, gh, gw, p)
    return predicted_img, mask_img, T


# ----------------------------------------------------------------------------- main

if __name__ == "__main__":
    cfg = dict(patch_size=4, emb_dim=32, num_heads=2, enc_layers=2, dec_layers=1,
               mask_ratio=0.75, rf_len=16, mlp_ratio=4)
    B, C, H, W = 2, 4, 16, 16

    key = jax.random.PRNGKey(0)
    k_img, k_rf, k_gsd = jax.random.split(key, 3)
    img = jax.random.normal(k_img, (B, C, H, W), jnp.float32)
    rf = jax.nn.softmax(jax.random.normal(k_rf, (B, C, cfg["rf_len"]), jnp.float32), axis=-1)
    gsd = jax.random.uniform(k_gsd, (B, C), jnp.float32, 1.0, 30.0)

    T0 = C * (H // cfg["patch_size"]) * (W // cfg["patch_size"])
    params = init_params(jax.random.PRNGKey(1), cfg, C, T0)

    fwd_fn = jax.jit(functools.partial(senpamae_forward, cfg=cfg))
    pred, mask, n_feat = fwd_fn(params, img, rf, gsd, jax.random.PRNGKey(42))
    jax.block_until_ready((pred, mask))

    assert pred.shape == (B, C, H, W), pred.shape
    assert mask.shape == (B, C, H, W), mask.shape
    assert int(n_feat) == int(T0 * (1 - cfg["mask_ratio"])) + 1, n_feat
    print("KERNEL_OK")
</pallas_src>

<mosaic_0001>
module attributes {stable_mosaic.version = 11 : i64} {
  func.func @kernel(%arg0: i32, %arg1: memref<8x16xf32, #tpu.memory_space<vmem>>, %arg2: memref<8x8xf32, #tpu.memory_space<vmem>>, %arg3: memref<16x64xf32, #tpu.memory_space<vmem>>, %arg4: memref<1x64xf32, #tpu.memory_space<vmem>>, %arg5: memref<64x32xf32, #tpu.memory_space<vmem>>, %arg6: memref<1x32xf32, #tpu.memory_space<vmem>>, %arg7: memref<8x64xf32, #tpu.memory_space<vmem>>, %arg8: memref<1x64xf32, #tpu.memory_space<vmem>>, %arg9: memref<64x32xf32, #tpu.memory_space<vmem>>, %arg10: memref<1x32xf32, #tpu.memory_space<vmem>>, %arg11: memref<8x32xf32, #tpu.memory_space<vmem>>) attributes {dimension_semantics = [#tpu.dimension_semantics<arbitrary>], iteration_bounds = array<i64: 1>, scalar_prefetch = 0 : i64, scratch_operands = 0 : i64, tpu.core_type = #tpu.core_type<tc>, window_params = [{pipeline_mode = #tpu.pipeline_mode<synchronous>, transform_indices = @transform_0, window_bounds = array<i64: 8, 16>}, {pipeline_mode = #tpu.pipeline_mode<synchronous>, transform_indices = @transform_1, window_bounds = array<i64: 8, 8>}, {pipeline_mode = #tpu.pipeline_mode<synchronous>, transform_indices = @transform_2, window_bounds = array<i64: 16, 64>}, {pipeline_mode = #tpu.pipeline_mode<synchronous>, transform_indices = @transform_3, window_bounds = array<i64: 1, 64>}, {pipeline_mode = #tpu.pipeline_mode<synchronous>, transform_indices = @transform_4, window_bounds = array<i64: 64, 32>}, {pipeline_mode = #tpu.pipeline_mode<synchronous>, transform_indices = @transform_5, window_bounds = array<i64: 1, 32>}, {pipeline_mode = #tpu.pipeline_mode<synchronous>, transform_indices = @transform_6, window_bounds = array<i64: 8, 64>}, {pipeline_mode = #tpu.pipeline_mode<synchronous>, transform_indices = @transform_7, window_bounds = array<i64: 1, 64>}, {pipeline_mode = #tpu.pipeline_mode<synchronous>, transform_indices = @transform_8, window_bounds = array<i64: 64, 32>}, {pipeline_mode = #tpu.pipeline_mode<synchronous>, transform_indices = @transform_9, window_bounds = array<i64: 1, 32>}, {pipeline_mode = #tpu.pipeline_mode<synchronous>, transform_indices = @transform_10, window_bounds = array<i64: 8, 32>}]} {
    %c0 = arith.constant 0 : index
    %c0_0 = arith.constant 0 : index
    %0 = vector.load %arg1[%c0, %c0_0] : memref<8x16xf32, #tpu.memory_space<vmem>>, vector<8x16xf32>
    %1 = arith.truncf %0 : vector<8x16xf32> to vector<8x16xbf16>
    %c0_1 = arith.constant 0 : index
    %c0_2 = arith.constant 0 : index
    %2 = vector.load %arg3[%c0_1, %c0_2] : memref<16x64xf32, #tpu.memory_space<vmem>>, vector<16x64xf32>
    %3 = arith.truncf %2 : vector<16x64xf32> to vector<16x64xbf16>
    %cst = arith.constant dense<0.000000e+00> : vector<8x64xf32>
    %4 = tpu.matmul %1, %3, %cst {dimension_numbers = #tpu.dot_dimension_numbers<[1], [0], [0], [1], [0, 0, 1, 1], [], []>} : vector<8x16xbf16>, vector<16x64xbf16>, vector<8x64xf32> -> vector<8x64xf32>
    %c0_3 = arith.constant 0 : index
    %c0_4 = arith.constant 0 : index
    %5 = vector.load %arg4[%c0_3, %c0_4] : memref<1x64xf32, #tpu.memory_space<vmem>>, vector<1x64xf32>
    %6 = vector.broadcast %5 : vector<1x64xf32> to vector<8x64xf32>
    %7 = arith.addf %4, %6 : vector<8x64xf32>
    %8 = arith.mulf %7, %7 : vector<8x64xf32>
    %9 = arith.mulf %7, %8 : vector<8x64xf32>
    %cst_5 = arith.constant 4.471500e-02 : f32
    %10 = vector.broadcast %cst_5 : f32 to vector<8x64xf32>
    %11 = arith.mulf %10, %9 : vector<8x64xf32>
    %12 = arith.addf %7, %11 : vector<8x64xf32>
    %cst_6 = arith.constant 0.797884583 : f32
    %13 = vector.broadcast %cst_6 : f32 to vector<8x64xf32>
    %14 = arith.mulf %13, %12 : vector<8x64xf32>
    %15 = math.tanh %14 : vector<8x64xf32>
    %cst_7 = arith.constant 1.000000e+00 : f32
    %16 = vector.broadcast %cst_7 : f32 to vector<8x64xf32>
    %17 = arith.addf %16, %15 : vector<8x64xf32>
    %cst_8 = arith.constant 5.000000e-01 : f32
    %18 = vector.broadcast %cst_8 : f32 to vector<8x64xf32>
    %19 = arith.mulf %18, %17 : vector<8x64xf32>
    %20 = arith.mulf %7, %19 : vector<8x64xf32>
    %21 = arith.truncf %20 : vector<8x64xf32> to vector<8x64xbf16>
    %c0_9 = arith.constant 0 : index
    %c0_10 = arith.constant 0 : index
    %22 = vector.load %arg5[%c0_9, %c0_10] : memref<64x32xf32, #tpu.memory_space<vmem>>, vector<64x32xf32>
    %23 = arith.truncf %22 : vector<64x32xf32> to vector<64x32xbf16>
    %cst_11 = arith.constant dense<0.000000e+00> : vector<8x32xf32>
    %24 = tpu.matmul %21, %23, %cst_11 {dimension_numbers = #tpu.dot_dimension_numbers<[1], [0], [0], [1], [0, 0, 1, 1], [], []>} : vector<8x64xbf16>, vector<64x32xbf16>, vector<8x32xf32> -> vector<8x32xf32>
    %c0_12 = arith.constant 0 : index
    %c0_13 = arith.constant 0 : index
    %25 = vector.load %arg6[%c0_12, %c0_13] : memref<1x32xf32, #tpu.memory_space<vmem>>, vector<1x32xf32>
    %26 = vector.broadcast %25 : vector<1x32xf32> to vector<8x32xf32>
    %27 = arith.addf %24, %26 : vector<8x32xf32>
    %c0_14 = arith.constant 0 : index
    %c0_15 = arith.constant 0 : index
    %28 = vector.load %arg2[%c0_14, %c0_15] : memref<8x8xf32, #tpu.memory_space<vmem>>, vector<8x8xf32>
    %29 = arith.truncf %28 : vector<8x8xf32> to vector<8x8xbf16>
    %c0_16 = arith.constant 0 : index
    %c0_17 = arith.constant 0 : index
    %30 = vector.load %arg7[%c0_16, %c0_17] : memref<8x64xf32, #tpu.memory_space<vmem>>, vector<8x64xf32>
    %31 = arith.truncf %30 : vector<8x64xf32> to vector<8x64xbf16>
    %cst_18 = arith.constant dense<0.000000e+00> : vector<8x64xf32>
    %32 = tpu.matmul %29, %31, %cst_18 {dimension_numbers = #tpu.dot_dimension_numbers<[1], [0], [0], [1], [0, 0, 1, 1], [], []>} : vector<8x8xbf16>, vector<8x64xbf16>, vector<8x64xf32> -> vector<8x64xf32>
    %c0_19 = arith.constant 0 : index
    %c0_20 = arith.constant 0 : index
    %33 = vector.load %arg8[%c0_19, %c0_20] : memref<1x64xf32, #tpu.memory_space<vmem>>, vector<1x64xf32>
    %34 = vector.broadcast %33 : vector<1x64xf32> to vector<8x64xf32>
    %35 = arith.addf %32, %34 : vector<8x64xf32>
    %36 = arith.mulf %35, %35 : vector<8x64xf32>
    %37 = arith.mulf %35, %36 : vector<8x64xf32>
    %cst_21 = arith.constant 4.471500e-02 : f32
    %38 = vector.broadcast %cst_21 : f32 to vector<8x64xf32>
    %39 = arith.mulf %38, %37 : vector<8x64xf32>
    %40 = arith.addf %35, %39 : vector<8x64xf32>
    %cst_22 = arith.constant 0.797884583 : f32
    %41 = vector.broadcast %cst_22 : f32 to vector<8x64xf32>
    %42 = arith.mulf %41, %40 : vector<8x64xf32>
    %43 = math.tanh %42 : vector<8x64xf32>
    %cst_23 = arith.constant 1.000000e+00 : f32
    %44 = vector.broadcast %cst_23 : f32 to vector<8x64xf32>
    %45 = arith.addf %44, %43 : vector<8x64xf32>
    %cst_24 = arith.constant 5.000000e-01 : f32
    %46 = vector.broadcast %cst_24 : f32 to vector<8x64xf32>
    %47 = arith.mulf %46, %45 : vector<8x64xf32>
    %48 = arith.mulf %35, %47 : vector<8x64xf32>
    %49 = arith.truncf %48 : vector<8x64xf32> to vector<8x64xbf16>
    %c0_25 = arith.constant 0 : index
    %c0_26 = arith.constant 0 : index
    %50 = vector.load %arg9[%c0_25, %c0_26] : memref<64x32xf32, #tpu.memory_space<vmem>>, vector<64x32xf32>
    %51 = arith.truncf %50 : vector<64x32xf32> to vector<64x32xbf16>
    %cst_27 = arith.constant dense<0.000000e+00> : vector<8x32xf32>
    %52 = tpu.matmul %49, %51, %cst_27 {dimension_numbers = #tpu.dot_dimension_numbers<[1], [0], [0], [1], [0, 0, 1, 1], [], []>} : vector<8x64xbf16>, vector<64x32xbf16>, vector<8x32xf32> -> vector<8x32xf32>
    %c0_28 = arith.constant 0 : index
    %c0_29 = arith.constant 0 : index
    %53 = vector.load %arg10[%c0_28, %c0_29] : memref<1x32xf32, #tpu.memory_space<vmem>>, vector<1x32xf32>
    %54 = vector.broadcast %53 : vector<1x32xf32> to vector<8x32xf32>
    %55 = arith.addf %52, %54 : vector<8x32xf32>
    %56 = arith.addf %27, %55 : vector<8x32xf32>
    %c0_30 = arith.constant 0 : index
    %c0_31 = arith.constant 0 : index
    %57 = vector.load %arg11[%c0_30, %c0_31] : memref<8x32xf32, #tpu.memory_space<vmem>>, vector<8x32xf32>
    tpu.vector_store %arg11[%c0_30, %c0_31], %56 {strides = array<i32>} : memref<8x32xf32, #tpu.memory_space<vmem>>, vector<8x32xf32>,
    return
  }
  func.func @transform_0(%arg0: i32) -> (i32, i32) {
    %c0_i32 = arith.constant 0 : i32
    %c0_i32_0 = arith.constant 0 : i32
    %c0_i32_1 = arith.constant 0 : i32
    return %c0_i32, %c0_i32_0 : i32, i32
  }
  func.func @transform_1(%arg0: i32) -> (i32, i32) {
    %c0_i32 = arith.constant 0 : i32
    %c0_i32_0 = arith.constant 0 : i32
    %c0_i32_1 = arith.constant 0 : i32
    return %c0_i32, %c0_i32_0 : i32, i32
  }
  func.func @transform_2(%arg0: i32) -> (i32, i32) {
    %c0_i32 = arith.constant 0 : i32
    %c0_i32_0 = arith.constant 0 : i32
    %c0_i32_1 = arith.constant 0 : i32
    return %c0_i32, %c0_i32_0 : i32, i32
  }
  func.func @transform_3(%arg0: i32) -> (i32, i32) {
    %c0_i32 = arith.constant 0 : i32
    %c0_i32_0 = arith.constant 0 : i32
    %c0_i32_1 = arith.constant 0 : i32
    return %c0_i32, %c0_i32_0 : i32, i32
  }
  func.func @transform_4(%arg0: i32) -> (i32, i32) {
    %c0_i32 = arith.constant 0 : i32
    %c0_i32_0 = arith.constant 0 : i32
    %c0_i32_1 = arith.constant 0 : i32
    return %c0_i32, %c0_i32_0 : i32, i32
  }
  func.func @transform_5(%arg0: i32) -> (i32, i32) {
    %c0_i32 = arith.constant 0 : i32
    %c0_i32_0 = arith.constant 0 : i32
    %c0_i32_1 = arith.constant 0 : i32
    return %c0_i32, %c0_i32_0 : i32, i32
  }
  func.func @transform_6(%arg0: i32) -> (i32, i32) {
    %c0_i32 = arith.constant 0 : i32
    %c0_i32_0 = arith.constant 0 : i32
    %c0_i32_1 = arith.constant 0 : i32
    return %c0_i32, %c0_i32_0 : i32, i32
  }
  func.func @transform_7(%arg0: i32) -> (i32, i32) {
    %c0_i32 = arith.constant 0 : i32
    %c0_i32_0 = arith.constant 0 : i32
    %c0_i32_1 = arith.constant 0 : i32
    return %c0_i32, %c0_i32_0 : i32, i32
  }
  func.func @transform_8(%arg0: i32) -> (i32, i32) {
    %c0_i32 = arith.constant 0 : i32
    %c0_i32_0 = arith.constant 0 : i32
    %c0_i32_1 = arith.constant 0 : i32
    return %c0_i32, %c0_i32_0 : i32, i32
  }
  func.func @transform_9(%arg0: i32) -> (i32, i32) {
    %c0_i32 = arith.constant 0 : i32
    %c0_i32_0 = arith.constant 0 : i32
    %c0_i32_1 = arith.constant 0 : i32
    return %c0_i32, %c0_i32_0 : i32, i32
  }
  func.func @transform_10(%arg0: i32) -> (i32, i32) {
    %c0_i32 = arith.constant 0 : i32
    %c0_i32_0 = arith.constant 0 : i32
    %c0_i32_1 = arith.constant 0 : i32
    return %c0_i32, %c0_i32_0 : i32, i32
  }
}

module attributes {stable_mosaic.version = 11 : i64} {
  func.func @kernel(%arg0: i32, %arg1: memref<64x16xf32, #tpu.memory_space<vmem>>, %arg2: memref<16x32xf32, #tpu.memory_space<vmem>>, %arg3: memref<1x32xf32, #tpu.memory_space<vmem>>, %arg4: memref<64x32xf32, #tpu.memory_space<vmem>>) attributes {dimension_semantics = [#tpu.dimension_semantics<parallel>], iteration_bounds = array<i64: 2>, scalar_prefetch = 0 : i64, scratch_operands = 0 : i64, tpu.core_type = #tpu.core_type<tc>, window_params = [{transform_indices = @transform_0, window_bounds = array<i64: 64, 16>}, {pipeline_mode = #tpu.pipeline_mode<synchronous>, transform_indices = @transform_1, window_bounds = array<i64: 16, 32>}, {pipeline_mode = #tpu.pipeline_mode<synchronous>, transform_indices = @transform_2, window_bounds = array<i64: 1, 32>}, {transform_indices = @transform_3, window_bounds = array<i64: 64, 32>}]} {
    %c0 = arith.constant 0 : index
    %c0_0 = arith.constant 0 : index
    %0 = vector.load %arg1[%c0, %c0_0] : memref<64x16xf32, #tpu.memory_space<vmem>>, vector<64x16xf32>
    %1 = arith.truncf %0 : vector<64x16xf32> to vector<64x16xbf16>
    %c0_1 = arith.constant 0 : index
    %c0_2 = arith.constant 0 : index
    %2 = vector.load %arg2[%c0_1, %c0_2] : memref<16x32xf32, #tpu.memory_space<vmem>>, vector<16x32xf32>
    %3 = arith.truncf %2 : vector<16x32xf32> to vector<16x32xbf16>
    %cst = arith.constant dense<0.000000e+00> : vector<64x32xf32>
    %4 = tpu.matmul %1, %3, %cst {dimension_numbers = #tpu.dot_dimension_numbers<[1], [0], [0], [1], [0, 0, 1, 1], [], []>} : vector<64x16xbf16>, vector<16x32xbf16>, vector<64x32xf32> -> vector<64x32xf32>
    %c0_3 = arith.constant 0 : index
    %c0_4 = arith.constant 0 : index
    %5 = vector.load %arg3[%c0_3, %c0_4] : memref<1x32xf32, #tpu.memory_space<vmem>>, vector<1x32xf32>
    %6 = vector.broadcast %5 : vector<1x32xf32> to vector<64x32xf32>
    %7 = arith.addf %4, %6 : vector<64x32xf32>
    %c0_5 = arith.constant 0 : index
    %c0_6 = arith.constant 0 : index
    %8 = vector.load %arg4[%c0_5, %c0_6] : memref<64x32xf32, #tpu.memory_space<vmem>>, vector<64x32xf32>
    tpu.vector_store %arg4[%c0_5, %c0_6], %7 {strides = array<i32>} : memref<64x32xf32, #tpu.memory_space<vmem>>, vector<64x32xf32>,
    return
  }
  func.func @transform_0(%arg0: i32) -> (i32, i32) {
    %c0_i32 = arith.constant 0 : i32
    %c0_i32_0 = arith.constant 0 : i32
    return %arg0, %c0_i32 : i32, i32
  }
  func.func @transform_1(%arg0: i32) -> (i32, i32) {
    %c0_i32 = arith.constant 0 : i32
    %c0_i32_0 = arith.constant 0 : i32
    %c0_i32_1 = arith.constant 0 : i32
    return %c0_i32, %c0_i32_0 : i32, i32
  }
  func.func @transform_2(%arg0: i32) -> (i32, i32) {
    %c0_i32 = arith.constant 0 : i32
    %c0_i32_0 = arith.constant 0 : i32
    %c0_i32_1 = arith.constant 0 : i32
    return %c0_i32, %c0_i32_0 : i32, i32
  }
  func.func @transform_3(%arg0: i32) -> (i32, i32) {
    %c0_i32 = arith.constant 0 : i32
    %c0_i32_0 = arith.constant 0 : i32
    return %arg0, %c0_i32 : i32, i32
  }
}

module attributes {stable_mosaic.version = 11 : i64} {
  func.func @kernel(%arg0: i32, %arg1: memref<34x32xf32, #tpu.memory_space<vmem>>, %arg2: memref<1x32xf32, #tpu.memory_space<vmem>>, %arg3: memref<1x32xf32, #tpu.memory_space<vmem>>, %arg4: memref<34x32xf32, #tpu.memory_space<vmem>>) attributes {dimension_semantics = [#tpu.dimension_semantics<arbitrary>], iteration_bounds = array<i64: 1>, scalar_prefetch = 0 : i64, scratch_operands = 0 : i64, tpu.core_type = #tpu.core_type<tc>, window_params = [{pipeline_mode = #tpu.pipeline_mode<synchronous>, transform_indices = @transform_0, window_bounds = array<i64: 34, 32>}, {pipeline_mode = #tpu.pipeline_mode<synchronous>, transform_indices = @transform_1, window_bounds = array<i64: 1, 32>}, {pipeline_mode = #tpu.pipeline_mode<synchronous>, transform_indices = @transform_2, window_bounds = array<i64: 1, 32>}, {pipeline_mode = #tpu.pipeline_mode<synchronous>, transform_indices = @transform_3, window_bounds = array<i64: 34, 32>}]} {
    %c0 = arith.constant 0 : index
    %c0_0 = arith.constant 0 : index
    %0 = vector.load %arg1[%c0, %c0_0] : memref<34x32xf32, #tpu.memory_space<vmem>>, vector<34x32xf32>
    %cst = arith.constant dense<0.000000e+00> : vector<34xf32>
    %1 = vector.multi_reduction <add>, %0, %cst [1] : vector<34x32xf32> to vector<34xf32>
    %2 = vector.shape_cast %1 : vector<34xf32> to vector<34x1xf32>
    %cst_1 = arith.constant 3.200000e+01 : f32
    %3 = vector.broadcast %cst_1 : f32 to vector<34x1xf32>
    %4 = arith.divf %2, %3 : vector<34x1xf32>
    %5 = vector.broadcast %4 : vector<34x1xf32> to vector<34x32xf32>
    %6 = arith.subf %0, %5 : vector<34x32xf32>
    %7 = arith.mulf %6, %6 : vector<34x32xf32>
    %cst_2 = arith.constant dense<0.000000e+00> : vector<34xf32>
    %8 = vector.multi_reduction <add>, %7, %cst_2 [1] : vector<34x32xf32> to vector<34xf32>
    %9 = vector.shape_cast %8 : vector<34xf32> to vector<34x1xf32>
    %cst_3 = arith.constant 3.200000e+01 : f32
    %10 = vector.broadcast %cst_3 : f32 to vector<34x1xf32>
    %11 = arith.divf %9, %10 : vector<34x1xf32>
    %cst_4 = arith.constant 9.99999974E-6 : f32
    %12 = vector.broadcast %cst_4 : f32 to vector<34x1xf32>
    %13 = arith.addf %11, %12 : vector<34x1xf32>
    %14 = math.rsqrt %13 : vector<34x1xf32>
    %15 = vector.broadcast %14 : vector<34x1xf32> to vector<34x32xf32>
    %16 = arith.mulf %6, %15 : vector<34x32xf32>
    %c0_5 = arith.constant 0 : index
    %c0_6 = arith.constant 0 : index
    %17 = vector.load %arg2[%c0_5, %c0_6] : memref<1x32xf32, #tpu.memory_space<vmem>>, vector<1x32xf32>
    %18 = vector.broadcast %17 : vector<1x32xf32> to vector<34x32xf32>
    %19 = arith.mulf %16, %18 : vector<34x32xf32>
    %c0_7 = arith.constant 0 : index
    %c0_8 = arith.constant 0 : index
    %20 = vector.load %arg3[%c0_7, %c0_8] : memref<1x32xf32, #tpu.memory_space<vmem>>, vector<1x32xf32>
    %21 = vector.broadcast %20 : vector<1x32xf32> to vector<34x32xf32>
    %22 = arith.addf %19, %21 : vector<34x32xf32>
    %c0_9 = arith.constant 0 : index
    %c0_10 = arith.constant 0 : index
    %23 = vector.load %arg4[%c0_9, %c0_10] : memref<34x32xf32, #tpu.memory_space<vmem>>, vector<34x32xf32>
    tpu.vector_store %arg4[%c0_9, %c0_10], %22 {strides = array<i32>} : memref<34x32xf32, #tpu.memory_space<vmem>>, vector<34x32xf32>,
    return
  }
  func.func @transform_0(%arg0: i32) -> (i32, i32) {
    %c0_i32 = arith.constant 0 : i32
    %c0_i32_0 = arith.constant 0 : i32
    %c0_i32_1 = arith.constant 0 : i32
    return %c0_i32, %c0_i32_0 : i32, i32
  }
  func.func @transform_1(%arg0: i32) -> (i32, i32) {
    %c0_i32 = arith.constant 0 : i32
    %c0_i32_0 = arith.constant 0 : i32
    %c0_i32_1 = arith.constant 0 : i32
    return %c0_i32, %c0_i32_0 : i32, i32
  }
  func.func @transform_2(%arg0: i32) -> (i32, i32) {
    %c0_i32 = arith.constant 0 : i32
    %c0_i32_0 = arith.constant 0 : i32
    %c0_i32_1 = arith.constant 0 : i32
    return %c0_i32, %c0_i32_0 : i32, i32
  }
  func.func @transform_3(%arg0: i32) -> (i32, i32) {
    %c0_i32 = arith.constant 0 : i32
    %c0_i32_0 = arith.constant 0 : i32
    %c0_i32_1 = arith.constant 0 : i32
    return %c0_i32, %c0_i32_0 : i32, i32
  }
}

module attributes {stable_mosaic.version = 11 : i64} {
  func.func @_block_kernel(%arg0: i32, %arg1: memref<1x17x32xf32, #tpu.memory_space<vmem>>, %arg2: memref<1x32xf32, #tpu.memory_space<vmem>>, %arg3: memref<1x32xf32, #tpu.memory_space<vmem>>, %arg4: memref<32x96xf32, #tpu.memory_space<vmem>>, %arg5: memref<1x96xf32, #tpu.memory_space<vmem>>, %arg6: memref<32x32xf32, #tpu.memory_space<vmem>>, %arg7: memref<1x32xf32, #tpu.memory_space<vmem>>, %arg8: memref<1x32xf32, #tpu.memory_space<vmem>>, %arg9: memref<1x32xf32, #tpu.memory_space<vmem>>, %arg10: memref<32x128xf32, #tpu.memory_space<vmem>>, %arg11: memref<1x128xf32, #tpu.memory_space<vmem>>, %arg12: memref<128x32xf32, #tpu.memory_space<vmem>>, %arg13: memref<1x32xf32, #tpu.memory_space<vmem>>, %arg14: memref<1x17x32xf32, #tpu.memory_space<vmem>>) attributes {dimension_semantics = [#tpu.dimension_semantics<parallel>], iteration_bounds = array<i64: 2>, scalar_prefetch = 0 : i64, scratch_operands = 0 : i64, tpu.core_type = #tpu.core_type<tc>, window_params = [{transform_indices = @transform_0, window_bounds = array<i64: 1, 17, 32>}, {pipeline_mode = #tpu.pipeline_mode<synchronous>, transform_indices = @transform_1, window_bounds = array<i64: 1, 32>}, {pipeline_mode = #tpu.pipeline_mode<synchronous>, transform_indices = @transform_2, window_bounds = array<i64: 1, 32>}, {pipeline_mode = #tpu.pipeline_mode<synchronous>, transform_indices = @transform_3, window_bounds = array<i64: 32, 96>}, {pipeline_mode = #tpu.pipeline_mode<synchronous>, transform_indices = @transform_4, window_bounds = array<i64: 1, 96>}, {pipeline_mode = #tpu.pipeline_mode<synchronous>, transform_indices = @transform_5, window_bounds = array<i64: 32, 32>}, {pipeline_mode = #tpu.pipeline_mode<synchronous>, transform_indices = @transform_6, window_bounds = array<i64: 1, 32>}, {pipeline_mode = #tpu.pipeline_mode<synchronous>, transform_indices = @transform_7, window_bounds = array<i64: 1, 32>}, {pipeline_mode = #tpu.pipeline_mode<synchronous>, transform_indices = @transform_8, window_bounds = array<i64: 1, 32>}, {pipeline_mode = #tpu.pipeline_mode<synchronous>, transform_indices = @transform_9, window_bounds = array<i64: 32, 128>}, {pipeline_mode = #tpu.pipeline_mode<synchronous>, transform_indices = @transform_10, window_bounds = array<i64: 1, 128>}, {pipeline_mode = #tpu.pipeline_mode<synchronous>, transform_indices = @transform_11, window_bounds = array<i64: 128, 32>}, {pipeline_mode = #tpu.pipeline_mode<synchronous>, transform_indices = @transform_12, window_bounds = array<i64: 1, 32>}, {transform_indices = @transform_13, window_bounds = array<i64: 1, 17, 32>}]} {
    %c0 = arith.constant 0 : index
    %c0_0 = arith.constant 0 : index
    %c0_1 = arith.constant 0 : index
    %0 = vector.load %arg1[%c0, %c0_0, %c0_1] : memref<1x17x32xf32, #tpu.memory_space<vmem>>, vector<1x17x32xf32>
    %1 = vector.shape_cast %0 : vector<1x17x32xf32> to vector<17x32xf32>
    %cst = arith.constant dense<0.000000e+00> : vector<17xf32>
    %2 = vector.multi_reduction <add>, %1, %cst [1] : vector<17x32xf32> to vector<17xf32>
    %3 = vector.shape_cast %2 : vector<17xf32> to vector<17x1xf32>
    %cst_2 = arith.constant 3.200000e+01 : f32
    %4 = vector.broadcast %cst_2 : f32 to vector<17x1xf32>
    %5 = arith.divf %3, %4 : vector<17x1xf32>
    %6 = vector.broadcast %5 : vector<17x1xf32> to vector<17x32xf32>
    %7 = arith.subf %1, %6 : vector<17x32xf32>
    %8 = arith.mulf %7, %7 : vector<17x32xf32>
    %cst_3 = arith.constant dense<0.000000e+00> : vector<17xf32>
    %9 = vector.multi_reduction <add>, %8, %cst_3 [1] : vector<17x32xf32> to vector<17xf32>
    %10 = vector.shape_cast %9 : vector<17xf32> to vector<17x1xf32>
    %cst_4 = arith.constant 3.200000e+01 : f32
    %11 = vector.broadcast %cst_4 : f32 to vector<17x1xf32>
    %12 = arith.divf %10, %11 : vector<17x1xf32>
    %cst_5 = arith.constant 9.99999974E-6 : f32
    %13 = vector.broadcast %cst_5 : f32 to vector<17x1xf32>
    %14 = arith.addf %12, %13 : vector<17x1xf32>
    %15 = math.rsqrt %14 : vector<17x1xf32>
    %16 = vector.broadcast %15 : vector<17x1xf32> to vector<17x32xf32>
    %17 = arith.mulf %7, %16 : vector<17x32xf32>
    %c0_6 = arith.constant 0 : index
    %c0_7 = arith.constant 0 : index
    %18 = vector.load %arg2[%c0_6, %c0_7] : memref<1x32xf32, #tpu.memory_space<vmem>>, vector<1x32xf32>
    %19 = vector.broadcast %18 : vector<1x32xf32> to vector<17x32xf32>
    %20 = arith.mulf %17, %19 : vector<17x32xf32>
    %c0_8 = arith.constant 0 : index
    %c0_9 = arith.constant 0 : index
    %21 = vector.load %arg3[%c0_8, %c0_9] : memref<1x32xf32, #tpu.memory_space<vmem>>, vector<1x32xf32>
    %22 = vector.broadcast %21 : vector<1x32xf32> to vector<17x32xf32>
    %23 = arith.addf %20, %22 : vector<17x32xf32>
    %24 = arith.truncf %23 : vector<17x32xf32> to vector<17x32xbf16>
    %c0_10 = arith.constant 0 : index
    %c0_11 = arith.constant 0 : index
    %25 = vector.load %arg4[%c0_10, %c0_11] : memref<32x96xf32, #tpu.memory_space<vmem>>, vector<32x96xf32>
    %26 = arith.truncf %25 : vector<32x96xf32> to vector<32x96xbf16>
    %cst_12 = arith.constant dense<0.000000e+00> : vector<17x96xf32>
    %27 = tpu.matmul %24, %26, %cst_12 {dimension_numbers = #tpu.dot_dimension_numbers<[1], [0], [0], [1], [0, 0, 1, 1], [], []>} : vector<17x32xbf16>, vector<32x96xbf16>, vector<17x96xf32> -> vector<17x96xf32>
    %c0_13 = arith.constant 0 : index
    %c0_14 = arith.constant 0 : index
    %28 = vector.load %arg5[%c0_13, %c0_14] : memref<1x96xf32, #tpu.memory_space<vmem>>, vector<1x96xf32>
    %29 = vector.broadcast %28 : vector<1x96xf32> to vector<17x96xf32>
    %30 = arith.addf %27, %29 : vector<17x96xf32>
    %31 = vector.extract_strided_slice %30 {offsets = [0, 0], sizes = [17, 16], strides = [1, 1]} : vector<17x96xf32> to vector<17x16xf32>
    %32 = vector.extract_strided_slice %30 {offsets = [0, 32], sizes = [17, 16], strides = [1, 1]} : vector<17x96xf32> to vector<17x16xf32>
    %33 = vector.extract_strided_slice %30 {offsets = [0, 64], sizes = [17, 16], strides = [1, 1]} : vector<17x96xf32> to vector<17x16xf32>
    %34 = arith.truncf %31 : vector<17x16xf32> to vector<17x16xbf16>
    %35 = arith.truncf %32 : vector<17x16xf32> to vector<17x16xbf16>
    %cst_15 = arith.constant dense<0.000000e+00> : vector<17x17xf32>
    %36 = tpu.matmul %34, %35, %cst_15 {dimension_numbers = #tpu.dot_dimension_numbers<[1], [1], [0], [0], [0, 0, 1, 0], [], []>} : vector<17x16xbf16>, vector<17x16xbf16>, vector<17x17xf32> -> vector<17x17xf32>
    %cst_16 = arith.constant 2.500000e-01 : f32
    %37 = vector.broadcast %cst_16 : f32 to vector<17x17xf32>
    %38 = arith.mulf %36, %37 : vector<17x17xf32>
    %cst_17 = arith.constant dense<0xFF800000> : vector<17xf32>
    %39 = vector.multi_reduction <maximumf>, %38, %cst_17 [1] : vector<17x17xf32> to vector<17xf32>
    %40 = vector.shape_cast %39 : vector<17xf32> to vector<17x1xf32>
    %41 = vector.broadcast %40 : vector<17x1xf32> to vector<17x17xf32>
    %42 = arith.subf %38, %41 : vector<17x17xf32>
    %43 = math.exp %42 : vector<17x17xf32>
    %cst_18 = arith.constant dense<0.000000e+00> : vector<17xf32>
    %44 = vector.multi_reduction <add>, %43, %cst_18 [1] : vector<17x17xf32> to vector<17xf32>
    %45 = vector.shape_cast %44 : vector<17xf32> to vector<17x1xf32>
    %46 = tpu.reciprocal %45 {approx = true} : vector<17x1xf32> -> vector<17x1xf32>
    %47 = vector.broadcast %46 : vector<17x1xf32> to vector<17x17xf32>
    %48 = arith.mulf %43, %47 : vector<17x17xf32>
    %49 = arith.truncf %48 : vector<17x17xf32> to vector<17x17xbf16>
    %50 = arith.truncf %33 : vector<17x16xf32> to vector<17x16xbf16>
    %cst_19 = arith.constant dense<0.000000e+00> : vector<17x16xf32>
    %51 = tpu.matmul %49, %50, %cst_19 {dimension_numbers = #tpu.dot_dimension_numbers<[1], [0], [0], [1], [0, 0, 1, 1], [], []>} : vector<17x17xbf16>, vector<17x16xbf16>, vector<17x16xf32> -> vector<17x16xf32>
    %52 = vector.extract_strided_slice %30 {offsets = [0, 16], sizes = [17, 16], strides = [1, 1]} : vector<17x96xf32> to vector<17x16xf32>
    %53 = vector.extract_strided_slice %30 {offsets = [0, 48], sizes = [17, 16], strides = [1, 1]} : vector<17x96xf32> to vector<17x16xf32>
    %54 = vector.extract_strided_slice %30 {offsets = [0, 80], sizes = [17, 16], strides = [1, 1]} : vector<17x96xf32> to vector<17x16xf32>
    %55 = arith.truncf %52 : vector<17x16xf32> to vector<17x16xbf16>
    %56 = arith.truncf %53 : vector<17x16xf32> to vector<17x16xbf16>
    %cst_20 = arith.constant dense<0.000000e+00> : vector<17x17xf32>
    %57 = tpu.matmul %55, %56, %cst_20 {dimension_numbers = #tpu.dot_dimension_numbers<[1], [1], [0], [0], [0, 0, 1, 0], [], []>} : vector<17x16xbf16>, vector<17x16xbf16>, vector<17x17xf32> -> vector<17x17xf32>
    %cst_21 = arith.constant 2.500000e-01 : f32
    %58 = vector.broadcast %cst_21 : f32 to vector<17x17xf32>
    %59 = arith.mulf %57, %58 : vector<17x17xf32>
    %cst_22 = arith.constant dense<0xFF800000> : vector<17xf32>
    %60 = vector.multi_reduction <maximumf>, %59, %cst_22 [1] : vector<17x17xf32> to vector<17xf32>
    %61 = vector.shape_cast %60 : vector<17xf32> to vector<17x1xf32>
    %62 = vector.broadcast %61 : vector<17x1xf32> to vector<17x17xf32>
    %63 = arith.subf %59, %62 : vector<17x17xf32>
    %64 = math.exp %63 : vector<17x17xf32>
    %cst_23 = arith.constant dense<0.000000e+00> : vector<17xf32>
    %65 = vector.multi_reduction <add>, %64, %cst_23 [1] : vector<17x17xf32> to vector<17xf32>
    %66 = vector.shape_cast %65 : vector<17xf32> to vector<17x1xf32>
    %67 = tpu.reciprocal %66 {approx = true} : vector<17x1xf32> -> vector<17x1xf32>
    %68 = vector.broadcast %67 : vector<17x1xf32> to vector<17x17xf32>
    %69 = arith.mulf %64, %68 : vector<17x17xf32>
    %70 = arith.truncf %69 : vector<17x17xf32> to vector<17x17xbf16>
    %71 = arith.truncf %54 : vector<17x16xf32> to vector<17x16xbf16>
    %cst_24 = arith.constant dense<0.000000e+00> : vector<17x16xf32>
    %72 = tpu.matmul %70, %71, %cst_24 {dimension_numbers = #tpu.dot_dimension_numbers<[1], [0], [0], [1], [0, 0, 1, 1], [], []>} : vector<17x17xbf16>, vector<17x16xbf16>, vector<17x16xf32> -> vector<17x16xf32>
    %73 = tpu.concatenate %51, %72 in 1 : vector<17x16xf32>, vector<17x16xf32> -> vector<17x32xf32>
    %74 = arith.truncf %73 : vector<17x32xf32> to vector<17x32xbf16>
    %c0_25 = arith.constant 0 : index
    %c0_26 = arith.constant 0 : index
    %75 = vector.load %arg6[%c0_25, %c0_26] : memref<32x32xf32, #tpu.memory_space<vmem>>, vector<32x32xf32>
    %76 = arith.truncf %75 : vector<32x32xf32> to vector<32x32xbf16>
    %cst_27 = arith.constant dense<0.000000e+00> : vector<17x32xf32>
    %77 = tpu.matmul %74, %76, %cst_27 {dimension_numbers = #tpu.dot_dimension_numbers<[1], [0], [0], [1], [0, 0, 1, 1], [], []>} : vector<17x32xbf16>, vector<32x32xbf16>, vector<17x32xf32> -> vector<17x32xf32>
    %c0_28 = arith.constant 0 : index
    %c0_29 = arith.constant 0 : index
    %78 = vector.load %arg7[%c0_28, %c0_29] : memref<1x32xf32, #tpu.memory_space<vmem>>, vector<1x32xf32>
    %79 = vector.broadcast %78 : vector<1x32xf32> to vector<17x32xf32>
    %80 = arith.addf %77, %79 : vector<17x32xf32>
    %81 = arith.addf %1, %80 : vector<17x32xf32>
    %cst_30 = arith.constant dense<0.000000e+00> : vector<17xf32>
    %82 = vector.multi_reduction <add>, %81, %cst_30 [1] : vector<17x32xf32> to vector<17xf32>
    %83 = vector.shape_cast %82 : vector<17xf32> to vector<17x1xf32>
    %cst_31 = arith.constant 3.200000e+01 : f32
    %84 = vector.broadcast %cst_31 : f32 to vector<17x1xf32>
    %85 = arith.divf %83, %84 : vector<17x1xf32>
    %86 = vector.broadcast %85 : vector<17x1xf32> to vector<17x32xf32>
    %87 = arith.subf %81, %86 : vector<17x32xf32>
    %88 = arith.mulf %87, %87 : vector<17x32xf32>
    %cst_32 = arith.constant dense<0.000000e+00> : vector<17xf32>
    %89 = vector.multi_reduction <add>, %88, %cst_32 [1] : vector<17x32xf32> to vector<17xf32>
    %90 = vector.shape_cast %89 : vector<17xf32> to vector<17x1xf32>
    %cst_33 = arith.constant 3.200000e+01 : f32
    %91 = vector.broadcast %cst_33 : f32 to vector<17x1xf32>
    %92 = arith.divf %90, %91 : vector<17x1xf32>
    %cst_34 = arith.constant 9.99999974E-6 : f32
    %93 = vector.broadcast %cst_34 : f32 to vector<17x1xf32>
    %94 = arith.addf %92, %93 : vector<17x1xf32>
    %95 = math.rsqrt %94 : vector<17x1xf32>
    %96 = vector.broadcast %95 : vector<17x1xf32> to vector<17x32xf32>
    %97 = arith.mulf %87, %96 : vector<17x32xf32>
    %c0_35 = arith.constant 0 : index
    %c0_36 = arith.constant 0 : index
    %98 = vector.load %arg8[%c0_35, %c0_36] : memref<1x32xf32, #tpu.memory_space<vmem>>, vector<1x32xf32>
    %99 = vector.broadcast %98 : vector<1x32xf32> to vector<17x32xf32>
    %100 = arith.mulf %97, %99 : vector<17x32xf32>
    %c0_37 = arith.constant 0 : index
    %c0_38 = arith.constant 0 : index
    %101 = vector.load %arg9[%c0_37, %c0_38] : memref<1x32xf32, #tpu.memory_space<vmem>>, vector<1x32xf32>
    %102 = vector.broadcast %101 : vector<1x32xf32> to vector<17x32xf32>
    %103 = arith.addf %100, %102 : vector<17x32xf32>
    %104 = arith.truncf %103 : vector<17x32xf32> to vector<17x32xbf16>
    %c0_39 = arith.constant 0 : index
    %c0_40 = arith.constant 0 : index
    %105 = vector.load %arg10[%c0_39, %c0_40] : memref<32x128xf32, #tpu.memory_space<vmem>>, vector<32x128xf32>
    %106 = arith.truncf %105 : vector<32x128xf32> to vector<32x128xbf16>
    %cst_41 = arith.constant dense<0.000000e+00> : vector<17x128xf32>
    %107 = tpu.matmul %104, %106, %cst_41 {dimension_numbers = #tpu.dot_dimension_numbers<[1], [0], [0], [1], [0, 0, 1, 1], [], []>} : vector<17x32xbf16>, vector<32x128xbf16>, vector<17x128xf32> -> vector<17x128xf32>
    %c0_42 = arith.constant 0 : index
    %c0_43 = arith.constant 0 : index
    %108 = vector.load %arg11[%c0_42, %c0_43] : memref<1x128xf32, #tpu.memory_space<vmem>>, vector<1x128xf32>
    %109 = vector.broadcast %108 : vector<1x128xf32> to vector<17x128xf32>
    %110 = arith.addf %107, %109 : vector<17x128xf32>
    %111 = arith.mulf %110, %110 : vector<17x128xf32>
    %112 = arith.mulf %110, %111 : vector<17x128xf32>
    %cst_44 = arith.constant 4.471500e-02 : f32
    %113 = vector.broadcast %cst_44 : f32 to vector<17x128xf32>
    %114 = arith.mulf %113, %112 : vector<17x128xf32>
    %115 = arith.addf %110, %114 : vector<17x128xf32>
    %cst_45 = arith.constant 0.797884583 : f32
    %116 = vector.broadcast %cst_45 : f32 to vector<17x128xf32>
    %117 = arith.mulf %116, %115 : vector<17x128xf32>
    %118 = math.tanh %117 : vector<17x128xf32>
    %cst_46 = arith.constant 1.000000e+00 : f32
    %119 = vector.broadcast %cst_46 : f32 to vector<17x128xf32>
    %120 = arith.addf %119, %118 : vector<17x128xf32>
    %cst_47 = arith.constant 5.000000e-01 : f32
    %121 = vector.broadcast %cst_47 : f32 to vector<17x128xf32>
    %122 = arith.mulf %121, %120 : vector<17x128xf32>
    %123 = arith.mulf %110, %122 : vector<17x128xf32>
    %124 = arith.truncf %123 : vector<17x128xf32> to vector<17x128xbf16>
    %c0_48 = arith.constant 0 : index
    %c0_49 = arith.constant 0 : index
    %125 = vector.load %arg12[%c0_48, %c0_49] : memref<128x32xf32, #tpu.memory_space<vmem>>, vector<128x32xf32>
    %126 = arith.truncf %125 : vector<128x32xf32> to vector<128x32xbf16>
    %cst_50 = arith.constant dense<0.000000e+00> : vector<17x32xf32>
    %127 = tpu.matmul %124, %126, %cst_50 {dimension_numbers = #tpu.dot_dimension_numbers<[1], [0], [0], [1], [0, 0, 1, 1], [], []>} : vector<17x128xbf16>, vector<128x32xbf16>, vector<17x32xf32> -> vector<17x32xf32>
    %c0_51 = arith.constant 0 : index
    %c0_52 = arith.constant 0 : index
    %128 = vector.load %arg13[%c0_51, %c0_52] : memref<1x32xf32, #tpu.memory_space<vmem>>, vector<1x32xf32>
    %129 = vector.broadcast %128 : vector<1x32xf32> to vector<17x32xf32>
    %130 = arith.addf %127, %129 : vector<17x32xf32>
    %131 = arith.addf %81, %130 : vector<17x32xf32>
    %c0_53 = arith.constant 0 : index
    %c0_54 = arith.constant 0 : index
    %c0_55 = arith.constant 0 : index
    %132 = vector.load %arg14[%c0_53, %c0_54, %c0_55] : memref<1x17x32xf32, #tpu.memory_space<vmem>>, vector<1x17x32xf32>
    %133 = vector.shape_cast %132 : vector<1x17x32xf32> to vector<17x32xf32>
    %134 = vector.shape_cast %131 : vector<17x32xf32> to vector<1x17x32xf32>
    tpu.vector_store %arg14[%c0_53, %c0_54, %c0_55], %134 {strides = array<i32>} : memref<1x17x32xf32, #tpu.memory_space<vmem>>, vector<1x17x32xf32>,
    return
  }
  func.func @transform_0(%arg0: i32) -> (i32, i32, i32) {
    %c0_i32 = arith.constant 0 : i32
    %c0_i32_0 = arith.constant 0 : i32
    %c0_i32_1 = arith.constant 0 : i32
    return %arg0, %c0_i32, %c0_i32_0 : i32, i32, i32
  }
  func.func @transform_1(%arg0: i32) -> (i32, i32) {
    %c0_i32 = arith.constant 0 : i32
    %c0_i32_0 = arith.constant 0 : i32
    %c0_i32_1 = arith.constant 0 : i32
    return %c0_i32, %c0_i32_0 : i32, i32
  }
  func.func @transform_2(%arg0: i32) -> (i32, i32) {
    %c0_i32 = arith.constant 0 : i32
    %c0_i32_0 = arith.constant 0 : i32
    %c0_i32_1 = arith.constant 0 : i32
    return %c0_i32, %c0_i32_0 : i32, i32
  }
  func.func @transform_3(%arg0: i32) -> (i32, i32) {
    %c0_i32 = arith.constant 0 : i32
    %c0_i32_0 = arith.constant 0 : i32
    %c0_i32_1 = arith.constant 0 : i32
    return %c0_i32, %c0_i32_0 : i32, i32
  }
  func.func @transform_4(%arg0: i32) -> (i32, i32) {
    %c0_i32 = arith.constant 0 : i32
    %c0_i32_0 = arith.constant 0 : i32
    %c0_i32_1 = arith.constant 0 : i32
    return %c0_i32, %c0_i32_0 : i32, i32
  }
  func.func @transform_5(%arg0: i32) -> (i32, i32) {
    %c0_i32 = arith.constant 0 : i32
    %c0_i32_0 = arith.constant 0 : i32
    %c0_i32_1 = arith.constant 0 : i32
    return %c0_i32, %c0_i32_0 : i32, i32
  }
  func.func @transform_6(%arg0: i32) -> (i32, i32) {
    %c0_i32 = arith.constant 0 : i32
    %c0_i32_0 = arith.constant 0 : i32
    %c0_i32_1 = arith.constant 0 : i32
    return %c0_i32, %c0_i32_0 : i32, i32
  }
  func.func @transform_7(%arg0: i32) -> (i32, i32) {
    %c0_i32 = arith.constant 0 : i32
    %c0_i32_0 = arith.constant 0 : i32
    %c0_i32_1 = arith.constant 0 : i32
    return %c0_i32, %c0_i32_0 : i32, i32
  }
  func.func @transform_8(%arg0: i32) -> (i32, i32) {
    %c0_i32 = arith.constant 0 : i32
    %c0_i32_0 = arith.constant 0 : i32
    %c0_i32_1 = arith.constant 0 : i32
    return %c0_i32, %c0_i32_0 : i32, i32
  }
  func.func @transform_9(%arg0: i32) -> (i32, i32) {
    %c0_i32 = arith.constant 0 : i32
    %c0_i32_0 = arith.constant 0 : i32
    %c0_i32_1 = arith.constant 0 : i32
    return %c0_i32, %c0_i32_0 : i32, i32
  }
  func.func @transform_10(%arg0: i32) -> (i32, i32) {
    %c0_i32 = arith.constant 0 : i32
    %c0_i32_0 = arith.constant 0 : i32
    %c0_i32_1 = arith.constant 0 : i32
    return %c0_i32, %c0_i32_0 : i32, i32
  }
  func.func @transform_11(%arg0: i32) -> (i32, i32) {
    %c0_i32 = arith.constant 0 : i32
    %c0_i32_0 = arith.constant 0 : i32
    %c0_i32_1 = arith.constant 0 : i32
    return %c0_i32, %c0_i32_0 : i32, i32
  }
  func.func @transform_12(%arg0: i32) -> (i32, i32) {
    %c0_i32 = arith.constant 0 : i32
    %c0_i32_0 = arith.constant 0 : i32
    %c0_i32_1 = arith.constant 0 : i32
    return %c0_i32, %c0_i32_0 : i32, i32
  }
  func.func @transform_13(%arg0: i32) -> (i32, i32, i32) {
    %c0_i32 = arith.constant 0 : i32
    %c0_i32_0 = arith.constant 0 : i32
    %c0_i32_1 = arith.constant 0 : i32
    return %arg0, %c0_i32, %c0_i32_0 : i32, i32, i32
  }
}

module attributes {stable_mosaic.version = 11 : i64} {
  func.func @_block_kernel(%arg0: i32, %arg1: memref<1x65x32xf32, #tpu.memory_space<vmem>>, %arg2: memref<1x32xf32, #tpu.memory_space<vmem>>, %arg3: memref<1x32xf32, #tpu.memory_space<vmem>>, %arg4: memref<32x96xf32, #tpu.memory_space<vmem>>, %arg5: memref<1x96xf32, #tpu.memory_space<vmem>>, %arg6: memref<32x32xf32, #tpu.memory_space<vmem>>, %arg7: memref<1x32xf32, #tpu.memory_space<vmem>>, %arg8: memref<1x32xf32, #tpu.memory_space<vmem>>, %arg9: memref<1x32xf32, #tpu.memory_space<vmem>>, %arg10: memref<32x128xf32, #tpu.memory_space<vmem>>, %arg11: memref<1x128xf32, #tpu.memory_space<vmem>>, %arg12: memref<128x32xf32, #tpu.memory_space<vmem>>, %arg13: memref<1x32xf32, #tpu.memory_space<vmem>>, %arg14: memref<1x65x32xf32, #tpu.memory_space<vmem>>) attributes {dimension_semantics = [#tpu.dimension_semantics<parallel>], iteration_bounds = array<i64: 2>, scalar_prefetch = 0 : i64, scratch_operands = 0 : i64, tpu.core_type = #tpu.core_type<tc>, window_params = [{transform_indices = @transform_0, window_bounds = array<i64: 1, 65, 32>}, {pipeline_mode = #tpu.pipeline_mode<synchronous>, transform_indices = @transform_1, window_bounds = array<i64: 1, 32>}, {pipeline_mode = #tpu.pipeline_mode<synchronous>, transform_indices = @transform_2, window_bounds = array<i64: 1, 32>}, {pipeline_mode = #tpu.pipeline_mode<synchronous>, transform_indices = @transform_3, window_bounds = array<i64: 32, 96>}, {pipeline_mode = #tpu.pipeline_mode<synchronous>, transform_indices = @transform_4, window_bounds = array<i64: 1, 96>}, {pipeline_mode = #tpu.pipeline_mode<synchronous>, transform_indices = @transform_5, window_bounds = array<i64: 32, 32>}, {pipeline_mode = #tpu.pipeline_mode<synchronous>, transform_indices = @transform_6, window_bounds = array<i64: 1, 32>}, {pipeline_mode = #tpu.pipeline_mode<synchronous>, transform_indices = @transform_7, window_bounds = array<i64: 1, 32>}, {pipeline_mode = #tpu.pipeline_mode<synchronous>, transform_indices = @transform_8, window_bounds = array<i64: 1, 32>}, {pipeline_mode = #tpu.pipeline_mode<synchronous>, transform_indices = @transform_9, window_bounds = array<i64: 32, 128>}, {pipeline_mode = #tpu.pipeline_mode<synchronous>, transform_indices = @transform_10, window_bounds = array<i64: 1, 128>}, {pipeline_mode = #tpu.pipeline_mode<synchronous>, transform_indices = @transform_11, window_bounds = array<i64: 128, 32>}, {pipeline_mode = #tpu.pipeline_mode<synchronous>, transform_indices = @transform_12, window_bounds = array<i64: 1, 32>}, {transform_indices = @transform_13, window_bounds = array<i64: 1, 65, 32>}]} {
    %c0 = arith.constant 0 : index
    %c0_0 = arith.constant 0 : index
    %c0_1 = arith.constant 0 : index
    %0 = vector.load %arg1[%c0, %c0_0, %c0_1] : memref<1x65x32xf32, #tpu.memory_space<vmem>>, vector<1x65x32xf32>
    %1 = vector.shape_cast %0 : vector<1x65x32xf32> to vector<65x32xf32>
    %cst = arith.constant dense<0.000000e+00> : vector<65xf32>
    %2 = vector.multi_reduction <add>, %1, %cst [1] : vector<65x32xf32> to vector<65xf32>
    %3 = vector.shape_cast %2 : vector<65xf32> to vector<65x1xf32>
    %cst_2 = arith.constant 3.200000e+01 : f32
    %4 = vector.broadcast %cst_2 : f32 to vector<65x1xf32>
    %5 = arith.divf %3, %4 : vector<65x1xf32>
    %6 = vector.broadcast %5 : vector<65x1xf32> to vector<65x32xf32>
    %7 = arith.subf %1, %6 : vector<65x32xf32>
    %8 = arith.mulf %7, %7 : vector<65x32xf32>
    %cst_3 = arith.constant dense<0.000000e+00> : vector<65xf32>
    %9 = vector.multi_reduction <add>, %8, %cst_3 [1] : vector<65x32xf32> to vector<65xf32>
    %10 = vector.shape_cast %9 : vector<65xf32> to vector<65x1xf32>
    %cst_4 = arith.constant 3.200000e+01 : f32
    %11 = vector.broadcast %cst_4 : f32 to vector<65x1xf32>
    %12 = arith.divf %10, %11 : vector<65x1xf32>
    %cst_5 = arith.constant 9.99999974E-6 : f32
    %13 = vector.broadcast %cst_5 : f32 to vector<65x1xf32>
    %14 = arith.addf %12, %13 : vector<65x1xf32>
    %15 = math.rsqrt %14 : vector<65x1xf32>
    %16 = vector.broadcast %15 : vector<65x1xf32> to vector<65x32xf32>
    %17 = arith.mulf %7, %16 : vector<65x32xf32>
    %c0_6 = arith.constant 0 : index
    %c0_7 = arith.constant 0 : index
    %18 = vector.load %arg2[%c0_6, %c0_7] : memref<1x32xf32, #tpu.memory_space<vmem>>, vector<1x32xf32>
    %19 = vector.broadcast %18 : vector<1x32xf32> to vector<65x32xf32>
    %20 = arith.mulf %17, %19 : vector<65x32xf32>
    %c0_8 = arith.constant 0 : index
    %c0_9 = arith.constant 0 : index
    %21 = vector.load %arg3[%c0_8, %c0_9] : memref<1x32xf32, #tpu.memory_space<vmem>>, vector<1x32xf32>
    %22 = vector.broadcast %21 : vector<1x32xf32> to vector<65x32xf32>
    %23 = arith.addf %20, %22 : vector<65x32xf32>
    %24 = arith.truncf %23 : vector<65x32xf32> to vector<65x32xbf16>
    %c0_10 = arith.constant 0 : index
    %c0_11 = arith.constant 0 : index
    %25 = vector.load %arg4[%c0_10, %c0_11] : memref<32x96xf32, #tpu.memory_space<vmem>>, vector<32x96xf32>
    %26 = arith.truncf %25 : vector<32x96xf32> to vector<32x96xbf16>
    %cst_12 = arith.constant dense<0.000000e+00> : vector<65x96xf32>
    %27 = tpu.matmul %24, %26, %cst_12 {dimension_numbers = #tpu.dot_dimension_numbers<[1], [0], [0], [1], [0, 0, 1, 1], [], []>} : vector<65x32xbf16>, vector<32x96xbf16>, vector<65x96xf32> -> vector<65x96xf32>
    %c0_13 = arith.constant 0 : index
    %c0_14 = arith.constant 0 : index
    %28 = vector.load %arg5[%c0_13, %c0_14] : memref<1x96xf32, #tpu.memory_space<vmem>>, vector<1x96xf32>
    %29 = vector.broadcast %28 : vector<1x96xf32> to vector<65x96xf32>
    %30 = arith.addf %27, %29 : vector<65x96xf32>
    %31 = vector.extract_strided_slice %30 {offsets = [0, 0], sizes = [65, 16], strides = [1, 1]} : vector<65x96xf32> to vector<65x16xf32>
    %32 = vector.extract_strided_slice %30 {offsets = [0, 32], sizes = [65, 16], strides = [1, 1]} : vector<65x96xf32> to vector<65x16xf32>
    %33 = vector.extract_strided_slice %30 {offsets = [0, 64], sizes = [65, 16], strides = [1, 1]} : vector<65x96xf32> to vector<65x16xf32>
    %34 = arith.truncf %31 : vector<65x16xf32> to vector<65x16xbf16>
    %35 = arith.truncf %32 : vector<65x16xf32> to vector<65x16xbf16>
    %cst_15 = arith.constant dense<0.000000e+00> : vector<65x65xf32>
    %36 = tpu.matmul %34, %35, %cst_15 {dimension_numbers = #tpu.dot_dimension_numbers<[1], [1], [0], [0], [0, 0, 1, 0], [], []>} : vector<65x16xbf16>, vector<65x16xbf16>, vector<65x65xf32> -> vector<65x65xf32>
    %cst_16 = arith.constant 2.500000e-01 : f32
    %37 = vector.broadcast %cst_16 : f32 to vector<65x65xf32>
    %38 = arith.mulf %36, %37 : vector<65x65xf32>
    %cst_17 = arith.constant dense<0xFF800000> : vector<65xf32>
    %39 = vector.multi_reduction <maximumf>, %38, %cst_17 [1] : vector<65x65xf32> to vector<65xf32>
    %40 = vector.shape_cast %39 : vector<65xf32> to vector<65x1xf32>
    %41 = vector.broadcast %40 : vector<65x1xf32> to vector<65x65xf32>
    %42 = arith.subf %38, %41 : vector<65x65xf32>
    %43 = math.exp %42 : vector<65x65xf32>
    %cst_18 = arith.constant dense<0.000000e+00> : vector<65xf32>
    %44 = vector.multi_reduction <add>, %43, %cst_18 [1] : vector<65x65xf32> to vector<65xf32>
    %45 = vector.shape_cast %44 : vector<65xf32> to vector<65x1xf32>
    %46 = tpu.reciprocal %45 {approx = true} : vector<65x1xf32> -> vector<65x1xf32>
    %47 = vector.broadcast %46 : vector<65x1xf32> to vector<65x65xf32>
    %48 = arith.mulf %43, %47 : vector<65x65xf32>
    %49 = arith.truncf %48 : vector<65x65xf32> to vector<65x65xbf16>
    %50 = arith.truncf %33 : vector<65x16xf32> to vector<65x16xbf16>
    %cst_19 = arith.constant dense<0.000000e+00> : vector<65x16xf32>
    %51 = tpu.matmul %49, %50, %cst_19 {dimension_numbers = #tpu.dot_dimension_numbers<[1], [0], [0], [1], [0, 0, 1, 1], [], []>} : vector<65x65xbf16>, vector<65x16xbf16>, vector<65x16xf32> -> vector<65x16xf32>
    %52 = vector.extract_strided_slice %30 {offsets = [0, 16], sizes = [65, 16], strides = [1, 1]} : vector<65x96xf32> to vector<65x16xf32>
    %53 = vector.extract_strided_slice %30 {offsets = [0, 48], sizes = [65, 16], strides = [1, 1]} : vector<65x96xf32> to vector<65x16xf32>
    %54 = vector.extract_strided_slice %30 {offsets = [0, 80], sizes = [65, 16], strides = [1, 1]} : vector<65x96xf32> to vector<65x16xf32>
    %55 = arith.truncf %52 : vector<65x16xf32> to vector<65x16xbf16>
    %56 = arith.truncf %53 : vector<65x16xf32> to vector<65x16xbf16>
    %cst_20 = arith.constant dense<0.000000e+00> : vector<65x65xf32>
    %57 = tpu.matmul %55, %56, %cst_20 {dimension_numbers = #tpu.dot_dimension_numbers<[1], [1], [0], [0], [0, 0, 1, 0], [], []>} : vector<65x16xbf16>, vector<65x16xbf16>, vector<65x65xf32> -> vector<65x65xf32>
    %cst_21 = arith.constant 2.500000e-01 : f32
    %58 = vector.broadcast %cst_21 : f32 to vector<65x65xf32>
    %59 = arith.mulf %57, %58 : vector<65x65xf32>
    %cst_22 = arith.constant dense<0xFF800000> : vector<65xf32>
    %60 = vector.multi_reduction <maximumf>, %59, %cst_22 [1] : vector<65x65xf32> to vector<65xf32>
    %61 = vector.shape_cast %60 : vector<65xf32> to vector<65x1xf32>
    %62 = vector.broadcast %61 : vector<65x1xf32> to vector<65x65xf32>
    %63 = arith.subf %59, %62 : vector<65x65xf32>
    %64 = math.exp %63 : vector<65x65xf32>
    %cst_23 = arith.constant dense<0.000000e+00> : vector<65xf32>
    %65 = vector.multi_reduction <add>, %64, %cst_23 [1] : vector<65x65xf32> to vector<65xf32>
    %66 = vector.shape_cast %65 : vector<65xf32> to vector<65x1xf32>
    %67 = tpu.reciprocal %66 {approx = true} : vector<65x1xf32> -> vector<65x1xf32>
    %68 = vector.broadcast %67 : vector<65x1xf32> to vector<65x65xf32>
    %69 = arith.mulf %64, %68 : vector<65x65xf32>
    %70 = arith.truncf %69 : vector<65x65xf32> to vector<65x65xbf16>
    %71 = arith.truncf %54 : vector<65x16xf32> to vector<65x16xbf16>
    %cst_24 = arith.constant dense<0.000000e+00> : vector<65x16xf32>
    %72 = tpu.matmul %70, %71, %cst_24 {dimension_numbers = #tpu.dot_dimension_numbers<[1], [0], [0], [1], [0, 0, 1, 1], [], []>} : vector<65x65xbf16>, vector<65x16xbf16>, vector<65x16xf32> -> vector<65x16xf32>
    %73 = tpu.concatenate %51, %72 in 1 : vector<65x16xf32>, vector<65x16xf32> -> vector<65x32xf32>
    %74 = arith.truncf %73 : vector<65x32xf32> to vector<65x32xbf16>
    %c0_25 = arith.constant 0 : index
    %c0_26 = arith.constant 0 : index
    %75 = vector.load %arg6[%c0_25, %c0_26] : memref<32x32xf32, #tpu.memory_space<vmem>>, vector<32x32xf32>
    %76 = arith.truncf %75 : vector<32x32xf32> to vector<32x32xbf16>
    %cst_27 = arith.constant dense<0.000000e+00> : vector<65x32xf32>
    %77 = tpu.matmul %74, %76, %cst_27 {dimension_numbers = #tpu.dot_dimension_numbers<[1], [0], [0], [1], [0, 0, 1, 1], [], []>} : vector<65x32xbf16>, vector<32x32xbf16>, vector<65x32xf32> -> vector<65x32xf32>
    %c0_28 = arith.constant 0 : index
    %c0_29 = arith.constant 0 : index
    %78 = vector.load %arg7[%c0_28, %c0_29] : memref<1x32xf32, #tpu.memory_space<vmem>>, vector<1x32xf32>
    %79 = vector.broadcast %78 : vector<1x32xf32> to vector<65x32xf32>
    %80 = arith.addf %77, %79 : vector<65x32xf32>
    %81 = arith.addf %1, %80 : vector<65x32xf32>
    %cst_30 = arith.constant dense<0.000000e+00> : vector<65xf32>
    %82 = vector.multi_reduction <add>, %81, %cst_30 [1] : vector<65x32xf32> to vector<65xf32>
    %83 = vector.shape_cast %82 : vector<65xf32> to vector<65x1xf32>
    %cst_31 = arith.constant 3.200000e+01 : f32
    %84 = vector.broadcast %cst_31 : f32 to vector<65x1xf32>
    %85 = arith.divf %83, %84 : vector<65x1xf32>
    %86 = vector.broadcast %85 : vector<65x1xf32> to vector<65x32xf32>
    %87 = arith.subf %81, %86 : vector<65x32xf32>
    %88 = arith.mulf %87, %87 : vector<65x32xf32>
    %cst_32 = arith.constant dense<0.000000e+00> : vector<65xf32>
    %89 = vector.multi_reduction <add>, %88, %cst_32 [1] : vector<65x32xf32> to vector<65xf32>
    %90 = vector.shape_cast %89 : vector<65xf32> to vector<65x1xf32>
    %cst_33 = arith.constant 3.200000e+01 : f32
    %91 = vector.broadcast %cst_33 : f32 to vector<65x1xf32>
    %92 = arith.divf %90, %91 : vector<65x1xf32>
    %cst_34 = arith.constant 9.99999974E-6 : f32
    %93 = vector.broadcast %cst_34 : f32 to vector<65x1xf32>
    %94 = arith.addf %92, %93 : vector<65x1xf32>
    %95 = math.rsqrt %94 : vector<65x1xf32>
    %96 = vector.broadcast %95 : vector<65x1xf32> to vector<65x32xf32>
    %97 = arith.mulf %87, %96 : vector<65x32xf32>
    %c0_35 = arith.constant 0 : index
    %c0_36 = arith.constant 0 : index
    %98 = vector.load %arg8[%c0_35, %c0_36] : memref<1x32xf32, #tpu.memory_space<vmem>>, vector<1x32xf32>
    %99 = vector.broadcast %98 : vector<1x32xf32> to vector<65x32xf32>
    %100 = arith.mulf %97, %99 : vector<65x32xf32>
    %c0_37 = arith.constant 0 : index
    %c0_38 = arith.constant 0 : index
    %101 = vector.load %arg9[%c0_37, %c0_38] : memref<1x32xf32, #tpu.memory_space<vmem>>, vector<1x32xf32>
    %102 = vector.broadcast %101 : vector<1x32xf32> to vector<65x32xf32>
    %103 = arith.addf %100, %102 : vector<65x32xf32>
    %104 = arith.truncf %103 : vector<65x32xf32> to vector<65x32xbf16>
    %c0_39 = arith.constant 0 : index
    %c0_40 = arith.constant 0 : index
    %105 = vector.load %arg10[%c0_39, %c0_40] : memref<32x128xf32, #tpu.memory_space<vmem>>, vector<32x128xf32>
    %106 = arith.truncf %105 : vector<32x128xf32> to vector<32x128xbf16>
    %cst_41 = arith.constant dense<0.000000e+00> : vector<65x128xf32>
    %107 = tpu.matmul %104, %106, %cst_41 {dimension_numbers = #tpu.dot_dimension_numbers<[1], [0], [0], [1], [0, 0, 1, 1], [], []>} : vector<65x32xbf16>, vector<32x128xbf16>, vector<65x128xf32> -> vector<65x128xf32>
    %c0_42 = arith.constant 0 : index
    %c0_43 = arith.constant 0 : index
    %108 = vector.load %arg11[%c0_42, %c0_43] : memref<1x128xf32, #tpu.memory_space<vmem>>, vector<1x128xf32>
    %109 = vector.broadcast %108 : vector<1x128xf32> to vector<65x128xf32>
    %110 = arith.addf %107, %109 : vector<65x128xf32>
    %111 = arith.mulf %110, %110 : vector<65x128xf32>
    %112 = arith.mulf %110, %111 : vector<65x128xf32>
    %cst_44 = arith.constant 4.471500e-02 : f32
    %113 = vector.broadcast %cst_44 : f32 to vector<65x128xf32>
    %114 = arith.mulf %113, %112 : vector<65x128xf32>
    %115 = arith.addf %110, %114 : vector<65x128xf32>
    %cst_45 = arith.constant 0.797884583 : f32
    %116 = vector.broadcast %cst_45 : f32 to vector<65x128xf32>
    %117 = arith.mulf %116, %115 : vector<65x128xf32>
    %118 = math.tanh %117 : vector<65x128xf32>
    %cst_46 = arith.constant 1.000000e+00 : f32
    %119 = vector.broadcast %cst_46 : f32 to vector<65x128xf32>
    %120 = arith.addf %119, %118 : vector<65x128xf32>
    %cst_47 = arith.constant 5.000000e-01 : f32
    %121 = vector.broadcast %cst_47 : f32 to vector<65x128xf32>
    %122 = arith.mulf %121, %120 : vector<65x128xf32>
    %123 = arith.mulf %110, %122 : vector<65x128xf32>
    %124 = arith.truncf %123 : vector<65x128xf32> to vector<65x128xbf16>
    %c0_48 = arith.constant 0 : index
    %c0_49 = arith.constant 0 : index
    %125 = vector.load %arg12[%c0_48, %c0_49] : memref<128x32xf32, #tpu.memory_space<vmem>>, vector<128x32xf32>
    %126 = arith.truncf %125 : vector<128x32xf32> to vector<128x32xbf16>
    %cst_50 = arith.constant dense<0.000000e+00> : vector<65x32xf32>
    %127 = tpu.matmul %124, %126, %cst_50 {dimension_numbers = #tpu.dot_dimension_numbers<[1], [0], [0], [1], [0, 0, 1, 1], [], []>} : vector<65x128xbf16>, vector<128x32xbf16>, vector<65x32xf32> -> vector<65x32xf32>
    %c0_51 = arith.constant 0 : index
    %c0_52 = arith.constant 0 : index
    %128 = vector.load %arg13[%c0_51, %c0_52] : memref<1x32xf32, #tpu.memory_space<vmem>>, vector<1x32xf32>
    %129 = vector.broadcast %128 : vector<1x32xf32> to vector<65x32xf32>
    %130 = arith.addf %127, %129 : vector<65x32xf32>
    %131 = arith.addf %81, %130 : vector<65x32xf32>
    %c0_53 = arith.constant 0 : index
    %c0_54 = arith.constant 0 : index
    %c0_55 = arith.constant 0 : index
    %132 = vector.load %arg14[%c0_53, %c0_54, %c0_55] : memref<1x65x32xf32, #tpu.memory_space<vmem>>, vector<1x65x32xf32>
    %133 = vector.shape_cast %132 : vector<1x65x32xf32> to vector<65x32xf32>
    %134 = vector.shape_cast %131 : vector<65x32xf32> to vector<1x65x32xf32>
    tpu.vector_store %arg14[%c0_53, %c0_54, %c0_55], %134 {strides = array<i32>} : memref<1x65x32xf32, #tpu.memory_space<vmem>>, vector<1x65x32xf32>,
    return
  }
  func.func @transform_0(%arg0: i32) -> (i32, i32, i32) {
    %c0_i32 = arith.constant 0 : i32
    %c0_i32_0 = arith.constant 0 : i32
    %c0_i32_1 = arith.constant 0 : i32
    return %arg0, %c0_i32, %c0_i32_0 : i32, i32, i32
  }
  func.func @transform_1(%arg0: i32) -> (i32, i32) {
    %c0_i32 = arith.constant 0 : i32
    %c0_i32_0 = arith.constant 0 : i32
    %c0_i32_1 = arith.constant 0 : i32
    return %c0_i32, %c0_i32_0 : i32, i32
  }
  func.func @transform_2(%arg0: i32) -> (i32, i32) {
    %c0_i32 = arith.constant 0 : i32
    %c0_i32_0 = arith.constant 0 : i32
    %c0_i32_1 = arith.constant 0 : i32
    return %c0_i32, %c0_i32_0 : i32, i32
  }
  func.func @transform_3(%arg0: i32) -> (i32, i32) {
    %c0_i32 = arith.constant 0 : i32
    %c0_i32_0 = arith.constant 0 : i32
    %c0_i32_1 = arith.constant 0 : i32
    return %c0_i32, %c0_i32_0 : i32, i32
  }
  func.func @transform_4(%arg0: i32) -> (i32, i32) {
    %c0_i32 = arith.constant 0 : i32
    %c0_i32_0 = arith.constant 0 : i32
    %c0_i32_1 = arith.constant 0 : i32
    return %c0_i32, %c0_i32_0 : i32, i32
  }
  func.func @transform_5(%arg0: i32) -> (i32, i32) {
    %c0_i32 = arith.constant 0 : i32
    %c0_i32_0 = arith.constant 0 : i32
    %c0_i32_1 = arith.constant 0 : i32
    return %c0_i32, %c0_i32_0 : i32, i32
  }
  func.func @transform_6(%arg0: i32) -> (i32, i32) {
    %c0_i32 = arith.constant 0 : i32
    %c0_i32_0 = arith.constant 0 : i32
    %c0_i32_1 = arith.constant 0 : i32
    return %c0_i32, %c0_i32_0 : i32, i32
  }
  func.func @transform_7(%arg0: i32) -> (i32, i32) {
    %c0_i32 = arith.constant 0 : i32
    %c0_i32_0 = arith.constant 0 : i32
    %c0_i32_1 = arith.constant 0 : i32
    return %c0_i32, %c0_i32_0 : i32, i32
  }
  func.func @transform_8(%arg0: i32) -> (i32, i32) {
    %c0_i32 = arith.constant 0 : i32
    %c0_i32_0 = arith.constant 0 : i32
    %c0_i32_1 = arith.constant 0 : i32
    return %c0_i32, %c0_i32_0 : i32, i32
  }
  func.func @transform_9(%arg0: i32) -> (i32, i32) {
    %c0_i32 = arith.constant 0 : i32
    %c0_i32_0 = arith.constant 0 : i32
    %c0_i32_1 = arith.constant 0 : i32
    return %c0_i32, %c0_i32_0 : i32, i32
  }
  func.func @transform_10(%arg0: i32) -> (i32, i32) {
    %c0_i32 = arith.constant 0 : i32
    %c0_i32_0 = arith.constant 0 : i32
    %c0_i32_1 = arith.constant 0 : i32
    return %c0_i32, %c0_i32_0 : i32, i32
  }
  func.func @transform_11(%arg0: i32) -> (i32, i32) {
    %c0_i32 = arith.constant 0 : i32
    %c0_i32_0 = arith.constant 0 : i32
    %c0_i32_1 = arith.constant 0 : i32
    return %c0_i32, %c0_i32_0 : i32, i32
  }
  func.func @transform_12(%arg0: i32) -> (i32, i32) {
    %c0_i32 = arith.constant 0 : i32
    %c0_i32_0 = arith.constant 0 : i32
    %c0_i32_1 = arith.constant 0 : i32
    return %c0_i32, %c0_i32_0 : i32, i32
  }
  func.func @transform_13(%arg0: i32) -> (i32, i32, i32) {
    %c0_i32 = arith.constant 0 : i32
    %c0_i32_0 = arith.constant 0 : i32
    %c0_i32_1 = arith.constant 0 : i32
    return %arg0, %c0_i32, %c0_i32_0 : i32, i32, i32
  }
}

module attributes {stable_mosaic.version = 11 : i64} {
  func.func @kernel(%arg0: i32, %arg1: memref<64x32xf32, #tpu.memory_space<vmem>>, %arg2: memref<32x16xf32, #tpu.memory_space<vmem>>, %arg3: memref<1x16xf32, #tpu.memory_space<vmem>>, %arg4: memref<64x16xf32, #tpu.memory_space<vmem>>) attributes {dimension_semantics = [#tpu.dimension_semantics<parallel>], iteration_bounds = array<i64: 2>, scalar_prefetch = 0 : i64, scratch_operands = 0 : i64, tpu.core_type = #tpu.core_type<tc>, window_params = [{transform_indices = @transform_0, window_bounds = array<i64: 64, 32>}, {pipeline_mode = #tpu.pipeline_mode<synchronous>, transform_indices = @transform_1, window_bounds = array<i64: 32, 16>}, {pipeline_mode = #tpu.pipeline_mode<synchronous>, transform_indices = @transform_2, window_bounds = array<i64: 1, 16>}, {transform_indices = @transform_3, window_bounds = array<i64: 64, 16>}]} {
    %c0 = arith.constant 0 : index
    %c0_0 = arith.constant 0 : index
    %0 = vector.load %arg1[%c0, %c0_0] : memref<64x32xf32, #tpu.memory_space<vmem>>, vector<64x32xf32>
    %1 = arith.truncf %0 : vector<64x32xf32> to vector<64x32xbf16>
    %c0_1 = arith.constant 0 : index
    %c0_2 = arith.constant 0 : index
    %2 = vector.load %arg2[%c0_1, %c0_2] : memref<32x16xf32, #tpu.memory_space<vmem>>, vector<32x16xf32>
    %3 = arith.truncf %2 : vector<32x16xf32> to vector<32x16xbf16>
    %cst = arith.constant dense<0.000000e+00> : vector<64x16xf32>
    %4 = tpu.matmul %1, %3, %cst {dimension_numbers = #tpu.dot_dimension_numbers<[1], [0], [0], [1], [0, 0, 1, 1], [], []>} : vector<64x32xbf16>, vector<32x16xbf16>, vector<64x16xf32> -> vector<64x16xf32>
    %c0_3 = arith.constant 0 : index
    %c0_4 = arith.constant 0 : index
    %5 = vector.load %arg3[%c0_3, %c0_4] : memref<1x16xf32, #tpu.memory_space<vmem>>, vector<1x16xf32>
    %6 = vector.broadcast %5 : vector<1x16xf32> to vector<64x16xf32>
    %7 = arith.addf %4, %6 : vector<64x16xf32>
    %c0_5 = arith.constant 0 : index
    %c0_6 = arith.constant 0 : index
    %8 = vector.load %arg4[%c0_5, %c0_6] : memref<64x16xf32, #tpu.memory_space<vmem>>, vector<64x16xf32>
    tpu.vector_store %arg4[%c0_5, %c0_6], %7 {strides = array<i32>} : memref<64x16xf32, #tpu.memory_space<vmem>>, vector<64x16xf32>,
    return
  }
  func.func @transform_0(%arg0: i32) -> (i32, i32) {
    %c0_i32 = arith.constant 0 : i32
    %c0_i32_0 = arith.constant 0 : i32
    return %arg0, %c0_i32 : i32, i32
  }
  func.func @transform_1(%arg0: i32) -> (i32, i32) {
    %c0_i32 = arith.constant 0 : i32
    %c0_i32_0 = arith.constant 0 : i32
    %c0_i32_1 = arith.constant 0 : i32
    return %c0_i32, %c0_i32_0 : i32, i32
  }
  func.func @transform_2(%arg0: i32) -> (i32, i32) {
    %c0_i32 = arith.constant 0 : i32
    %c0_i32_0 = arith.constant 0 : i32
    %c0_i32_1 = arith.constant 0 : i32
    return %c0_i32, %c0_i32_0 : i32, i32
  }
  func.func @transform_3(%arg0: i32) -> (i32, i32) {
    %c0_i32 = arith.constant 0 : i32
    %c0_i32_0 = arith.constant 0 : i32
    return %arg0, %c0_i32 : i32, i32
  }
}

</mosaic_0001>

<bundles_post_ra>
// kernel: mul.15
= control target key start
LH: loop header
LB: loop body
LE: loop exit
PB: predicated region body
PF: predicated region fallthrough
CT: control target
= control target key end

     0   :  { %2 = vsyncpa [#allocation1], 0  ;;  %s62_s8 = smov [#allocation0]   ;;  %s80_s0 = inlined_call_operand.hbm [shape: f32[2,4], index: 0, kind: input, shape index: {}]   ;;  %s81_s1 = inlined_call_operand.vmem [shape: f32[8], index: 1, kind: output, shape index: {}]  }
   0x1   :  { %s6_s0 = sshll.u32 %s80_s0, 4  ;;  %s8_s9 = sshll.u32 %s62_s8, 4  ;;  %s7_s0 = int_to_ptr.hbm [resolvable:$true] %s6_s0  ;;  %s9_s9 = int_to_ptr.vmem [resolvable:$true] %s8_s9 }
   0x2   :  { %11 = dma.hbm_to_vmem [thread:$0]  %s7_s0, 32, %s9_s9, [#allocation1]  }
   0x3   :  { %60 = dma.done.wait [#allocation1], 32  }
   0x4   :  { %61 = vsyncadd [#allocation1], 4294967264  ;;  %v16_v0 = vld [vmem:[#allocation0] sm:$0x3]  ;;  %vm19_vm0 = vcmask 31744   ;;  %s63_s10 = smov 4  }
   0x5   :  { %17 = vst [vmem:[#allocation3] sm:$0x3] %v16_v0  ;;  %vm25_vm1 = vcmask 64544  }
   0xc   :  { %v18_v1 = vld [vmem:[#allocation3] sm:$0x1]   ;;  %v22_v2 = vld [vmem:[#allocation3 + $0x1] sm:$0x1]  }
   0xd   :  { %23 = vrot.lane.b32.xlu0 %v22_v2, %s63_s10  ;;  %20 = vst.msk [vmem:[#allocation2] sm:$0x1] %vm19_vm0, %v18_v1  }
  0x7f   :  { %v24_v3 = vpop.permute.xlu0 %23  }
  0x80   :  { %26 = vst.msk [vmem:[#allocation2] sm:$0x1] %vm25_vm1, %v24_v3  }
  0x87   :  { %v29_v4 = vld [vmem:[#allocation2] sm:$0x1] }
  0x88   :  { %32 = vst [vmem:[%s81_s1] sm:$0x1] %v29_v4 }
  0x89   :  { %33 = vsyncpa [#allocation1], 1 }

// kernel: senpamae_forward.11
= control target key start
LH: loop header
LB: loop body
LE: loop exit
PB: predicated region body
PF: predicated region fallthrough
CT: control target
= control target key end

     0   :  { %s356_s12 = smov 0   ;;  %s390_s0 = inlined_call_operand.vmem [shape: f32[128,16], index: 0, kind: input, shape index: {}]   ;;  %s391_s1 = inlined_call_operand.vmem [shape: f32[16,32], index: 1, kind: input, shape index: {}]   ;;  %s392_s2 = inlined_call_operand.vmem [shape: f32[1,32], index: 2, kind: input, shape index: {}]   ;;  %s393_s3 = inlined_call_operand.vmem [shape: f32[128,32], index: 3, kind: output, shape index: {}]  }
   0x1 LB: > { %s301_s13 = sadd.s32 4294967295, %s334_s12   ;;  %p305_p0 = scmp.ge.s32.totalorder %s334_s12, 1  ;;  %s334_s12 = sphi %s356_s12, %s13_s12  }
   0x2   : > { %p138_p1 = scmp.lt.s32.totalorder %s334_s12, 3 }
   0x4   : > { %p139_p2 = pnand %p305_p0, %p138_p1 }
   0x5   : > { %s306_s18 = sshll.u32 (!%p139_p2), %s301_s13, 3 }
   0x6   : > { %142 = sbr.rel (%p139_p2) target bundleno = 162 (0xa2), region = 32  ;;  %p163_p3 = scmp.lt.s32.totalorder (!%p139_p2), %s306_s18, 15 }
   0xb   : > { %v187_v0 = vld [vmem:[%s391_s1] sm:$0xff]  ;;  %v188_v1 = vld [vmem:[%s391_s1 + $0x8] sm:$0xff]  ;;  %s395_s18 = smov (!%p163_p3, %s306_s18), 15  ;;  %vm194_vm0 = vcmask 130048   ;;  %vm236_vm1 = vcmask 261120  }
   0xc   : > { %v189_v2 = vpack.c.bf16 %v188_v1, %v187_v0  ;;  %s307_s19 = sshll.u32 %s395_s18, 3  ;;  %v327_v15 = vld [vmem:[%s392_s2] ss:$0 sm:$0xff] }
   0xd   : > { %s166_s22 = scalar_lea.vmem %s390_s0, %s307_s19  ;;  %s172_s27 = scalar_lea.vmem %s393_s3, %s307_s19 }
   0xe   : > { %214 = vmatpush.bf16.msra.mxu0 %v189_v2  ;;  %316 = vmatpush.bf16.msra.mxu1 %v189_v2  ;;  %v175_v3 = vld [vmem:[%s166_s22] sm:$0xff]  ;;  %v176_v4 = vld [vmem:[%s166_s22 + $0x8] sm:$0xff]  ;;  %v177_v5 = vld [vmem:[%s166_s22 + $0x10] sm:$0xff] }
   0xf   : > { %317 = vmatpush.bf16.msra.mxu2 %v189_v2  ;;  %318 = vmatpush.bf16.msra.mxu3 %v189_v2  ;;  %v183_v6 = vpack.c.bf16 %v176_v4, %v175_v3  ;;  %v178_v7 = vld [vmem:[%s166_s22 + $0x18] sm:$0xff]  ;;  %v179_v8 = vld [vmem:[%s166_s22 + $0x20] sm:$0xff]  ;;  %v180_v9 = vld [vmem:[%s166_s22 + $0x28] sm:$0xff] }
  0x10   : > { %v184_v10 = vpack.c.bf16 %v178_v7, %v177_v5  ;;  %v185_v11 = vpack.c.bf16 %v180_v9, %v179_v8  ;;  %v181_v12 = vld [vmem:[%s166_s22 + $0x30] sm:$0xff]  ;;  %v182_v13 = vld [vmem:[%s166_s22 + $0x38] sm:$0xff] }
  0x11   : > { %310 = vmatmul.msk.bf16.vlgmr.msra.gmra.mxu0 %vm194_vm0, %v183_v6  ;;  %v186_v14 = vpack.c.bf16 %v182_v13, %v181_v12 }
  0x12   : > { %311 = vmatmul.msk.bf16.vlgmr.msra.gmra.mxu1 %vm194_vm0, %v184_v10  ;;  %312 = vmatmul.msk.bf16.vlgmr.msra.gmra.mxu2 %vm194_vm0, %v185_v11 }
  0x13   : > { %313 = vmatmul.msk.bf16.vlgmr.msra.gmra.mxu3 %vm194_vm0, %v186_v14 }
  0x8e   : > { %v216_v16 = vpop.f32.mrf.mxu0 }
  0x8f   : > { %v217_v17 = vadd.f32 %v327_v15, %v216_v16  ;;  %v221_v18 = vpop.f32.mrf.mxu1 }
  0x90   : > { %v222_v19 = vadd.f32 %v327_v15, %v221_v18 }
  0x91   : > { %237 = vst.msk [vmem:[%s172_s27] sm:$0xff] %vm236_vm1, %v217_v17 }
  0x92   : > { %239 = vst.msk [vmem:[%s172_s27 + $0x10] sm:$0xff] %vm236_vm1, %v222_v19 }
  0x95   : > { %v226_v20 = vpop.f32.mrf.mxu2 }
  0x96   : > { %v227_v21 = vadd.f32 %v327_v15, %v226_v20  ;;  %v231_v22 = vpop.f32.mrf.mxu3  ;;  %v218_v23 = vpop.f32.mrf.mxu0 }
  0x97   : > { %v232_v24 = vadd.f32 %v327_v15, %v231_v22  ;;  %v219_v25 = vadd.f32 %v327_v15, %v218_v23  ;;  %v223_v26 = vpop.f32.mrf.mxu1 }
  0x98   : > { %241 = vst.msk [vmem:[%s172_s27 + $0x20] sm:$0xff] %vm236_vm1, %v227_v21  ;;  %v224_v27 = vadd.f32 %v327_v15, %v223_v26 }
  0x99   : > { %243 = vst.msk [vmem:[%s172_s27 + $0x30] sm:$0xff] %vm236_vm1, %v232_v24 }
  0x9a   : > { %238 = vst.msk [vmem:[%s172_s27 + $0x8] sm:$0xff] %vm236_vm1, %v219_v25 }
  0x9b   : > { %240 = vst.msk [vmem:[%s172_s27 + $0x18] sm:$0xff] %vm236_vm1, %v224_v27 }
  0x9d   : > { %v228_v28 = vpop.f32.mrf.mxu2 }
  0x9e   : > { %v229_v29 = vadd.f32 %v327_v15, %v228_v28  ;;  %v233_v30 = vpop.f32.mrf.mxu3 }
  0x9f   : > { %v234_v31 = vadd.f32 %v327_v15, %v233_v30 }
  0xa0   : > { %242 = vst.msk [vmem:[%s172_s27 + $0x28] sm:$0xff] %vm236_vm1, %v229_v29 }
  0xa1   : > { %244 = vst.msk [vmem:[%s172_s27 + $0x38] sm:$0xff] %vm236_vm1, %v234_v31 }
  0xa2 PF: > { %s13_s12 = sadd.s32 1, %s334_s12  }
  0xa3   : > { %p10_p4 = scmp.ge.s32.totalorder %s13_s12, 4  }
  0xa5   :  { %12 = sbr.rel (!%p10_p4) target bundleno = 1 (0x1), region = 62 }

// kernel: senpamae_forward.12
= control target key start
LH: loop header
LB: loop body
LE: loop exit
PB: predicated region body
PF: predicated region fallthrough
CT: control target
= control target key end

     0   :  { %15 = vsyncpa [#allocation3], 0  ;;  %s620_s0 = inlined_call_operand.hbm [shape: f32[8,16], index: 0, kind: input, shape index: {}]   ;;  %s621_s1 = inlined_call_operand.vmem [shape: f32[8,8], index: 1, kind: input, shape index: {}]   ;;  %s622_s2 = inlined_call_operand.hbm [shape: f32[16,64], index: 2, kind: input, shape index: {}]   ;;  %s623_s3 = inlined_call_operand.hbm [shape: f32[1,64], index: 3, kind: input, shape index: {}]   ;;  %s624_s4 = inlined_call_operand.vmem [shape: f32[64,32], index: 4, kind: input, shape index: {}]   ;;  %s625_s5 = inlined_call_operand.hbm [shape: f32[1,32], index: 5, kind: input, shape index: {}]   ;;  %s626_s6 = inlined_call_operand.hbm [shape: f32[8,64], index: 6, kind: input, shape index: {}]   ;;  %s627_s7 = inlined_call_operand.hbm [shape: f32[1,64], index: 7, kind: input, shape index: {}]   ;;  %s628_s8 = inlined_call_operand.vmem [shape: f32[64,32], index: 8, kind: input, shape index: {}]   ;;  %s629_s9 = inlined_call_operand.hbm [shape: f32[1,32], index: 9, kind: input, shape index: {}]   ;;  %s630_s10 = inlined_call_operand.vmem [shape: f32[8,32], index: 10, kind: output, shape index: {}]  }
   0x1   :  { %16 = vsyncpa [#allocation5], 0 }
   0x2   :  { %17 = vsyncpa [#allocation8], 0  ;;  %s36_s15 = sshll.u32 %s622_s2, 4  ;;  %s37_s15 = int_to_ptr.hbm [resolvable:$true] %s36_s15 }
   0x3   :  { %18 = vsyncpa [#allocation11], 0  ;;  %s481_s16 = smov [#allocation4]   ;;  %s63_s20 = sshll.u32 %s625_s5, 4  ;;  %s64_s20 = int_to_ptr.hbm [resolvable:$true] %s63_s20 }
   0x4   :  { %s38_s17 = sshll.u32 %s481_s16, 4  ;;  %s482_s21 = smov 128   ;;  %s39_s17 = int_to_ptr.vmem [resolvable:$true] %s38_s17 }
   0x5   :  { %s483_s22 = smov 8   ;;  %s484_s23 = smov [#allocation7]  }
   0x6   :  { %44 = dma.hbm_to_vmem [thread:$0]  %s37_s15, 256, %s39_s17, [#allocation5], %s482_s21, %s482_s21, %s483_s22  }
   0x7   :  { %s65_s24 = sshll.u32 %s484_s23, 4  ;;  %s85_s27 = sshll.u32 %s627_s7, 4  ;;  %s66_s24 = int_to_ptr.vmem [resolvable:$true] %s65_s24  ;;  %s86_s27 = int_to_ptr.hbm [resolvable:$true] %s85_s27 }
   0x8   :  { %68 = dma.hbm_to_vmem [thread:$0]  %s64_s20, 16, %s66_s24, [#allocation8]  }
   0x9   :  { %s24_s29 = sshll.u32 %s620_s0, 4  ;;  %s485_s30 = smov [#allocation10]   ;;  %s25_s29 = int_to_ptr.hbm [resolvable:$true] %s24_s29 }
   0xa   :  { %s87_s11 = sshll.u32 %s485_s30, 4  ;;  %s486_s5 = smov [#allocation2]   ;;  %s88_s11 = int_to_ptr.vmem [resolvable:$true] %s87_s11 }
   0xb   :  { %90 = dma.hbm_to_vmem [thread:$0]  %s86_s27, 16, %s88_s11, [#allocation11]  }
   0xc   :  { %s26_s12 = sshll.u32 %s486_s5, 4  ;;  %s50_s15 = sshll.u32 %s623_s3, 4  ;;  %s27_s12 = int_to_ptr.vmem [resolvable:$true] %s26_s12  ;;  %s51_s15 = int_to_ptr.hbm [resolvable:$true] %s50_s15 }
   0xd   :  { %29 = dma.hbm_to_vmem [thread:$0]  %s25_s29, 128, %s27_s12, [#allocation3]  }
   0xe   :  { %s74_s17 = sshll.u32 %s626_s6, 4  ;;  %s487_s18 = smov [#allocation6]   ;;  %s75_s17 = int_to_ptr.hbm [resolvable:$true] %s74_s17 }
   0xf   :  { %s52_s0 = sshll.u32 %s487_s18, 4  ;;  %s488_s19 = smov [#allocation9]   ;;  %s53_s0 = int_to_ptr.vmem [resolvable:$true] %s52_s0 }
  0x10   :  { %55 = dma.hbm_to_vmem [thread:$0]  %s51_s15, 16, %s53_s0, [#allocation5]  }
  0x11   :  { %s76_s20 = sshll.u32 %s488_s19, 4  ;;  %s98_s23 = sshll.u32 %s629_s9, 4  ;;  %s77_s20 = int_to_ptr.vmem [resolvable:$true] %s76_s20  ;;  %s99_s23 = int_to_ptr.hbm [resolvable:$true] %s98_s23 }
  0x12   :  { %79 = dma.hbm_to_vmem [thread:$0]  %s75_s17, 128, %s77_s20, [#allocation8]  }
  0x13   :  { %s489_s3 = smov [#allocation12]  }
  0x14   :  { %s100_s24 = sshll.u32 %s489_s3, 4  ;;  %s101_s24 = int_to_ptr.vmem [resolvable:$true] %s100_s24 }
  0x15   :  { %103 = dma.hbm_to_vmem [thread:$0]  %s99_s23, 16, %s101_s24, [#allocation11]  }
  0x16   :  { %473 = dma.done.wait [#allocation3], 128  }
  0x17   :  { %474 = vsyncadd [#allocation3], 4294967168 }
  0x18   :  { %475 = dma.done.wait [#allocation5], 272  }
  0x19   :  { %476 = vsyncadd [#allocation5], 4294967024 }
  0x1a   :  { %477 = dma.done.wait [#allocation8], 144  }
  0x1b   :  { %478 = vsyncadd [#allocation8], 4294967152 }
  0x1c   :  { %479 = dma.done.wait [#allocation11], 32  }
  0x1d   :  { %480 = vsyncadd [#allocation11], 4294967264  ;;  %v135_v0 = vld [vmem:[#allocation4] sm:$0xff]  ;;  %v136_v1 = vld [vmem:[#allocation4 + $0x8] sm:$0xff]  ;;  %vm214_vm0 = vcmask 1043456   ;;  %vm142_vm1 = vcmask 130048  }
  0x1e   :  { %v204_v2 = vld [vmem:[#allocation9] sm:$0xff]  ;;  %v137_v3 = vpack.c.bf16 %v136_v1, %v135_v0  ;;  %vm210_vm2 = vcmask 64512   ;;  %v175_v10 = vld [vmem:[%s624_s4 + $0x30] sm:$0xff]  ;;  %v174_v14 = vld [vmem:[%s624_s4 + $0x28] sm:$0xff]  ;;  %vm185_vm3 = vcmask 523264   ;;  %vm274_vm4 = vcmask 261120  }
  0x1f   :  { %v205_v4 = vpack.c.bf16 %v204_v2, %v204_v2  ;;  %v133_v5 = vld [vmem:[#allocation2] sm:$0xff]  ;;  %v176_v11 = vld [vmem:[%s624_s4 + $0x38] sm:$0xff]  ;;  %v247_v16 = vld [vmem:[%s628_s8 + $0x30] sm:$0xff] }
  0x20   :  { %v202_v6 = vld [vmem:[%s621_s1] sm:$0xff]  ;;  %v134_v7 = vpack.c.bf16 %v133_v5, %v133_v5  ;;  %153 = vmatpush.bf16.msra.mxu0 %v137_v3  ;;  %v180_v12 = vpack.c.bf16 %v176_v11, %v175_v10  ;;  %v248_v17 = vld [vmem:[%s628_s8 + $0x38] sm:$0xff]  ;;  %v171_v19 = vld [vmem:[%s624_s4 + $0x10] sm:$0xff] }
  0x21   :  { %v216_v8 = vsel %vm214_vm0, %v205_v4, 0  ;;  %v203_v9 = vpack.c.bf16 %v202_v6, %v202_v6  ;;  %v173_v13 = vld [vmem:[%s624_s4 + $0x20] sm:$0xff]  ;;  %v252_v18 = vpack.c.bf16 %v248_v17, %v247_v16  ;;  %v172_v20 = vld [vmem:[%s624_s4 + $0x18] sm:$0xff]  ;;  %v246_v23 = vld [vmem:[%s628_s8 + $0x28] sm:$0xff] }
  0x22   :  { %225 = vmatpush.bf16.msra.mxu2 %v216_v8  ;;  %193 = vmatpush.bf16.msra.mxu1 %v180_v12  ;;  %v179_v15 = vpack.c.bf16 %v174_v14, %v173_v13  ;;  %v245_v21 = vld [vmem:[%s628_s8 + $0x20] sm:$0xff]  ;;  %v178_v22 = vpack.c.bf16 %v172_v20, %v171_v19  ;;  %v170_v25 = vld [vmem:[%s624_s4 + $0x8] sm:$0xff]  ;;  %v243_v28 = vld [vmem:[%s628_s8 + $0x10] sm:$0xff] }
  0x23   :  { %284 = vmatmul.msk.bf16.vlgmr.msra.gmra.mxu0 %vm142_vm1, %v134_v7  ;;  %v169_v24 = vld [vmem:[%s624_s4] sm:$0xff]  ;;  %264 = vmatpush.bf16.msra.mxu3 %v252_v18  ;;  %v251_v26 = vpack.c.bf16 %v246_v23, %v245_v21  ;;  %v244_v29 = vld [vmem:[%s628_s8 + $0x18] sm:$0xff]  ;;  %v242_v32 = vld [vmem:[%s628_s8 + $0x8] sm:$0xff] }
  0x24   :  { %v177_v27 = vpack.c.bf16 %v170_v25, %v169_v24  ;;  %v250_v30 = vpack.c.bf16 %v244_v29, %v243_v28  ;;  %v241_v31 = vld [vmem:[%s628_s8] sm:$0xff]  ;;  %v297_v33 = vld [vmem:[#allocation6] ss:$0 sm:$0xff]  ;;  %v299_v0 = vld [vmem:[#allocation7] ss:$0 sm:$0xff] }
  0x25   :  { %286 = vmatmul.msk.bf16.vlgmr.msra.gmra.mxu2 %vm210_vm2, %v203_v9  ;;  %v249_v34 = vpack.c.bf16 %v242_v32, %v241_v31  ;;  %v298_v38 = vld [vmem:[#allocation10] ss:$0 sm:$0xff]  ;;  %v300_v1 = vld [vmem:[#allocation12] ss:$0 sm:$0xff] }
  0x26   :  { %194 = vmatpush.bf16.msra.mxu1 %v179_v15 }
  0x27   :  { %265 = vmatpush.bf16.msra.mxu3 %v251_v26 }
  0x2a   :  { %195 = vmatpush.bf16.msra.mxu1 %v178_v22 }
  0x2b   :  { %266 = vmatpush.bf16.msra.mxu3 %v250_v30 }
  0x2e   :  { %196 = vmatpush.bf16.msra.mxu1 %v177_v27 }
  0x2f   :  { %267 = vmatpush.bf16.msra.mxu3 %v249_v34 }
  0xa0   :  { %v155_v35 = vpop.f32.mrf.mxu0 }
  0xa1   :  { %v156_v36 = vadd.f32 %v297_v33, %v155_v35 }
  0xa3   :  { %v159_v37 = vmul.f32 %v156_v36, %v156_v36 }
  0xa5   :  { %v160_v39 = vmul.f32 %v159_v37, %v156_v36 }
  0xa7   :  { %v161_v40 = vmul.f32 0.044715, %v160_v39 }
  0xa8   :  { %v227_v41 = vpop.f32.mrf.mxu2  ;;  %v157_v43 = vpop.f32.mrf.mxu0 }
  0xa9   :  { %v228_v42 = vadd.f32 %v298_v38, %v227_v41  ;;  %v162_v44 = vadd.f32 %v161_v40, %v156_v36 }
  0xab   :  { %v231_v45 = vmul.f32 %v228_v42, %v228_v42  ;;  %v163_v46 = vmul.f32 0.7978846, %v162_v44 }
  0xad   :  { %v232_v47 = vmul.f32 %v231_v45, %v228_v42  ;;  %301 = vtanh.f32 %v163_v46 }
  0xaf   :  { %v233_v48 = vmul.f32 0.044715, %v232_v47 }
  0xb0   :  { %v229_v49 = vpop.f32.mrf.mxu2 }
  0xb1   :  { %v234_v50 = vadd.f32 %v233_v48, %v228_v42 }
  0xb3   :  { %v235_v51 = vmul.f32 0.7978846, %v234_v50  ;;  %v302_v52 = vpop.eup %301 }
  0xb4   :  { %v165_v53 = vadd.f32 1.0, %v302_v52 }
  0xb5   :  { %303 = vtanh.f32 %v235_v51 }
  0xb6   :  { %v166_v54 = vmul.f32 0.5, %v165_v53 }
  0xb8   :  { %v167_v55 = vmul.f32 %v166_v54, %v156_v36 }
  0xba   :  { %v168_v57 = vpack.c.bf16 %v167_v55, %v167_v55 }
  0xbb   :  { %v304_v56 = vpop.eup %303 }
  0xbc   :  { %v237_v58 = vadd.f32 1.0, %v304_v56  ;;  %285 = vmatmul.msk.bf16.vlgmr.msra.gmra.mxu1 %vm185_vm3, %v168_v57 }
  0xbe   :  { %v238_v59 = vmul.f32 0.5, %v237_v58 }
  0xc0   :  { %v239_v60 = vmul.f32 %v238_v59, %v228_v42 }
  0xc2   :  { %v240_v61 = vpack.c.bf16 %v239_v60, %v239_v60 }
  0xc4   :  { %287 = vmatmul.msk.bf16.vlgmr.msra.gmra.mxu3 %vm185_vm3, %v240_v61 }
 0x139   :  { %v198_v62 = vpop.f32.mrf.mxu1 }
 0x13a   :  { %v199_v3 = vadd.f32 %v299_v0, %v198_v62 }
 0x141   :  { %v200_v63 = vpop.f32.mrf.mxu1 }
 0x147   :  { %v269_v2 = vpop.f32.mrf.mxu3 }
 0x148   :  { %v270_v4 = vadd.f32 %v300_v1, %v269_v2 }
 0x14a   :  { %v273_v5 = vadd.f32 %v270_v4, %v199_v3 }
 0x14c   :  { %275 = vst.msk [vmem:[%s630_s10] sm:$0xff] %vm274_vm4, %v273_v5 }
 0x14f   :  { %v271_v6 = vpop.f32.mrf.mxu3 }
 0x150   :  { %280 = vsyncpa [#allocation3], 1 }
 0x151   :  { %281 = vsyncpa [#allocation5], 1 }
 0x152   :  { %282 = vsyncpa [#allocation8], 1 }
 0x153   :  { %283 = vsyncpa [#allocation11], 1 }

// kernel: senpamae_forward.15
= control target key start
LH: loop header
LB: loop body
LE: loop exit
PB: predicated region body
PF: predicated region fallthrough
CT: control target
= control target key end

     0   :  { %vm19_vm0 = vcmask 261120   ;;  %vm32_vm1 = vcmask 254976   ;;  %v180_v10 = vmov 32.0   ;;  %s277_s0 = inlined_call_operand.vmem [shape: f32[34,32], index: 0, kind: input, shape index: {}]   ;;  %s278_s1 = inlined_call_operand.vmem [shape: f32[1,32], index: 1, kind: input, shape index: {}]   ;;  %s279_s2 = inlined_call_operand.vmem [shape: f32[1,32], index: 2, kind: input, shape index: {}]   ;;  %s280_s3 = inlined_call_operand.vmem [shape: f32[34,32], index: 3, kind: output, shape index: {}]  }
   0x1   :  { %v16_v0 = vld [vmem:[%s277_s0 + $0x10] sm:$0xff]  ;;  %v14_v1 = vld [vmem:[%s277_s0] sm:$0xff]  ;;  %v17_v6 = vld [vmem:[%s277_s0 + $0x18] sm:$0xff]  ;;  %168 = vrcp.f32 %v180_v10 }
   0x2   :  { %v26_v2 = vsel %vm19_vm0, %v16_v0, 0.0  ;;  %v20_v3 = vsel %vm19_vm0, %v14_v1, 0.0  ;;  %v18_v4 = vld [vmem:[%s277_s0 + $0x20] sm:$0x3]  ;;  %v15_v7 = vld [vmem:[%s277_s0 + $0x8] sm:$0xff]  ;;  %v29_v8 = vsel %vm19_vm0, %v17_v6, 0.0 }
   0x3   :  { %27 = vadd.xlane.f32.xlu1 %v26_v2  ;;  %21 = vadd.xlane.f32.xlu0 %v20_v3  ;;  %v33_v5 = vsel %vm32_vm1, %v18_v4, 0.0  ;;  %v23_v9 = vsel %vm19_vm0, %v15_v7, 0.0 }
   0x4   :  { %34 = vadd.xlane.f32.xlu2 %v33_v5 }
   0x7   :  { %v169_v11 = vpop.eup %168 }
   0x8   :  { %v37_v12 = vmul.f32 32.0, %v169_v11  ;;  %vm41_vm2 = vweird.f32 %v169_v11 }
   0xa   :  { %v38_v13 = vsub.f32 1.0, %v37_v12  ;;  %v167_v12 = vld [vmem:[%s279_s2] ss:$0 sm:$0xff] }
   0xb   :  { %30 = vadd.xlane.f32.xlu1 %v29_v8  ;;  %24 = vadd.xlane.f32.xlu0 %v23_v9 }
   0xc   :  { %v39_v14 = vmul.f32 %v169_v11, %v38_v13 }
   0xe   :  { %v40_v15 = vadd.f32 %v169_v11, %v39_v14 }
  0x10   :  { %v42_v16 = vsel %vm41_vm2, %v169_v11, %v40_v15 }
  0x76   :  { %v28_v17 = vpop.xlane.xlu1 %27  ;;  %v22_v18 = vpop.xlane.xlu0 %21 }
  0x77   :  { %v45_v19 = vmul.f32 %v42_v16, %v28_v17  ;;  %v43_v20 = vmul.f32 %v42_v16, %v22_v18  ;;  %v35_v25 = vpop.xlane.xlu2 %34 }
  0x78   :  { %v47_v32 = vmul.f32 %v42_v16, %v35_v25 }
  0x79   :  { %v221_v21 = vsub.f32 %v16_v0, %v45_v19  ;;  %v223_v22 = vsub.f32 %v14_v1, %v43_v20 }
  0x7a   :  { %v235_v35 = vsub.f32 %v18_v4, %v47_v32 }
  0x7b   :  { %v55_v23 = vmul.f32 %v221_v21, %v221_v21  ;;  %v53_v24 = vmul.f32 %v223_v22, %v223_v22 }
  0x7c   :  { %v57_v40 = vmul.f32 %v235_v35, %v235_v35 }
  0x7d   :  { %v64_v26 = vsel %vm19_vm0, %v55_v23, 0.0  ;;  %v58_v27 = vsel %vm19_vm0, %v53_v24, 0.0 }
  0x7e   :  { %65 = vadd.xlane.f32.xlu1 %v64_v26  ;;  %v31_v28 = vpop.xlane.xlu1 %30  ;;  %59 = vadd.xlane.f32.xlu2 %v58_v27  ;;  %v25_v29 = vpop.xlane.xlu0 %24  ;;  %v70_v41 = vsel %vm32_vm1, %v57_v40, 0.0 }
  0x7f   :  { %v46_v30 = vmul.f32 %v42_v16, %v31_v28  ;;  %v44_v31 = vmul.f32 %v42_v16, %v25_v29 }
  0x81   :  { %v231_v33 = vsub.f32 %v17_v6, %v46_v30  ;;  %v233_v34 = vsub.f32 %v15_v7, %v44_v31  ;;  %v166_v7 = vld [vmem:[%s278_s1] ss:$0 sm:$0xff] }
  0x83   :  { %v56_v36 = vmul.f32 %v231_v33, %v231_v33  ;;  %v54_v37 = vmul.f32 %v233_v34, %v233_v34 }
  0x85   :  { %v67_v38 = vsel %vm19_vm0, %v56_v36, 0.0  ;;  %v61_v39 = vsel %vm19_vm0, %v54_v37, 0.0 }
  0x86   :  { %68 = vadd.xlane.f32.xlu2 %v67_v38  ;;  %62 = vadd.xlane.f32.xlu0 %v61_v39 }
  0x8e   :  { %71 = vadd.xlane.f32.xlu0 %v70_v41 }
  0xf1   :  { %v66_v42 = vpop.xlane.xlu1 %65  ;;  %v60_v43 = vpop.xlane.xlu2 %59 }
  0xf2   :  { %v75_v44 = vmul.f32 %v66_v42, %v42_v16  ;;  %v73_v45 = vmul.f32 %v60_v43, %v42_v16 }
  0xf4   :  { %v80_v46 = vadd.f32 1e-05, %v75_v44  ;;  %v78_v47 = vadd.f32 1e-05, %v73_v45 }
  0xf6   :  { %170 = vrsqrt.f32 %v80_v46  ;;  %vm109_vm3 = vweird.f32 %v80_v46  ;;  %vm89_vm7 = vweird.f32 %v78_v47 }
  0xf7   :  { %172 = vrsqrt.f32 %v78_v47 }
  0xf9   :  { %v69_v48 = vpop.xlane.xlu2 %68  ;;  %v63_v49 = vpop.xlane.xlu0 %62 }
  0xfa   :  { %v76_v50 = vmul.f32 %v69_v48, %v42_v16  ;;  %v74_v51 = vmul.f32 %v63_v49, %v42_v16 }
  0xfc   :  { %v171_v52 = vpop.eup %170  ;;  %v81_v53 = vadd.f32 1e-05, %v76_v50  ;;  %v79_v54 = vadd.f32 1e-05, %v74_v51 }
  0xfd   :  { %v173_v55 = vpop.eup %172  ;;  %v104_v56 = vmul.f32 %v171_v52, %v80_v46  ;;  %vm110_vm4 = vweird.f32 %v171_v52 }
  0xfe   :  { %v84_v57 = vmul.f32 %v173_v55, %v78_v47  ;;  %174 = vrsqrt.f32 %v81_v53  ;;  %vm90_vm5 = vweird.f32 %v173_v55  ;;  %vm111_vm6 = vmor %vm109_vm3, %vm110_vm4  ;;  %vm119_vm9 = vweird.f32 %v81_v53 }
  0xff   :  { %v105_v58 = vmul.f32 %v171_v52, %v104_v56  ;;  %176 = vrsqrt.f32 %v79_v54  ;;  %vm91_vm8 = vmor %vm89_vm7, %vm90_vm5  ;;  %vm99_vm13 = vweird.f32 %v79_v54 }
 0x100   :  { %v85_v59 = vmul.f32 %v173_v55, %v84_v57 }
 0x101   :  { %v106_v60 = vmul.f32 0.5, %v105_v58  ;;  %v72_v61 = vpop.xlane.xlu0 %71 }
 0x102   :  { %v86_v62 = vmul.f32 0.5, %v85_v59  ;;  %v77_v63 = vmul.f32 %v72_v61, %v42_v16 }
 0x103   :  { %v107_v0 = vsub.f32 1.5, %v106_v60 }
 0x104   :  { %v175_v1 = vpop.eup %174  ;;  %v87_v2 = vsub.f32 1.5, %v86_v62  ;;  %v82_v3 = vadd.f32 1e-05, %v77_v63 }
 0x105   :  { %v177_v4 = vpop.eup %176  ;;  %v108_v5 = vmul.f32 %v171_v52, %v107_v0  ;;  %v114_v6 = vmul.f32 %v175_v1, %v81_v53  ;;  %vm120_vm10 = vweird.f32 %v175_v1 }
 0x106   :  { %v88_v8 = vmul.f32 %v173_v55, %v87_v2  ;;  %v94_v9 = vmul.f32 %v177_v4, %v79_v54  ;;  %178 = vrsqrt.f32 %v82_v3  ;;  %vm100_vm11 = vweird.f32 %v177_v4  ;;  %vm121_vm12 = vmor %vm119_vm9, %vm120_vm10 }
 0x107   :  { %v112_v10 = vsel %vm111_vm6, %v171_v52, %v108_v5  ;;  %v115_v11 = vmul.f32 %v175_v1, %v114_v6  ;;  %vm101_vm14 = vmor %vm99_vm13, %vm100_vm11  ;;  %vm129_vm2 = vweird.f32 %v82_v3 }
 0x108   :  { %v135_v13 = vmul.f32 %v112_v10, %v221_v21  ;;  %v92_v14 = vsel %vm91_vm8, %v173_v55, %v88_v8  ;;  %v95_v15 = vmul.f32 %v177_v4, %v94_v9 }
 0x109   :  { %v133_v16 = vmul.f32 %v92_v14, %v223_v22  ;;  %v116_v17 = vmul.f32 0.5, %v115_v11 }
 0x10a   :  { %v144_v18 = vmul.f32 %v166_v7, %v135_v13  ;;  %v96_v19 = vmul.f32 0.5, %v95_v15 }
 0x10b   :  { %v142_v20 = vmul.f32 %v166_v7, %v133_v16  ;;  %v117_v23 = vsub.f32 1.5, %v116_v17 }
 0x10c   :  { %v179_v24 = vpop.eup %178  ;;  %v153_v25 = vadd.f32 %v167_v12, %v144_v18  ;;  %v97_v26 = vsub.f32 1.5, %v96_v19 }
 0x10d   :  { %v151_v27 = vadd.f32 %v167_v12, %v142_v20  ;;  %v118_v28 = vmul.f32 %v175_v1, %v117_v23  ;;  %v124_v29 = vmul.f32 %v179_v24, %v82_v3  ;;  %vm130_vm15 = vweird.f32 %v179_v24 }
 0x10e   :  { %158 = vst.msk [vmem:[%s280_s3 + $0x10] sm:$0xff] %vm19_vm0, %v153_v25  ;;  %v98_v21 = vmul.f32 %v177_v4, %v97_v26  ;;  %vm131_vm3 = vmor %vm129_vm2, %vm130_vm15 }
 0x10f   :  { %156 = vst.msk [vmem:[%s280_s3] sm:$0xff] %vm19_vm0, %v151_v27  ;;  %v122_v22 = vsel %vm121_vm12, %v175_v1, %v118_v28  ;;  %v125_v30 = vmul.f32 %v179_v24, %v124_v29 }
 0x110   :  { %v136_v31 = vmul.f32 %v122_v22, %v231_v33  ;;  %v102_v32 = vsel %vm101_vm14, %v177_v4, %v98_v21 }
 0x111   :  { %v134_v36 = vmul.f32 %v102_v32, %v233_v34  ;;  %v126_v37 = vmul.f32 0.5, %v125_v30 }
 0x112   :  { %v145_v38 = vmul.f32 %v166_v7, %v136_v31 }
 0x113   :  { %v143_v39 = vmul.f32 %v166_v7, %v134_v36  ;;  %v127_v40 = vsub.f32 1.5, %v126_v37 }
 0x114   :  { %v154_v41 = vadd.f32 %v167_v12, %v145_v38 }
 0x115   :  { %v152_v42 = vadd.f32 %v167_v12, %v143_v39  ;;  %v128_v43 = vmul.f32 %v179_v24, %v127_v40 }
 0x116   :  { %159 = vst.msk [vmem:[%s280_s3 + $0x18] sm:$0xff] %vm19_vm0, %v154_v41 }
 0x117   :  { %157 = vst.msk [vmem:[%s280_s3 + $0x8] sm:$0xff] %vm19_vm0, %v152_v42  ;;  %v132_v33 = vsel %vm131_vm3, %v179_v24, %v128_v43 }
 0x118   :  { %v137_v34 = vmul.f32 %v132_v33, %v235_v35 }
 0x11a   :  { %v146_v44 = vmul.f32 %v166_v7, %v137_v34 }
 0x11c   :  { %v155_v45 = vadd.f32 %v167_v12, %v146_v44 }
 0x11e   :  { %160 = vst.msk [vmem:[%s280_s3 + $0x20] sm:$0x3] %vm32_vm1, %v155_v45 }

// kernel: senpamae_forward.13
= control target key start
LH: loop header
LB: loop body
LE: loop exit
PB: predicated region body
PF: predicated region fallthrough
CT: control target
= control target key end

     0   :  { %s1281_s25 = smov 0   ;;  %s1527_s0 = inlined_call_operand.vmem [shape: f32[2,17,32], index: 0, kind: input, shape index: {}]   ;;  %s1528_s1 = inlined_call_operand.vmem [shape: f32[1,32], index: 1, kind: input, shape index: {}]   ;;  %s1529_s2 = inlined_call_operand.vmem [shape: f32[1,32], index: 2, kind: input, shape index: {}]   ;;  %s1530_s3 = inlined_call_operand.vmem [shape: f32[32,96], index: 3, kind: input, shape index: {}]   ;;  %s1531_s4 = inlined_call_operand.vmem [shape: f32[1,96], index: 4, kind: input, shape index: {}]   ;;  %s1532_s5 = inlined_call_operand.vmem [shape: f32[32,32], index: 5, kind: input, shape index: {}]   ;;  %s1533_s6 = inlined_call_operand.vmem [shape: f32[1,32], index: 6, kind: input, shape index: {}]   ;;  %s1534_s7 = inlined_call_operand.vmem [shape: f32[1,32], index: 7, kind: input, shape index: {}]   ;;  %s1535_s8 = inlined_call_operand.vmem [shape: f32[1,32], index: 8, kind: input, shape index: {}]   ;;  %s1536_s9 = inlined_call_operand.vmem [shape: f32[32,128], index: 9, kind: input, shape index: {}]   ;;  %s1537_s10 = inlined_call_operand.vmem [shape: f32[1,128], index: 10, kind: input, shape index: {}]   ;;  %s1538_s11 = inlined_call_operand.vmem [shape: f32[128,32], index: 11, kind: input, shape index: {}]   ;;  %s1539_s12 = inlined_call_operand.vmem [shape: f32[1,32], index: 12, kind: input, shape index: {}]   ;;  %s1540_s13 = inlined_call_operand.vmem [shape: f32[2,17,32], index: 13, kind: output, shape index: {}]  }
   0x1 LB: > { %s1098_s26 = sadd.s32 4294967295, %s1201_s25   ;;  %p1102_p0 = scmp.ge.s32.totalorder %s1201_s25, 1  ;;  %s1201_s25 = sphi %s1281_s25, %s23_s25  }
   0x2   : > { %p387_p1 = scmp.lt.s32.totalorder %s1201_s25, 3 }
   0x4   : > { %p388_p2 = pnand %p1102_p0, %p387_p1 }
   0x5   : > { %p431_p3 = scmp.lt.s32.totalorder (!%p388_p2), %s1098_s26, 1  ;;  %s1204_s14 = smov (!%p388_p2), 112  }
   0x6   : > { %391 = sbr.rel (%p388_p2) target bundleno = 1972 (0x7b4), region = 72  ;;  %s1205_s15 = smov (!%p388_p2), 80  }
   0x7   : > { %s1206_s16 = smov (!%p388_p2), 96   ;;  %s1207_s17 = smov (!%p388_p2), 48  }
   0x8   : > { %s1208_s18 = smov (!%p388_p2), 64   ;;  %s1210_s19 = smov (!%p388_p2), 16  }
   0xb   : > { %s1542_s26 = smov (!%p431_p3, %s1098_s26), 1  ;;  %vm445_vm0 = vcmask 261120   ;;  %vm452_vm1 = vcmask 253952   ;;  %v1203_v6 = vmov 32.0   ;;  %v538_v28 = vld [vmem:[%s1530_s3 + $0x10] sm:$0xff]  ;;  %v539_v29 = vld [vmem:[%s1530_s3 + $0x18] sm:$0xff] }
   0xc   : > { %s1121_s27 = smul.u32 24, %s1542_s26  ;;  %1151 = vrcp.f32 %v1203_v6  ;;  %v541_v30 = vpack.c.bf16 %v539_v29, %v538_v28  ;;  %v536_v33 = vld [vmem:[%s1530_s3] sm:$0xff]  ;;  %v537_v34 = vld [vmem:[%s1530_s3 + $0x8] sm:$0xff]  ;;  %vm578_vm12 = vcmask 130048   ;;  %vm612_vm13 = vcmask 138240  }
   0xd   : > { %v540_v35 = vpack.c.bf16 %v537_v34, %v536_v33  ;;  %v1143_v57 = vld [vmem:[%s1528_s1] ss:$0 sm:$0xff]  ;;  %vm619_vm14 = vcmask 131072   ;;  %vm660_vm15 = vcmask 1040384  }
   0xe   : > { %s435_s30 = scalar_lea.vmem %s1527_s0, %s1121_s27  ;;  %558 = vmatpush.bf16.msra.mxu0 %v541_v30  ;;  %s440_s24 = scalar_lea.vmem %s1540_s13, %s1121_s27 }
   0xf   : > { %v1297_v0 = vld [vmem:[%s435_s30] sm:$0xff]  ;;  %v1299_v1 = vld [vmem:[%s435_s30 + $0x10] sm:$0x1]  ;;  %v1305_v4 = vld [vmem:[%s435_s30 + $0x8] sm:$0xff] }
  0x10   : > { %v446_v2 = vsel %vm445_vm0, %v1297_v0, 0.0  ;;  %v453_v3 = vsel %vm452_vm1, %v1299_v1, 0.0  ;;  %v449_v5 = vsel %vm445_vm0, %v1305_v4, 0.0 }
  0x11   : > { %447 = vadd.xlane.f32.xlu0 %v446_v2  ;;  %454 = vadd.xlane.f32.xlu1 %v453_v3  ;;  %v1144_v2 = vld [vmem:[%s1529_s2] ss:$0 sm:$0xff] }
  0x12   : > { %v1152_v7 = vpop.eup %1151  ;;  %559 = vmatpush.bf16.msra.mxu0 %v540_v35 }
  0x13   : > { %v457_v8 = vmul.f32 32.0, %v1152_v7  ;;  %vm461_vm2 = vweird.f32 %v1152_v7 }
  0x15   : > { %v458_v9 = vsub.f32 1.0, %v457_v8 }
  0x17   : > { %v459_v10 = vmul.f32 %v1152_v7, %v458_v9 }
  0x19   : > { %450 = vadd.xlane.f32.xlu0 %v449_v5  ;;  %v460_v11 = vadd.f32 %v1152_v7, %v459_v10 }
  0x1b   : > { %v1309_v12 = vsel %vm461_vm2, %v1152_v7, %v460_v11 }
  0x84   : > { %v448_v13 = vpop.xlane.xlu0 %447  ;;  %v455_v17 = vpop.xlane.xlu1 %454 }
  0x85   : > { %v463_v14 = vmul.f32 %v1309_v12, %v448_v13  ;;  %v465_v21 = vmul.f32 %v1309_v12, %v455_v17 }
  0x87   : > { %v466_v15 = vsub.f32 %v1297_v0, %v463_v14  ;;  %v1318_v23 = vsub.f32 %v1299_v1, %v465_v21 }
  0x89   : > { %v469_v16 = vmul.f32 %v466_v15, %v466_v15  ;;  %v471_v26 = vmul.f32 %v1318_v23, %v1318_v23 }
  0x8b   : > { %v472_v18 = vsel %vm445_vm0, %v469_v16, 0.0  ;;  %v478_v27 = vsel %vm452_vm1, %v471_v26, 0.0 }
  0x8c   : > { %473 = vadd.xlane.f32.xlu1 %v472_v18  ;;  %v451_v19 = vpop.xlane.xlu0 %450  ;;  %v1145_v18 = vld [vmem:[%s1531_s4] ss:$0 sm:$0xff] }
  0x8d   : > { %v464_v20 = vmul.f32 %v1309_v12, %v451_v19 }
  0x8f   : > { %v467_v22 = vsub.f32 %v1305_v4, %v464_v20 }
  0x91   : > { %v470_v24 = vmul.f32 %v467_v22, %v467_v22 }
  0x93   : > { %v475_v25 = vsel %vm445_vm0, %v470_v24, 0.0 }
  0x94   : > { %476 = vadd.xlane.f32.xlu2 %v475_v25 }
  0x9c   : > { %479 = vadd.xlane.f32.xlu2 %v478_v27 }
  0xff   : > { %v474_v31 = vpop.xlane.xlu1 %473 }
 0x100   : > { %v481_v32 = vmul.f32 %v474_v31, %v1309_v12 }
 0x102   : > { %v484_v36 = vadd.f32 1e-05, %v481_v32 }
 0x104   : > { %1153 = vrsqrt.f32 %v484_v36  ;;  %vm493_vm4 = vweird.f32 %v484_v36 }
 0x107   : > { %v477_v37 = vpop.xlane.xlu2 %476 }
 0x108   : > { %v482_v38 = vmul.f32 %v477_v37, %v1309_v12 }
 0x10a   : > { %v1154_v39 = vpop.eup %1153  ;;  %v485_v40 = vadd.f32 1e-05, %v482_v38 }
 0x10b   : > { %v488_v41 = vmul.f32 %v1154_v39, %v484_v36  ;;  %vm494_vm3 = vweird.f32 %v1154_v39 }
 0x10c   : > { %1155 = vrsqrt.f32 %v485_v40  ;;  %vm495_vm5 = vmor %vm493_vm4, %vm494_vm3  ;;  %vm503_vm7 = vweird.f32 %v485_v40 }
 0x10d   : > { %v489_v42 = vmul.f32 %v1154_v39, %v488_v41 }
 0x10f   : > { %v490_v43 = vmul.f32 0.5, %v489_v42  ;;  %v480_v44 = vpop.xlane.xlu2 %479 }
 0x110   : > { %v483_v45 = vmul.f32 %v480_v44, %v1309_v12 }
 0x111   : > { %v491_v46 = vsub.f32 1.5, %v490_v43 }
 0x112   : > { %v1156_v47 = vpop.eup %1155  ;;  %v486_v48 = vadd.f32 1e-05, %v483_v45 }
 0x113   : > { %v492_v49 = vmul.f32 %v1154_v39, %v491_v46  ;;  %v498_v50 = vmul.f32 %v1156_v47, %v485_v40  ;;  %vm504_vm6 = vweird.f32 %v1156_v47 }
 0x114   : > { %1157 = vrsqrt.f32 %v486_v48  ;;  %vm505_vm8 = vmor %vm503_vm7, %vm504_vm6  ;;  %vm513_vm9 = vweird.f32 %v486_v48 }
 0x115   : > { %v499_v51 = vmul.f32 %v1156_v47, %v498_v50  ;;  %v496_v52 = vsel %vm495_vm5, %v1154_v39, %v492_v49 }
 0x116   : > { %v517_v56 = vmul.f32 %v496_v52, %v466_v15 }
 0x117   : > { %v500_v53 = vmul.f32 0.5, %v499_v51 }
 0x118   : > { %v524_v63 = vmul.f32 %v1143_v57, %v517_v56 }
 0x119   : > { %v501_v54 = vsub.f32 1.5, %v500_v53 }
 0x11a   : > { %v1158_v55 = vpop.eup %1157  ;;  %v531_v7 = vadd.f32 %v1144_v2, %v524_v63 }
 0x11b   : > { %v502_v58 = vmul.f32 %v1156_v47, %v501_v54  ;;  %v508_v59 = vmul.f32 %v1158_v55, %v486_v48  ;;  %vm514_vm10 = vweird.f32 %v1158_v55 }
 0x11c   : > { %vm515_vm11 = vmor %vm513_vm9, %vm514_vm10 }
 0x11d   : > { %v506_v60 = vsel %vm505_vm8, %v1156_v47, %v502_v58  ;;  %v509_v61 = vmul.f32 %v1158_v55, %v508_v59 }
 0x11e   : > { %v518_v62 = vmul.f32 %v506_v60, %v467_v22 }
 0x11f   : > { %v510_v3 = vmul.f32 0.5, %v509_v61 }
 0x120   : > { %v525_v5 = vmul.f32 %v1143_v57, %v518_v62 }
 0x121   : > { %v511_v6 = vsub.f32 1.5, %v510_v3 }
 0x122   : > { %v532_v8 = vadd.f32 %v1144_v2, %v525_v5 }
 0x123   : > { %v512_v9 = vmul.f32 %v1158_v55, %v511_v6 }
 0x124   : > { %v534_v10 = vpack.c.bf16 %v532_v8, %v531_v7 }
 0x125   : > { %v516_v11 = vsel %vm515_vm11, %v1158_v55, %v512_v9 }
 0x126   : > { %1105 = vmatmul.msk.bf16.vlgmr.msra.gmra.mxu0 %vm445_vm0, %v534_v10  ;;  %v519_v13 = vmul.f32 %v516_v11, %v1318_v23 }
 0x128   : > { %v526_v14 = vmul.f32 %v1143_v57, %v519_v13 }
 0x12a   : > { %v533_v15 = vadd.f32 %v1144_v2, %v526_v14 }
 0x12c   : > { %v535_v16 = vpack.c.bf16 %v533_v15, %v533_v15 }
 0x136   : > { %1106 = vmatmul.msk.bf16.gmra.mxu0 %vm445_vm0, %v535_v16 }
 0x1a3   : > { %v561_v17 = vpop.f32.mrf.mxu0 }
 0x1a4   : > { %v562_v20 = vadd.f32 %v1145_v18, %v561_v17 }
 0x1ab   : > { %v563_v19 = vpop.f32.mrf.mxu0 }
 0x1ac   : > { %v564_v21 = vadd.f32 %v1145_v18, %v563_v19  ;;  %v1209_v19 = vmov 0  }
 0x1ae   : > { %v1351_v22 = vpack.c.bf16 %v564_v21, %v562_v20  ;;  %v662_v20 = vsel %vm660_vm15, 65535, %v1209_v19 }
 0x1b0   : > { %684 = vrot.lane.b32.xlu2 %v1351_v22, %s1204_s14  ;;  %688 = vrot.lane.b32.xlu1 %v1351_v22, %s1205_s15 }
 0x1b3   : > { %v566_v23 = vpop.f32.mrf.mxu0 }
 0x1b4   : > { %v567_v24 = vadd.f32 %v1145_v18, %v566_v23 }
 0x1b6   : > { %v571_v25 = vpack.c.bf16 %v567_v24, %v567_v24 }
 0x1b8   : > { %574 = vrot.lane.b32.xlu2 %v1351_v22, %s1206_s16  ;;  %686 = vrot.lane.b32.xlu1 %v571_v25, %s1204_s14 }
 0x1b9   : > { %690 = vrot.lane.b32.xlu0 %v571_v25, %s1205_s15 }
 0x1bb   : > { %v568_v26 = vpop.f32.mrf.mxu0 }
 0x1c1   : > { %576 = vrot.lane.b32.xlu0 %v571_v25, %s1206_s16 }
 0x20a   : > { %v685_v29 = vpop.permute.xlu2 %684 }
 0x212   : > { %v575_v34 = vpop.permute.xlu2 %574 }
 0x213   : > { %v586_v35 = vsel %vm578_vm12, %v575_v34, 0 }
 0x222   : > { %v689_v30 = vpop.permute.xlu1 %688 }
 0x223   : > { %v699_v33 = vsel %vm578_vm12, %v689_v30, 0 }
 0x22a   : > { %v687_v36 = vpop.permute.xlu1 %686 }
 0x22b   : > { %v691_v27 = vpop.permute.xlu0 %690 }
 0x22c   : > { %v702_v28 = vsel %vm578_vm12, %v691_v27, 0 }
 0x22d   : > { %710 = vmatpush.bf16.xpose.msra.mxu3 %v702_v28 }
 0x233   : > { %v577_v31 = vpop.permute.xlu0 %576 }
 0x234   : > { %v589_v32 = vsel %vm578_vm12, %v577_v31, 0 }
 0x235   : > { %597 = vmatpush.bf16.xpose.msra.mxu1 %v589_v32  ;;  %711 = vmatpush.bf16.xpose.msra.mxu3 %v699_v33 }
 0x23c   : > { %1111 = vmatmul.msk.bf16.vlgmr.msra.gmra.mxu3 %vm578_vm12, %v685_v29 }
 0x23d   : > { %598 = vmatpush.bf16.xpose.msra.mxu1 %v586_v35 }
 0x244   : > { %1107 = vmatmul.msk.bf16.vlgmr.msra.gmra.mxu1 %vm578_vm12, %v1351_v22 }
 0x24c   : > { %1112 = vmatmul.msk.bf16.gmra.mxu3 %vm578_vm12, %v687_v36 }
 0x254   : > { %1108 = vmatmul.msk.bf16.gmra.mxu1 %vm578_vm12, %v571_v25 }
 0x2bf   : > { %v713_v37 = vpop.f32.mrf.mxu3 }
 0x2c0   : > { %v722_v38 = vmul.f32 0.25, %v713_v37 }
 0x2c1   : > { %v600_v39 = vpop.f32.mrf.mxu1 }
 0x2c2   : > { %v609_v40 = vmul.f32 0.25, %v600_v39  ;;  %v725_v41 = vsel %vm612_vm13, %v722_v38, -inf }
 0x2c3   : > { %726 = vmax.xlane.f32.xlu0 %v725_v41 }
 0x2c4   : > { %v613_v42 = vsel %vm612_vm13, %v609_v40, -inf }
 0x2c5   : > { %614 = vmax.xlane.f32.xlu1 %v613_v42 }
 0x2c7   : > { %v715_v43 = vpop.f32.mrf.mxu3 }
 0x2c8   : > { %v723_v44 = vmul.f32 0.25, %v715_v43 }
 0x2c9   : > { %v602_v45 = vpop.f32.mrf.mxu1 }
 0x2ca   : > { %v610_v46 = vmul.f32 0.25, %v602_v45  ;;  %v728_v47 = vsel %vm612_vm13, %v723_v44, -inf }
 0x2cb   : > { %729 = vmax.xlane.f32.xlu2 %v728_v47 }
 0x2cc   : > { %v616_v48 = vsel %vm612_vm13, %v610_v46, -inf }
 0x2cd   : > { %617 = vmax.xlane.f32.xlu0 %v616_v48 }
 0x2cf   : > { %v718_v49 = vpop.f32.mrf.mxu3 }
 0x2d0   : > { %v724_v50 = vmul.f32 0.25, %v718_v49 }
 0x2d1   : > { %v605_v51 = vpop.f32.mrf.mxu1 }
 0x2d2   : > { %v611_v52 = vmul.f32 0.25, %v605_v51  ;;  %v731_v53 = vsel %vm619_vm14, %v724_v50, -inf }
 0x2d3   : > { %732 = vmax.xlane.f32.xlu2 %v731_v53 }
 0x2d4   : > { %v620_v54 = vsel %vm619_vm14, %v611_v52, -inf }
 0x2d5   : > { %621 = vmax.xlane.f32.xlu0 %v620_v54 }
 0x2d7   : > { %v720_v55 = vpop.f32.mrf.mxu3 }
 0x2d9   : > { %v607_v56 = vpop.f32.mrf.mxu1 }
 0x2eb   : > { %762 = vrot.lane.b32.xlu2 %v571_v25, %s1207_s17 }
 0x2f3   : > { %651 = vrot.lane.b32.xlu2 %v571_v25, %s1208_s18 }
 0x336   : > { %v727_v57 = vpop.xlane.xlu0 %726 }
 0x337   : > { %v734_v58 = vsub.f32 %v722_v38, %v727_v57 }
 0x338   : > { %v615_v59 = vpop.xlane.xlu1 %614 }
 0x339   : > { %v737_v60 = vmul.f32 1.442695, %v734_v58  ;;  %v623_v61 = vsub.f32 %v609_v40, %v615_v59 }
 0x33b   : > { %1159 = vpow2.f32 %v737_v60  ;;  %v626_v62 = vmul.f32 1.442695, %v623_v61 }
 0x33d   : > { %1161 = vpow2.f32 %v626_v62  ;;  %v811_v62 = vld [vmem:[%s1532_s5 + $0x10] sm:$0xff] }
 0x33e   : > { %v730_v63 = vpop.xlane.xlu2 %729 }
 0x33f   : > { %v735_v8 = vsub.f32 %v723_v44, %v730_v63  ;;  %v812_v63 = vld [vmem:[%s1532_s5 + $0x18] sm:$0xff] }
 0x340   : > { %v618_v2 = vpop.xlane.xlu0 %617 }
 0x341   : > { %v1160_v3 = vpop.eup %1159  ;;  %v624_v5 = vsub.f32 %v610_v46, %v618_v2  ;;  %v739_v13 = vmul.f32 1.442695, %v735_v8  ;;  %v814_v2 = vpack.c.bf16 %v812_v63, %v811_v62  ;;  %v809_v8 = vld [vmem:[%s1532_s5] sm:$0xff] }
 0x342   : > { %v743_v6 = vsel %vm612_vm13, %v1160_v3, 0.0 }
 0x343   : > { %v1162_v7 = vpop.eup %1161  ;;  %v628_v9 = vmul.f32 1.442695, %v624_v5  ;;  %744 = vadd.xlane.f32.xlu1 %v743_v6 }
 0x344   : > { %v632_v10 = vsel %vm612_vm13, %v1162_v7, 0.0 }
 0x345   : > { %1163 = vpow2.f32 %v628_v9  ;;  %633 = vadd.xlane.f32.xlu0 %v632_v10  ;;  %v810_v9 = vld [vmem:[%s1532_s5 + $0x8] sm:$0xff] }
 0x346   : > { %v733_v11 = vpop.xlane.xlu2 %732  ;;  %1165 = vpow2.f32 %v739_v13  ;;  %v813_v10 = vpack.c.bf16 %v810_v9, %v809_v8 }
 0x347   : > { %v736_v30 = vsub.f32 %v724_v50, %v733_v11 }
 0x348   : > { %v622_v14 = vpop.xlane.xlu0 %621 }
 0x349   : > { %v625_v15 = vsub.f32 %v611_v52, %v622_v14  ;;  %v741_v31 = vmul.f32 1.442695, %v736_v30 }
 0x34b   : > { %v1164_v16 = vpop.eup %1163  ;;  %v630_v17 = vmul.f32 1.442695, %v625_v15 }
 0x34c   : > { %v635_v18 = vsel %vm612_vm13, %v1164_v16, 0.0  ;;  %v1166_v24 = vpop.eup %1165 }
 0x34d   : > { %1167 = vpow2.f32 %v630_v17  ;;  %636 = vadd.xlane.f32.xlu0 %v635_v18  ;;  %v746_v27 = vsel %vm612_vm13, %v1166_v24, 0.0 }
 0x34e   : > { %v763_v21 = vpop.permute.xlu2 %762  ;;  %1169 = vpow2.f32 %v741_v31 }
 0x34f   : > { %v772_v23 = vand.u32 %v763_v21, %v662_v20  ;;  %v1146_v21 = vld [vmem:[%s1533_s6] ss:$0 sm:$0xff] }
 0x351   : > { %780 = vmatpush.bf16.msrb.mxu0 %v772_v23 }
 0x353   : > { %v1168_v25 = vpop.eup %1167 }
 0x354   : > { %v638_v26 = vsel %vm619_vm14, %v1168_v25, 0.0  ;;  %v1170_v32 = vpop.eup %1169 }
 0x355   : > { %639 = vadd.xlane.f32.xlu2 %v638_v26  ;;  %747 = vadd.xlane.f32.xlu0 %v746_v27  ;;  %v749_v33 = vsel %vm619_vm14, %v1170_v32, 0.0 }
 0x356   : > { %v652_v28 = vpop.permute.xlu2 %651 }
 0x357   : > { %v664_v29 = vand.u32 %v662_v20, %v652_v28 }
 0x359   : > { %672 = vmatpush.bf16.msra.mxu2 %v664_v29 }
 0x35c   : > { %760 = vrot.lane.b32.xlu1 %v1351_v22, %s1207_s17 }
 0x369   : > { %649 = vrot.lane.b32.xlu0 %v1351_v22, %s1208_s18 }
 0x386   : > { %750 = vadd.xlane.f32.xlu1 %v749_v33 }
 0x3b6   : > { %v745_v36 = vpop.xlane.xlu1 %744 }
 0x3b7   : > { %1171 = vrcp.f32 %v745_v36 }
 0x3b8   : > { %v634_v34 = vpop.xlane.xlu0 %633 }
 0x3bd   : > { %v1172_v38 = vpop.eup %1171 }
 0x3be   : > { %v755_v41 = vmul.f32 %v1172_v38, %v1160_v3 }
 0x3c0   : > { %v637_v35 = vpop.xlane.xlu0 %636 }
 0x3c8   : > { %v748_v37 = vpop.xlane.xlu0 %747  ;;  %v640_v48 = vpop.xlane.xlu2 %639 }
 0x3c9   : > { %1173 = vrcp.f32 %v748_v37 }
 0x3ca   : > { %1175 = vrcp.f32 %v637_v35 }
 0x3cb   : > { %1177 = vrcp.f32 %v634_v34 }
 0x3cc   : > { %1179 = vrcp.f32 %v640_v48  ;;  %v931_v48 = vld [vmem:[%s1536_s9 + $0x18] sm:$0xff] }
 0x3ce   : > { %v761_v39 = vpop.permute.xlu1 %760 }
 0x3cf   : > { %v1174_v40 = vpop.eup %1173  ;;  %781 = vmatpush.bf16.msrb.mxu0 %v761_v39 }
 0x3d0   : > { %v756_v22 = vmul.f32 %v1174_v40, %v1166_v24  ;;  %v1176_v43 = vpop.eup %1175 }
 0x3d1   : > { %v1178_v44 = vpop.eup %1177  ;;  %v645_v45 = vmul.f32 %v1176_v43, %v1164_v16 }
 0x3d2   : > { %v758_v42 = vpack.c.bf16 %v756_v22, %v755_v41  ;;  %v644_v47 = vmul.f32 %v1178_v44, %v1162_v7  ;;  %v1180_v50 = vpop.eup %1179 }
 0x3d3   : > { %v646_v51 = vmul.f32 %v1180_v50, %v1168_v25  ;;  %v928_v50 = vld [vmem:[%s1536_s9] sm:$0xff] }
 0x3d4   : > { %1113 = vmatmul.msk.bf16.vlgmr.msrb.gmra.mxu0 %vm612_vm13, %v758_v42  ;;  %v647_v49 = vpack.c.bf16 %v645_v45, %v644_v47  ;;  %v930_v47 = vld [vmem:[%s1536_s9 + $0x10] sm:$0xff] }
 0x3d5   : > { %v648_v52 = vpack.c.bf16 %v646_v51, %v646_v51  ;;  %v929_v51 = vld [vmem:[%s1536_s9 + $0x8] sm:$0xff] }
 0x3db   : > { %v650_v46 = vpop.permute.xlu0 %649 }
 0x3dc   : > { %673 = vmatpush.bf16.msra.mxu2 %v650_v46 }
 0x3df   : > { %1109 = vmatmul.msk.bf16.vlgmr.msra.gmra.mxu2 %vm612_vm13, %v647_v49  ;;  %v933_v49 = vpack.c.bf16 %v931_v48, %v930_v47  ;;  %v997_v47 = vld [vmem:[%s1538_s11 + $0x30] sm:$0xff]  ;;  %v998_v48 = vld [vmem:[%s1538_s11 + $0x38] sm:$0xff] }
 0x3e0   : > { %831 = vmatpush.bf16.msrb.mxu2 %v814_v2 }
 0x3e1   : > { %950 = vmatpush.bf16.msrb.mxu1 %v933_v49  ;;  %v1010_v49 = vpack.c.bf16 %v998_v48, %v997_v47 }
 0x3e4   : > { %832 = vmatpush.bf16.msrb.mxu2 %v813_v10 }
 0x3ef   : > { %1110 = vmatmul.msk.bf16.gmra.mxu2 %vm612_vm13, %v648_v52 }
 0x3f9   : > { %v751_v53 = vpop.xlane.xlu1 %750 }
 0x3fa   : > { %1181 = vrcp.f32 %v751_v53 }
 0x400   : > { %v1182_v54 = vpop.eup %1181 }
 0x401   : > { %v757_v55 = vmul.f32 %v1182_v54, %v1170_v32  ;;  %v932_v54 = vpack.c.bf16 %v929_v51, %v928_v50  ;;  %v995_v50 = vld [vmem:[%s1538_s11 + $0x20] sm:$0xff]  ;;  %v996_v51 = vld [vmem:[%s1538_s11 + $0x28] sm:$0xff] }
 0x403   : > { %v759_v56 = vpack.c.bf16 %v757_v55, %v757_v55  ;;  %951 = vmatpush.bf16.msrb.mxu1 %v932_v54  ;;  %v994_v54 = vld [vmem:[%s1538_s11 + $0x18] sm:$0xff] }
 0x405   : > { %1114 = vmatmul.msk.bf16.gmra.mxu0 %vm612_vm13, %v759_v56 }
 0x451   : > { %v783_v57 = vpop.f32.mrf.mxu0 }
 0x459   : > { %v785_v58 = vpop.f32.mrf.mxu0 }
 0x45a   : > { %v1138_v59 = vpack.i.bf16 %v785_v58, %v783_v57 }
 0x45c   : > { %1139 = vrot.lane.b32.xlu0 %v1138_v59, %s1210_s19 }
 0x462   : > { %v675_v60 = vpop.f32.mrf.mxu2 }
 0x46a   : > { %v677_v61 = vpop.f32.mrf.mxu2 }
 0x472   : > { %v680_v3 = vpop.f32.mrf.mxu2 }
 0x47a   : > { %v682_v5 = vpop.f32.mrf.mxu2 }
 0x482   : > { %v788_v6 = vpop.f32.mrf.mxu0 }
 0x483   : > { %799 = vrot.lane.b32.xlu0 %v788_v6, %s1210_s19 }
 0x48a   : > { %v790_v7 = vpop.f32.mrf.mxu0 }
 0x4ce   : > { %v1140_v11 = vpop.permute.xlu0 %1139 }
 0x4cf   : > { %v1142_v13 = vunpack.i.h.bf16 %v1140_v11  ;;  %v1141_v14 = vunpack.i.l.bf16 %v1140_v11  ;;  %v1147_v11 = vld [vmem:[%s1534_s7] ss:$0 sm:$0xff] }
 0x4d1   : > { %v804_v15 = vsel %vm578_vm12, %v675_v60, %v1141_v14  ;;  %v805_v16 = vsel %vm578_vm12, %v677_v61, %v1142_v13 }
 0x4d2   : > { %v807_v17 = vpack.c.bf16 %v805_v16, %v804_v15 }
 0x4d4   : > { %1115 = vmatmul.msk.bf16.vlgmr.msrb.gmra.mxu2 %vm445_vm0, %v807_v17  ;;  %v1148_v17 = vld [vmem:[%s1535_s8] ss:$0 sm:$0xff] }
 0x4f5   : > { %v800_v18 = vpop.permute.xlu0 %799 }
 0x4f6   : > { %v806_v19 = vsel %vm578_vm12, %v680_v3, %v800_v18 }
 0x4f7   : > { %v808_v20 = vpack.c.bf16 %v806_v19, %v806_v19 }
 0x4f9   : > { %1116 = vmatmul.msk.bf16.gmra.mxu2 %vm445_vm0, %v808_v20 }
 0x557   : > { %v834_v23 = vpop.f32.mrf.mxu2 }
 0x558   : > { %v835_v24 = vadd.f32 %v1146_v21, %v834_v23 }
 0x55a   : > { %v1408_v25 = vadd.f32 %v835_v24, %v1297_v0 }
 0x55c   : > { %v846_v26 = vsel %vm445_vm0, %v1408_v25, 0.0 }
 0x55d   : > { %847 = vadd.xlane.f32.xlu0 %v846_v26 }
 0x55f   : > { %v836_v27 = vpop.f32.mrf.mxu2 }
 0x560   : > { %v837_v28 = vadd.f32 %v1146_v21, %v836_v27 }
 0x562   : > { %v1413_v29 = vadd.f32 %v837_v28, %v1305_v4 }
 0x564   : > { %v849_v30 = vsel %vm445_vm0, %v1413_v29, 0.0 }
 0x565   : > { %850 = vadd.xlane.f32.xlu1 %v849_v30 }
 0x57c   : > { %v839_v31 = vpop.f32.mrf.mxu2 }
 0x57d   : > { %v840_v32 = vadd.f32 %v1146_v21, %v839_v31 }
 0x57f   : > { %v1418_v33 = vadd.f32 %v840_v32, %v1299_v1 }
 0x581   : > { %v852_v0 = vsel %vm452_vm1, %v1418_v33, 0.0 }
 0x582   : > { %853 = vadd.xlane.f32.xlu2 %v852_v0 }
 0x584   : > { %v841_v34 = vpop.f32.mrf.mxu2 }
 0x5d0   : > { %v848_v35 = vpop.xlane.xlu0 %847 }
 0x5d1   : > { %v855_v36 = vmul.f32 %v848_v35, %v1309_v12 }
 0x5d3   : > { %v858_v4 = vsub.f32 %v1408_v25, %v855_v36 }
 0x5d5   : > { %v861_v37 = vmul.f32 %v858_v4, %v858_v4 }
 0x5d7   : > { %v864_v38 = vsel %vm445_vm0, %v861_v37, 0.0 }
 0x5d8   : > { %v851_v39 = vpop.xlane.xlu1 %850  ;;  %865 = vadd.xlane.f32.xlu1 %v864_v38  ;;  %v1006_v38 = vld [vmem:[%s1538_s11 + $0x78] sm:$0xff] }
 0x5d9   : > { %v856_v40 = vmul.f32 %v851_v39, %v1309_v12 }
 0x5db   : > { %v859_v1 = vsub.f32 %v1413_v29, %v856_v40  ;;  %v1003_v40 = vld [vmem:[%s1538_s11 + $0x60] sm:$0xff] }
 0x5dd   : > { %v862_v41 = vmul.f32 %v859_v1, %v859_v1 }
 0x5df   : > { %v867_v22 = vsel %vm445_vm0, %v862_v41, 0.0 }
 0x5e0   : > { %868 = vadd.xlane.f32.xlu2 %v867_v22  ;;  %v1001_v22 = vld [vmem:[%s1538_s11 + $0x50] sm:$0xff] }
 0x5f5   : > { %v854_v42 = vpop.xlane.xlu2 %853 }
 0x5f6   : > { %v857_v43 = vmul.f32 %v854_v42, %v1309_v12  ;;  %v1002_v42 = vld [vmem:[%s1538_s11 + $0x58] sm:$0xff] }
 0x5f8   : > { %v1430_v44 = vsub.f32 %v1418_v33, %v857_v43  ;;  %v1012_v43 = vpack.c.bf16 %v1002_v42, %v1001_v22 }
 0x5fa   : > { %v863_v45 = vmul.f32 %v1430_v44, %v1430_v44 }
 0x5fc   : > { %v870_v46 = vsel %vm452_vm1, %v863_v45, 0.0  ;;  %v1000_v45 = vld [vmem:[%s1538_s11 + $0x48] sm:$0xff] }
 0x5fd   : > { %871 = vadd.xlane.f32.xlu1 %v870_v46 }
 0x64b   : > { %v866_v52 = vpop.xlane.xlu1 %865 }
 0x64c   : > { %v873_v53 = vmul.f32 %v866_v52, %v1309_v12  ;;  %v1009_v52 = vpack.c.bf16 %v996_v51, %v995_v50 }
 0x64e   : > { %v876_v55 = vadd.f32 1e-05, %v873_v53  ;;  %v993_v53 = vld [vmem:[%s1538_s11 + $0x10] sm:$0xff] }
 0x650   : > { %1183 = vrsqrt.f32 %v876_v55  ;;  %vm885_vm3 = vweird.f32 %v876_v55 }
 0x653   : > { %v869_v56 = vpop.xlane.xlu2 %868 }
 0x654   : > { %v874_v57 = vmul.f32 %v869_v56, %v1309_v12  ;;  %v1149_v56 = vld [vmem:[%s1537_s10] ss:$0 sm:$0xff] }
 0x656   : > { %v1184_v58 = vpop.eup %1183  ;;  %v877_v59 = vadd.f32 1e-05, %v874_v57  ;;  %v991_v57 = vld [vmem:[%s1538_s11] sm:$0xff] }
 0x657   : > { %v880_v60 = vmul.f32 %v1184_v58, %v876_v55  ;;  %vm886_vm2 = vweird.f32 %v1184_v58  ;;  %v1008_v55 = vpack.c.bf16 %v994_v54, %v993_v53 }
 0x658   : > { %1185 = vrsqrt.f32 %v877_v59  ;;  %vm887_vm4 = vmor %vm885_vm3, %vm886_vm2  ;;  %vm895_vm6 = vweird.f32 %v877_v59 }
 0x659   : > { %v881_v61 = vmul.f32 %v1184_v58, %v880_v60 }
 0x65b   : > { %v882_v62 = vmul.f32 0.5, %v881_v61 }
 0x65d   : > { %v883_v63 = vsub.f32 1.5, %v882_v62 }
 0x65e   : > { %v1186_v2 = vpop.eup %1185 }
 0x65f   : > { %v884_v3 = vmul.f32 %v1184_v58, %v883_v63  ;;  %v890_v5 = vmul.f32 %v1186_v2, %v877_v59  ;;  %vm896_vm5 = vweird.f32 %v1186_v2 }
 0x660   : > { %vm897_vm7 = vmor %vm895_vm6, %vm896_vm5 }
 0x661   : > { %v891_v6 = vmul.f32 %v1186_v2, %v890_v5  ;;  %v888_v7 = vsel %vm887_vm4, %v1184_v58, %v884_v3  ;;  %v992_v58 = vld [vmem:[%s1538_s11 + $0x8] sm:$0xff] }
 0x662   : > { %v909_v10 = vmul.f32 %v888_v7, %v858_v4  ;;  %v1007_v60 = vpack.c.bf16 %v992_v58, %v991_v57 }
 0x663   : > { %v892_v8 = vmul.f32 0.5, %v891_v6 }
 0x664   : > { %v916_v16 = vmul.f32 %v1147_v11, %v909_v10 }
 0x665   : > { %v893_v9 = vsub.f32 1.5, %v892_v8 }
 0x666   : > { %v923_v19 = vadd.f32 %v1148_v17, %v916_v16 }
 0x667   : > { %v894_v13 = vmul.f32 %v1186_v2, %v893_v9 }
 0x669   : > { %v898_v14 = vsel %vm897_vm7, %v1186_v2, %v894_v13 }
 0x66a   : > { %v910_v15 = vmul.f32 %v898_v14, %v859_v1  ;;  %v1004_v1 = vld [vmem:[%s1538_s11 + $0x68] sm:$0xff] }
 0x66b   : > { %v1013_v41 = vpack.c.bf16 %v1004_v1, %v1003_v40 }
 0x66c   : > { %v917_v18 = vmul.f32 %v1147_v11, %v910_v15 }
 0x66e   : > { %v924_v20 = vadd.f32 %v1148_v17, %v917_v18 }
 0x670   : > { %v872_v21 = vpop.xlane.xlu1 %871  ;;  %v926_v23 = vpack.c.bf16 %v924_v20, %v923_v19 }
 0x671   : > { %v875_v24 = vmul.f32 %v872_v21, %v1309_v12  ;;  %v1005_v12 = vld [vmem:[%s1538_s11 + $0x70] sm:$0xff] }
 0x672   : > { %1117 = vmatmul.msk.bf16.vlgmr.msrb.gmra.mxu1 %vm445_vm0, %v926_v23  ;;  %v1014_v39 = vpack.c.bf16 %v1006_v38, %v1005_v12  ;;  %v1150_v12 = vld [vmem:[%s1539_s12] ss:$0 sm:$0xff] }
 0x673   : > { %v878_v26 = vadd.f32 1e-05, %v875_v24 }
 0x674   : > { %1019 = vmatpush.bf16.msrb.mxu3 %v1014_v39 }
 0x675   : > { %1187 = vrsqrt.f32 %v878_v26  ;;  %vm905_vm9 = vweird.f32 %v878_v26 }
 0x678   : > { %1020 = vmatpush.bf16.msrb.mxu3 %v1013_v41 }
 0x67b   : > { %v1188_v27 = vpop.eup %1187 }
 0x67c   : > { %v900_v28 = vmul.f32 %v1188_v27, %v878_v26  ;;  %vm906_vm8 = vweird.f32 %v1188_v27  ;;  %1021 = vmatpush.bf16.msrb.mxu3 %v1012_v43 }
 0x67d   : > { %vm907_vm10 = vmor %vm905_vm9, %vm906_vm8 }
 0x67e   : > { %v901_v30 = vmul.f32 %v1188_v27, %v900_v28 }
 0x680   : > { %v902_v31 = vmul.f32 0.5, %v901_v30 }
 0x682   : > { %v903_v32 = vsub.f32 1.5, %v902_v31 }
 0x684   : > { %v904_v0 = vmul.f32 %v1188_v27, %v903_v32 }
 0x686   : > { %v908_v34 = vsel %vm907_vm10, %v1188_v27, %v904_v0 }
 0x687   : > { %v911_v35 = vmul.f32 %v908_v34, %v1430_v44  ;;  %v999_v44 = vld [vmem:[%s1538_s11 + $0x40] sm:$0xff] }
 0x688   : > { %v1011_v46 = vpack.c.bf16 %v1000_v45, %v999_v44 }
 0x689   : > { %v918_v36 = vmul.f32 %v1147_v11, %v911_v35 }
 0x68a   : > { %1022 = vmatpush.bf16.msrb.mxu3 %v1011_v46 }
 0x68b   : > { %v925_v4 = vadd.f32 %v1148_v17, %v918_v36 }
 0x68d   : > { %v927_v37 = vpack.c.bf16 %v925_v4, %v925_v4 }
 0x68e   : > { %1023 = vmatpush.bf16.msrb.mxu3 %v1010_v49 }
 0x68f   : > { %1118 = vmatmul.msk.bf16.gmra.mxu1 %vm445_vm0, %v927_v37 }
 0x692   : > { %1024 = vmatpush.bf16.msrb.mxu3 %v1009_v52 }
 0x696   : > { %1025 = vmatpush.bf16.msrb.mxu3 %v1008_v55 }
 0x69a   : > { %1026 = vmatpush.bf16.msrb.mxu3 %v1007_v60 }
 0x6ef   : > { %v953_v59 = vpop.f32.mrf.mxu1 }
 0x6f0   : > { %v954_v61 = vadd.f32 %v1149_v56, %v953_v59 }
 0x6f2   : > { %v962_v62 = vmul.f32 %v954_v61, %v954_v61 }
 0x6f4   : > { %v965_v63 = vmul.f32 %v962_v62, %v954_v61 }
 0x6f6   : > { %v968_v2 = vmul.f32 0.044715, %v965_v63 }
 0x6f7   : > { %v955_v3 = vpop.f32.mrf.mxu1 }
 0x6f8   : > { %v971_v5 = vadd.f32 %v968_v2, %v954_v61  ;;  %v956_v6 = vadd.f32 %v1149_v56, %v955_v3 }
 0x6fa   : > { %v974_v7 = vmul.f32 0.7978846, %v971_v5  ;;  %v963_v8 = vmul.f32 %v956_v6, %v956_v6 }
 0x6fc   : > { %v966_v9 = vmul.f32 %v963_v8, %v956_v6  ;;  %1189 = vtanh.f32 %v974_v7 }
 0x6fe   : > { %v969_v10 = vmul.f32 0.044715, %v966_v9 }
 0x700   : > { %v972_v11 = vadd.f32 %v969_v10, %v956_v6 }
 0x702   : > { %v975_v13 = vmul.f32 0.7978846, %v972_v11  ;;  %v1190_v14 = vpop.eup %1189 }
 0x703   : > { %v980_v15 = vadd.f32 1.0, %v1190_v14 }
 0x704   : > { %1191 = vtanh.f32 %v975_v13 }
 0x705   : > { %v983_v18 = vmul.f32 0.5, %v980_v15 }
 0x707   : > { %v986_v24 = vmul.f32 %v983_v18, %v954_v61 }
 0x70a   : > { %v1192_v16 = vpop.eup %1191 }
 0x70b   : > { %v981_v17 = vadd.f32 1.0, %v1192_v16 }
 0x70c   : > { %v958_v19 = vpop.f32.mrf.mxu1 }
 0x70d   : > { %v959_v20 = vadd.f32 %v1149_v56, %v958_v19  ;;  %v984_v21 = vmul.f32 0.5, %v981_v17 }
 0x70f   : > { %v964_v23 = vmul.f32 %v959_v20, %v959_v20  ;;  %v987_v26 = vmul.f32 %v984_v21, %v956_v6 }
 0x711   : > { %v967_v27 = vmul.f32 %v964_v23, %v959_v20  ;;  %v989_v28 = vpack.c.bf16 %v987_v26, %v986_v24 }
 0x713   : > { %v970_v30 = vmul.f32 0.044715, %v967_v27  ;;  %1027 = vmatmul.bf16.vlgmr.msrb.gmra.mxu3 %v989_v28 }
 0x714   : > { %v960_v31 = vpop.f32.mrf.mxu1 }
 0x715   : > { %v973_v32 = vadd.f32 %v970_v30, %v959_v20 }
 0x717   : > { %v976_v0 = vmul.f32 0.7978846, %v973_v32 }
 0x719   : > { %1193 = vtanh.f32 %v976_v0 }
 0x71f   : > { %v1194_v34 = vpop.eup %1193 }
 0x720   : > { %v982_v35 = vadd.f32 1.0, %v1194_v34 }
 0x722   : > { %v985_v36 = vmul.f32 0.5, %v982_v35 }
 0x724   : > { %v988_v4 = vmul.f32 %v985_v36, %v959_v20 }
 0x726   : > { %v990_v37 = vpack.c.bf16 %v988_v4, %v988_v4 }
 0x728   : > { %1032 = vmatmul.bf16.gmra.mxu3 %v990_v37 }
 0x796   : > { %v1028_v38 = vpop.f32.mrf.mxu3 }
 0x797   : > { %v1029_v39 = vadd.f32 %v1150_v12, %v1028_v38 }
 0x799   : > { %v1037_v40 = vadd.f32 %v1029_v39, %v1408_v25 }
 0x79b   : > { %1040 = vst.msk [vmem:[%s440_s24] sm:$0xff] %vm445_vm0, %v1037_v40 }
 0x79e   : > { %v1030_v1 = vpop.f32.mrf.mxu3 }
 0x79f   : > { %v1031_v41 = vadd.f32 %v1150_v12, %v1030_v1 }
 0x7a1   : > { %v1038_v22 = vadd.f32 %v1031_v41, %v1413_v29 }
 0x7a3   : > { %1041 = vst.msk [vmem:[%s440_s24 + $0x8] sm:$0xff] %vm445_vm0, %v1038_v22 }
 0x7ab   : > { %v1033_v42 = vpop.f32.mrf.mxu3 }
 0x7ac   : > { %v1034_v43 = vadd.f32 %v1150_v12, %v1033_v42 }
 0x7ae   : > { %v1039_v44 = vadd.f32 %v1034_v43, %v1418_v33 }
 0x7b0   : > { %1042 = vst.msk [vmem:[%s440_s24 + $0x10] sm:$0x1] %vm452_vm1, %v1039_v44 }
 0x7b3   : > { %v1035_v45 = vpop.f32.mrf.mxu3 }
 0x7b4 PF: > { %s23_s25 = sadd.s32 1, %s1201_s25  }
 0x7b5   : > { %p20_p4 = scmp.ge.s32.totalorder %s23_s25, 4  }
 0x7b7   :  { %22 = sbr.rel (!%p20_p4) target bundleno = 1 (0x1), region = 102 }

// kernel: senpamae_forward.16
= control target key start
LH: loop header
LB: loop body
LE: loop exit
PB: predicated region body
PF: predicated region fallthrough
CT: control target
= control target key end

     0   :  { %s2211_s25 = smov 0   ;;  %s2950_s0 = inlined_call_operand.vmem [shape: f32[2,65,32], index: 0, kind: input, shape index: {}]   ;;  %s2951_s1 = inlined_call_operand.vmem [shape: f32[1,32], index: 1, kind: input, shape index: {}]   ;;  %s2952_s2 = inlined_call_operand.vmem [shape: f32[1,32], index: 2, kind: input, shape index: {}]   ;;  %s2953_s3 = inlined_call_operand.vmem [shape: f32[32,96], index: 3, kind: input, shape index: {}]   ;;  %s2954_s4 = inlined_call_operand.vmem [shape: f32[1,96], index: 4, kind: input, shape index: {}]   ;;  %s2955_s5 = inlined_call_operand.vmem [shape: f32[32,32], index: 5, kind: input, shape index: {}]   ;;  %s2956_s6 = inlined_call_operand.vmem [shape: f32[1,32], index: 6, kind: input, shape index: {}]   ;;  %s2957_s7 = inlined_call_operand.vmem [shape: f32[1,32], index: 7, kind: input, shape index: {}]   ;;  %s2958_s8 = inlined_call_operand.vmem [shape: f32[1,32], index: 8, kind: input, shape index: {}]   ;;  %s2959_s9 = inlined_call_operand.vmem [shape: f32[32,128], index: 9, kind: input, shape index: {}]   ;;  %s2960_s10 = inlined_call_operand.vmem [shape: f32[1,128], index: 10, kind: input, shape index: {}]   ;;  %s2961_s11 = inlined_call_operand.vmem [shape: f32[128,32], index: 11, kind: input, shape index: {}]   ;;  %s2962_s12 = inlined_call_operand.vmem [shape: f32[1,32], index: 12, kind: input, shape index: {}]   ;;  %s2963_s13 = inlined_call_operand.vmem [shape: f32[2,65,32], index: 13, kind: output, shape index: {}]  }
   0x1 LB: > { %s1899_s26 = sadd.s32 4294967295, %s2131_s25   ;;  %p1903_p0 = scmp.ge.s32.totalorder %s2131_s25, 1  ;;  %s2131_s25 = sphi %s2211_s25, %s23_s25  }
   0x2   : > { %p387_p1 = scmp.lt.s32.totalorder %s2131_s25, 3 }
   0x4   : > { %p388_p2 = pnand %p1903_p0, %p387_p1 }
   0x5   : > { %p431_p3 = scmp.lt.s32.totalorder (!%p388_p2), %s1899_s26, 1  ;;  %s2134_s15 = smov (!%p388_p2), 80  }
   0x6   : > { %391 = sbr.rel (%p388_p2) target bundleno = 2240 (0x8c0), region = 72  ;;  %s2135_s16 = smov (!%p388_p2), 96  }
   0x7   : > { %s2136_s17 = smov (!%p388_p2), 112   ;;  %s2137_s18 = smov (!%p388_p2), 48  }
   0x8   : > { %s2139_s19 = smov (!%p388_p2), 64   ;;  %s2140_s20 = smov (!%p388_p2), 16  }
   0xb   : > { %s2965_s26 = smov (!%p431_p3, %s1899_s26), 1  ;;  %vm451_vm0 = vcmask 261120   ;;  %v2133_v14 = vmov 32.0   ;;  %vm476_vm2 = vcmask 253952   ;;  %v691_v60 = vld [vmem:[%s2953_s3 + $0x10] sm:$0xff]  ;;  %v692_v61 = vld [vmem:[%s2953_s3 + $0x18] sm:$0xff] }
   0xc   : > { %s1943_s27 = smul.u32 72, %s2965_s26  ;;  %1988 = vrcp.f32 %v2133_v14  ;;  %v694_v63 = vpack.c.bf16 %v692_v61, %v691_v60 }
   0xe   : > { %s2227_s30 = scalar_lea.vmem %s2950_s0, %s1943_s27  ;;  %720 = vmatpush.bf16.msra.mxu0 %v694_v63  ;;  %s2918_s28 = scalar_lea.vmem %s2963_s13, %s1943_s27 }
   0xf   : > { %v444_v0 = vld [vmem:[%s2227_s30 + $0x10] sm:$0xff]  ;;  %v442_v1 = vld [vmem:[%s2227_s30] sm:$0xff]  ;;  %v445_v6 = vld [vmem:[%s2227_s30 + $0x18] sm:$0xff] }
  0x10   : > { %v2232_v2 = vld [vmem:[%s2227_s30 + $0x20] sm:$0xff]  ;;  %v458_v3 = vsel %vm451_vm0, %v444_v0, 0.0  ;;  %v452_v4 = vsel %vm451_vm0, %v442_v1, 0.0  ;;  %v443_v7 = vld [vmem:[%s2227_s30 + $0x8] sm:$0xff]  ;;  %v461_v9 = vsel %vm451_vm0, %v445_v6, 0.0  ;;  %v448_v12 = vld [vmem:[%s2227_s30 + $0x30] sm:$0xff] }
  0x11   : > { %v464_v5 = vsel %vm451_vm0, %v2232_v2, 0.0  ;;  %459 = vadd.xlane.f32.xlu1 %v458_v3  ;;  %453 = vadd.xlane.f32.xlu0 %v452_v4  ;;  %v447_v8 = vld [vmem:[%s2227_s30 + $0x28] sm:$0xff]  ;;  %v455_v10 = vsel %vm451_vm0, %v443_v7, 0.0  ;;  %v470_v13 = vsel %vm451_vm0, %v448_v12, 0.0  ;;  %v449_v35 = vld [vmem:[%s2227_s30 + $0x38] sm:$0xff] }
  0x12   : > { %465 = vadd.xlane.f32.xlu2 %v464_v5  ;;  %v467_v11 = vsel %vm451_vm0, %v447_v8, 0.0  ;;  %v1989_v15 = vpop.eup %1988  ;;  %v473_v40 = vsel %vm451_vm0, %v449_v35, 0.0  ;;  %v450_v49 = vld [vmem:[%s2227_s30 + $0x40] sm:$0x1]  ;;  %v690_v3 = vld [vmem:[%s2953_s3 + $0x8] sm:$0xff] }
  0x13   : > { %v481_v16 = vmul.f32 32.0, %v1989_v15  ;;  %vm485_vm1 = vweird.f32 %v1989_v15  ;;  %v477_v53 = vsel %vm476_vm2, %v450_v49, 0.0 }
  0x15   : > { %v482_v17 = vsub.f32 1.0, %v481_v16 }
  0x17   : > { %v483_v18 = vmul.f32 %v1989_v15, %v482_v17 }
  0x19   : > { %462 = vadd.xlane.f32.xlu1 %v461_v9  ;;  %456 = vadd.xlane.f32.xlu0 %v455_v10  ;;  %v484_v19 = vadd.f32 %v1989_v15, %v483_v18 }
  0x1a   : > { %468 = vadd.xlane.f32.xlu2 %v467_v11 }
  0x1b   : > { %v2246_v20 = vsel %vm485_vm1, %v1989_v15, %v484_v19 }
  0x22   : > { %471 = vadd.xlane.f32.xlu2 %v470_v13 }
  0x84   : > { %v460_v21 = vpop.xlane.xlu1 %459  ;;  %v454_v22 = vpop.xlane.xlu0 %453 }
  0x85   : > { %v487_v23 = vmul.f32 %v2246_v20, %v454_v22  ;;  %v466_v24 = vpop.xlane.xlu2 %465  ;;  %v489_v33 = vmul.f32 %v2246_v20, %v460_v21 }
  0x86   : > { %v491_v47 = vmul.f32 %v2246_v20, %v466_v24 }
  0x87   : > { %v2249_v25 = vsub.f32 %v442_v1, %v487_v23  ;;  %v2270_v42 = vsub.f32 %v444_v0, %v489_v33 }
  0x88   : > { %v2286_v54 = vsub.f32 %v2232_v2, %v491_v47  ;;  %v689_v2 = vld [vmem:[%s2953_s3] sm:$0xff] }
  0x89   : > { %v505_v26 = vmul.f32 %v2249_v25, %v2249_v25  ;;  %v507_v50 = vmul.f32 %v2270_v42, %v2270_v42  ;;  %v693_v4 = vpack.c.bf16 %v690_v3, %v689_v2 }
  0x8a   : > { %v509_v57 = vmul.f32 %v2286_v54, %v2286_v54 }
  0x8b   : > { %v514_v27 = vsel %vm451_vm0, %v505_v26, 0.0  ;;  %v520_v55 = vsel %vm451_vm0, %v507_v50, 0.0  ;;  %721 = vmatpush.bf16.msra.mxu0 %v693_v4 }
  0x8c   : > { %v463_v28 = vpop.xlane.xlu1 %462  ;;  %515 = vadd.xlane.f32.xlu0 %v514_v27  ;;  %v457_v29 = vpop.xlane.xlu0 %456  ;;  %v526_v59 = vsel %vm451_vm0, %v509_v57, 0.0 }
  0x8d   : > { %v490_v30 = vmul.f32 %v2246_v20, %v463_v28  ;;  %v488_v31 = vmul.f32 %v2246_v20, %v457_v29  ;;  %v469_v32 = vpop.xlane.xlu2 %468 }
  0x8e   : > { %v492_v34 = vmul.f32 %v2246_v20, %v469_v32 }
  0x8f   : > { %v2259_v36 = vsub.f32 %v445_v6, %v490_v30  ;;  %v2261_v37 = vsub.f32 %v443_v7, %v488_v31 }
  0x90   : > { %v2263_v38 = vsub.f32 %v447_v8, %v492_v34 }
  0x91   : > { %v508_v39 = vmul.f32 %v2259_v36, %v2259_v36  ;;  %v506_v41 = vmul.f32 %v2261_v37, %v2261_v37 }
  0x92   : > { %v510_v46 = vmul.f32 %v2263_v38, %v2263_v38 }
  0x93   : > { %v523_v43 = vsel %vm451_vm0, %v508_v39, 0.0  ;;  %v517_v44 = vsel %vm451_vm0, %v506_v41, 0.0 }
  0x94   : > { %524 = vadd.xlane.f32.xlu2 %v523_v43  ;;  %474 = vadd.xlane.f32.xlu0 %v473_v40  ;;  %v529_v52 = vsel %vm451_vm0, %v510_v46, 0.0 }
  0x95   : > { %518 = vadd.xlane.f32.xlu1 %v517_v44  ;;  %v472_v45 = vpop.xlane.xlu2 %471 }
  0x96   : > { %v493_v48 = vmul.f32 %v2246_v20, %v472_v45 }
  0x98   : > { %v2281_v51 = vsub.f32 %v448_v12, %v493_v48 }
  0x9a   : > { %v511_v56 = vmul.f32 %v2281_v51, %v2281_v51 }
  0x9c   : > { %530 = vadd.xlane.f32.xlu2 %v529_v52  ;;  %478 = vadd.xlane.f32.xlu0 %v477_v53  ;;  %v532_v58 = vsel %vm451_vm0, %v511_v56, 0.0 }
  0x9d   : > { %521 = vadd.xlane.f32.xlu1 %v520_v55  ;;  %v2340_v55 = vld [vmem:[%s2951_s1] ss:$0 sm:$0xff] }
  0xa4   : > { %533 = vadd.xlane.f32.xlu0 %v532_v58 }
  0xa5   : > { %527 = vadd.xlane.f32.xlu1 %v526_v59 }
  0xff   : > { %v516_v62 = vpop.xlane.xlu0 %515 }
 0x100   : > { %v541_v0 = vmul.f32 %v516_v62, %v2246_v20 }
 0x102   : > { %v550_v1 = vadd.f32 1e-05, %v541_v0 }
 0x104   : > { %1990 = vrsqrt.f32 %v550_v1  ;;  %vm565_vm4 = vweird.f32 %v550_v1 }
 0x107   : > { %v525_v5 = vpop.xlane.xlu2 %524  ;;  %v475_v6 = vpop.xlane.xlu0 %474 }
 0x108   : > { %v544_v7 = vmul.f32 %v525_v5, %v2246_v20  ;;  %v519_v8 = vpop.xlane.xlu1 %518  ;;  %v494_v9 = vmul.f32 %v2246_v20, %v475_v6 }
 0x109   : > { %v542_v10 = vmul.f32 %v519_v8, %v2246_v20 }
 0x10a   : > { %v1991_v11 = vpop.eup %1990  ;;  %v2311_v12 = vadd.f32 1e-05, %v544_v7  ;;  %v2313_v13 = vsub.f32 %v449_v35, %v494_v9 }
 0x10b   : > { %v560_v14 = vmul.f32 %v1991_v11, %v550_v1  ;;  %v551_v15 = vadd.f32 1e-05, %v542_v10  ;;  %vm566_vm3 = vweird.f32 %v1991_v11 }
 0x10c   : > { %1992 = vrsqrt.f32 %v2311_v12  ;;  %v512_v16 = vmul.f32 %v2313_v13, %v2313_v13  ;;  %vm567_vm5 = vmor %vm565_vm4, %vm566_vm3  ;;  %vm595_vm11 = vweird.f32 %v2311_v12 }
 0x10d   : > { %v561_v17 = vmul.f32 %v1991_v11, %v560_v14  ;;  %1994 = vrsqrt.f32 %v551_v15  ;;  %vm575_vm6 = vweird.f32 %v551_v15 }
 0x10e   : > { %v535_v18 = vsel %vm451_vm0, %v512_v16, 0.0 }
 0x10f   : > { %v562_v19 = vmul.f32 0.5, %v561_v17  ;;  %536 = vadd.xlane.f32.xlu1 %v535_v18  ;;  %v479_v21 = vpop.xlane.xlu0 %478  ;;  %v531_v22 = vpop.xlane.xlu2 %530 }
 0x110   : > { %v522_v23 = vpop.xlane.xlu1 %521  ;;  %v495_v24 = vmul.f32 %v2246_v20, %v479_v21  ;;  %v546_v31 = vmul.f32 %v531_v22, %v2246_v20 }
 0x111   : > { %v563_v26 = vsub.f32 1.5, %v562_v19  ;;  %v543_v27 = vmul.f32 %v522_v23, %v2246_v20 }
 0x112   : > { %v2321_v28 = vpop.eup %1992  ;;  %v2323_v29 = vsub.f32 %v450_v49, %v495_v24  ;;  %v2330_v41 = vadd.f32 1e-05, %v546_v31 }
 0x113   : > { %v1995_v30 = vpop.eup %1994  ;;  %v552_v32 = vadd.f32 1e-05, %v543_v27  ;;  %v564_v33 = vmul.f32 %v1991_v11, %v563_v26  ;;  %v590_v34 = vmul.f32 %v2321_v28, %v2311_v12  ;;  %vm596_vm12 = vweird.f32 %v2321_v28 }
 0x114   : > { %v570_v35 = vmul.f32 %v1995_v30, %v551_v15  ;;  %v513_v40 = vmul.f32 %v2323_v29, %v2323_v29  ;;  %vm576_vm7 = vweird.f32 %v1995_v30  ;;  %vm597_vm14 = vmor %vm595_vm11, %vm596_vm12  ;;  %vm615_vm3 = vweird.f32 %v2330_v41 }
 0x115   : > { %1996 = vrsqrt.f32 %v552_v32  ;;  %v568_v43 = vsel %vm567_vm5, %v1991_v11, %v564_v33  ;;  %v591_v44 = vmul.f32 %v2321_v28, %v590_v34  ;;  %vm577_vm8 = vmor %vm575_vm6, %vm576_vm7  ;;  %vm585_vm9 = vweird.f32 %v552_v32 }
 0x116   : > { %v571_v39 = vmul.f32 %v1995_v30, %v570_v35  ;;  %v538_v47 = vsel %vm476_vm2, %v513_v40, 0.0  ;;  %v649_v52 = vmul.f32 %v568_v43, %v2249_v25  ;;  %1998 = vrsqrt.f32 %v2330_v41  ;;  %v2347_v25 = vld [vmem:[%s2952_s2] ss:$0 sm:$0xff] }
 0x117   : > { %539 = vadd.xlane.f32.xlu2 %v538_v47  ;;  %v592_v56 = vmul.f32 0.5, %v591_v44  ;;  %v534_v43 = vpop.xlane.xlu0 %533 }
 0x118   : > { %v572_v45 = vmul.f32 0.5, %v571_v39  ;;  %v528_v46 = vpop.xlane.xlu1 %527  ;;  %v662_v62 = vmul.f32 %v2340_v55, %v649_v52  ;;  %v547_v44 = vmul.f32 %v534_v43, %v2246_v20 }
 0x119   : > { %v545_v48 = vmul.f32 %v528_v46, %v2246_v20  ;;  %v593_v63 = vsub.f32 1.5, %v592_v56 }
 0x11a   : > { %v573_v49 = vsub.f32 1.5, %v572_v45  ;;  %v675_v4 = vadd.f32 %v2347_v25, %v662_v62  ;;  %v556_v45 = vadd.f32 1e-05, %v547_v44 }
 0x11b   : > { %v1997_v50 = vpop.eup %1996  ;;  %v554_v53 = vadd.f32 1e-05, %v545_v48  ;;  %v594_v6 = vmul.f32 %v2321_v28, %v593_v63 }
 0x11c   : > { %v574_v57 = vmul.f32 %v1995_v30, %v573_v49  ;;  %v580_v58 = vmul.f32 %v1997_v50, %v552_v32  ;;  %vm586_vm10 = vweird.f32 %v1997_v50  ;;  %v1999_v1 = vpop.eup %1998  ;;  %vm625_vm7 = vweird.f32 %v556_v45 }
 0x11d   : > { %2000 = vrsqrt.f32 %v554_v53  ;;  %vm587_vm13 = vmor %vm585_vm9, %vm586_vm10  ;;  %v610_v7 = vmul.f32 %v1999_v1, %v2330_v41  ;;  %v598_v12 = vsel %vm597_vm14, %v2321_v28, %v594_v6  ;;  %vm605_vm15 = vweird.f32 %v554_v53 }
 0x11e   : > { %v578_v59 = vsel %vm577_vm8, %v1995_v30, %v574_v57  ;;  %v581_v60 = vmul.f32 %v1997_v50, %v580_v58  ;;  %v652_v18 = vmul.f32 %v598_v12, %v2259_v36  ;;  %vm616_vm4 = vweird.f32 %v1999_v1 }
 0x11f   : > { %v650_v61 = vmul.f32 %v578_v59, %v2261_v37  ;;  %v611_v15 = vmul.f32 %v1999_v1, %v610_v7  ;;  %vm617_vm6 = vmor %vm615_vm3, %vm616_vm4  ;;  %2002 = vrsqrt.f32 %v556_v45  ;;  %vm975_vm3 = vcmask 1040384  }
 0x120   : > { %v582_v0 = vmul.f32 0.5, %v581_v60  ;;  %v665_v23 = vmul.f32 %v2340_v55, %v652_v18  ;;  %vm840_vm4 = vcmask 531456  }
 0x121   : > { %v663_v2 = vmul.f32 %v2340_v55, %v650_v61  ;;  %v612_v19 = vmul.f32 0.5, %v611_v15 }
 0x122   : > { %v583_v3 = vsub.f32 1.5, %v582_v0 }
 0x123   : > { %v2001_v37 = vpop.eup %2000  ;;  %v676_v5 = vadd.f32 %v2347_v25, %v663_v2  ;;  %v613_v24 = vsub.f32 1.5, %v612_v19 }
 0x124   : > { %v584_v8 = vmul.f32 %v1997_v50, %v583_v3  ;;  %v600_v9 = vmul.f32 %v2001_v37, %v554_v53  ;;  %vm606_vm1 = vweird.f32 %v2001_v37 }
 0x125   : > { %v684_v10 = vpack.c.bf16 %v676_v5, %v675_v4  ;;  %vm607_vm5 = vmor %vm605_vm15, %vm606_vm1  ;;  %v614_v28 = vmul.f32 %v1999_v1, %v613_v24  ;;  %v2003_v46 = vpop.eup %2002  ;;  %vm767_vm1 = vcmask 130048  }
 0x126   : > { %v588_v11 = vsel %vm587_vm13, %v1997_v50, %v584_v8  ;;  %v601_v14 = vmul.f32 %v2001_v37, %v600_v9  ;;  %vm626_vm8 = vweird.f32 %v2003_v46 }
 0x127   : > { %1906 = vmatmul.msk.bf16.vlgmr.msra.gmra.mxu0 %vm451_vm0, %v684_v10  ;;  %v651_v16 = vmul.f32 %v588_v11, %v2270_v42  ;;  %v678_v42 = vadd.f32 %v2347_v25, %v665_v23  ;;  %v618_v31 = vsel %vm617_vm6, %v1999_v1, %v614_v28  ;;  %vm627_vm9 = vmor %vm625_vm7, %vm626_vm8  ;;  %v1982_v23 = vld [vmem:[%s2954_s4] ss:$0 sm:$0xff] }
 0x128   : > { %v602_v17 = vmul.f32 0.5, %v601_v14  ;;  %v654_v33 = vmul.f32 %v618_v31, %v2263_v38 }
 0x129   : > { %v664_v21 = vmul.f32 %v2340_v55, %v651_v16 }
 0x12a   : > { %v603_v22 = vsub.f32 1.5, %v602_v17  ;;  %v667_v35 = vmul.f32 %v2340_v55, %v654_v33 }
 0x12b   : > { %v677_v26 = vadd.f32 %v2347_v25, %v664_v21 }
 0x12c   : > { %v604_v27 = vmul.f32 %v2001_v37, %v603_v22  ;;  %v680_v40 = vadd.f32 %v2347_v25, %v667_v35 }
 0x12d   : > { %v685_v36 = vpack.c.bf16 %v678_v42, %v677_v26 }
 0x12e   : > { %v608_v30 = vsel %vm607_vm5, %v2001_v37, %v604_v27  ;;  %vm865_vm5 = vcmask 524288  }
 0x12f   : > { %v653_v32 = vmul.f32 %v608_v30, %v2286_v54  ;;  %v620_v54 = vmul.f32 %v2003_v46, %v556_v45 }
 0x131   : > { %v666_v34 = vmul.f32 %v2340_v55, %v653_v32  ;;  %v621_v47 = vmul.f32 %v2003_v46, %v620_v54 }
 0x133   : > { %v679_v39 = vadd.f32 %v2347_v25, %v666_v34  ;;  %v622_v50 = vmul.f32 0.5, %v621_v47 }
 0x135   : > { %v686_v41 = vpack.c.bf16 %v680_v40, %v679_v39  ;;  %v623_v52 = vsub.f32 1.5, %v622_v50 }
 0x137   : > { %1907 = vmatmul.msk.bf16.gmra.mxu0 %vm451_vm0, %v685_v36  ;;  %v624_v58 = vmul.f32 %v2003_v46, %v623_v52 }
 0x139   : > { %v628_v62 = vsel %vm627_vm9, %v2003_v46, %v624_v58 }
 0x13a   : > { %v655_v1 = vmul.f32 %v628_v62, %v2281_v51 }
 0x13c   : > { %v668_v6 = vmul.f32 %v2340_v55, %v655_v1 }
 0x13e   : > { %v681_v10 = vadd.f32 %v2347_v25, %v668_v6 }
 0x147   : > { %1908 = vmatmul.msk.bf16.gmra.mxu0 %vm451_vm0, %v686_v41 }
 0x182   : > { %v537_v38 = vpop.xlane.xlu1 %536 }
 0x183   : > { %v548_v48 = vmul.f32 %v537_v38, %v2246_v20 }
 0x185   : > { %v557_v49 = vadd.f32 1e-05, %v548_v48 }
 0x187   : > { %2004 = vrsqrt.f32 %v557_v49  ;;  %vm635_vm11 = vweird.f32 %v557_v49 }
 0x18a   : > { %v540_v53 = vpop.xlane.xlu2 %539 }
 0x18b   : > { %v549_v57 = vmul.f32 %v540_v53, %v2246_v20 }
 0x18d   : > { %v2005_v56 = vpop.eup %2004  ;;  %v558_v60 = vadd.f32 1e-05, %v549_v57 }
 0x18e   : > { %v630_v59 = vmul.f32 %v2005_v56, %v557_v49  ;;  %vm636_vm10 = vweird.f32 %v2005_v56 }
 0x18f   : > { %2006 = vrsqrt.f32 %v558_v60  ;;  %vm637_vm12 = vmor %vm635_vm11, %vm636_vm10  ;;  %vm645_vm13 = vweird.f32 %v558_v60 }
 0x190   : > { %v631_v61 = vmul.f32 %v2005_v56, %v630_v59 }
 0x192   : > { %v632_v63 = vmul.f32 0.5, %v631_v61 }
 0x194   : > { %v633_v0 = vsub.f32 1.5, %v632_v63 }
 0x195   : > { %v2007_v3 = vpop.eup %2006 }
 0x196   : > { %v634_v2 = vmul.f32 %v2005_v56, %v633_v0  ;;  %v640_v4 = vmul.f32 %v2007_v3, %v558_v60  ;;  %vm646_vm14 = vweird.f32 %v2007_v3 }
 0x197   : > { %vm647_vm15 = vmor %vm645_vm13, %vm646_vm14 }
 0x198   : > { %v638_v37 = vsel %vm637_vm12, %v2005_v56, %v634_v2  ;;  %v641_v7 = vmul.f32 %v2007_v3, %v640_v4 }
 0x199   : > { %v656_v5 = vmul.f32 %v638_v37, %v2313_v13  ;;  %v2138_v37 = vmov 0  }
 0x19a   : > { %v642_v9 = vmul.f32 0.5, %v641_v7  ;;  %v2428_v4 = vsel %vm975_vm3, 65535, %v2138_v37 }
 0x19b   : > { %v669_v8 = vmul.f32 %v2340_v55, %v656_v5 }
 0x19c   : > { %v643_v14 = vsub.f32 1.5, %v642_v9 }
 0x19d   : > { %v682_v11 = vadd.f32 %v2347_v25, %v669_v8 }
 0x19e   : > { %v644_v12 = vmul.f32 %v2007_v3, %v643_v14 }
 0x19f   : > { %v687_v51 = vpack.c.bf16 %v682_v11, %v681_v10 }
 0x1a0   : > { %v648_v15 = vsel %vm647_vm15, %v2007_v3, %v644_v12 }
 0x1a1   : > { %1909 = vmatmul.msk.bf16.gmra.mxu0 %vm451_vm0, %v687_v51  ;;  %v657_v13 = vmul.f32 %v648_v15, %v2323_v29 }
 0x1a3   : > { %v670_v17 = vmul.f32 %v2340_v55, %v657_v13 }
 0x1a4   : > { %v723_v16 = vpop.f32.mrf.mxu0 }
 0x1a5   : > { %v683_v18 = vadd.f32 %v2347_v25, %v670_v17  ;;  %v724_v31 = vadd.f32 %v1982_v23, %v723_v16 }
 0x1a7   : > { %v688_v21 = vpack.c.bf16 %v683_v18, %v683_v18 }
 0x1ac   : > { %v725_v19 = vpop.f32.mrf.mxu0 }
 0x1ad   : > { %v726_v25 = vadd.f32 %v1982_v23, %v725_v19 }
 0x1af   : > { %v2395_v32 = vpack.c.bf16 %v726_v25, %v724_v31 }
 0x1b1   : > { %1910 = vmatmul.msk.bf16.gmra.mxu0 %vm451_vm0, %v688_v21 }
 0x1b4   : > { %v728_v22 = vpop.f32.mrf.mxu0 }
 0x1b5   : > { %v729_v26 = vadd.f32 %v1982_v23, %v728_v22 }
 0x1bc   : > { %v730_v24 = vpop.f32.mrf.mxu0 }
 0x1bd   : > { %v731_v27 = vadd.f32 %v1982_v23, %v730_v24 }
 0x1bf   : > { %v2390_v42 = vpack.c.bf16 %v731_v27, %v729_v26 }
 0x1c4   : > { %v733_v29 = vpop.f32.mrf.mxu0 }
 0x1c5   : > { %v734_v36 = vadd.f32 %v1982_v23, %v733_v29 }
 0x1cc   : > { %v735_v28 = vpop.f32.mrf.mxu0 }
 0x1cd   : > { %v736_v55 = vadd.f32 %v1982_v23, %v735_v28 }
 0x1cf   : > { %v2392_v30 = vpack.c.bf16 %v736_v55, %v734_v36 }
 0x1d1   : > { %1028 = vrot.lane.b32.xlu2 %v2392_v30, %s2134_s15 }
 0x1d9   : > { %1024 = vrot.lane.b32.xlu2 %v2395_v32, %s2134_s15 }
 0x21e   : > { %v738_v33 = vpop.f32.mrf.mxu0 }
 0x21f   : > { %v739_v35 = vadd.f32 %v1982_v23, %v738_v33 }
 0x226   : > { %v740_v34 = vpop.f32.mrf.mxu0 }
 0x227   : > { %v741_v39 = vadd.f32 %v1982_v23, %v740_v34 }
 0x229   : > { %v2398_v40 = vpack.c.bf16 %v741_v39, %v739_v35 }
 0x22b   : > { %763 = vrot.lane.b32.xlu2 %v2398_v40, %s2135_s16  ;;  %1030 = vrot.lane.b32.xlu1 %v2398_v40, %s2134_s15  ;;  %v1029_v46 = vpop.permute.xlu2 %1028 }
 0x22c   : > { %v1056_v61 = vsel %vm767_vm1, %v1029_v46, 0 }
 0x22e   : > { %v743_v41 = vpop.f32.mrf.mxu0 }
 0x22f   : > { %v744_v43 = vadd.f32 %v1982_v23, %v743_v41 }
 0x231   : > { %v2402_v44 = vpack.c.bf16 %v744_v43, %v744_v43 }
 0x233   : > { %1032 = vrot.lane.b32.xlu0 %v2402_v44, %s2134_s15  ;;  %759 = vrot.lane.b32.xlu2 %v2390_v42, %s2135_s16  ;;  %v1025_v47 = vpop.permute.xlu2 %1024 }
 0x234   : > { %765 = vrot.lane.b32.xlu1 %v2402_v44, %s2135_s16  ;;  %v1050_v7 = vsel %vm767_vm1, %v1025_v47, 0 }
 0x236   : > { %v745_v45 = vpop.f32.mrf.mxu0 }
 0x23b   : > { %1026 = vrot.lane.b32.xlu0 %v2390_v42, %s2134_s15  ;;  %1020 = vrot.lane.b32.xlu2 %v2398_v40, %s2136_s17 }
 0x23c   : > { %761 = vrot.lane.b32.xlu1 %v2392_v30, %s2135_s16 }
 0x243   : > { %1014 = vrot.lane.b32.xlu0 %v2395_v32, %s2136_s17  ;;  %1214 = vrot.lane.b32.xlu2 %v2392_v30, %s2137_s18 }
 0x244   : > { %757 = vrot.lane.b32.xlu1 %v2395_v32, %s2135_s16 }
 0x24b   : > { %1016 = vrot.lane.b32.xlu0 %v2390_v42, %s2136_s17 }
 0x24c   : > { %1022 = vrot.lane.b32.xlu1 %v2402_v44, %s2136_s17 }
 0x253   : > { %1018 = vrot.lane.b32.xlu0 %v2392_v30, %s2136_s17 }
 0x254   : > { %1218 = vrot.lane.b32.xlu1 %v2402_v44, %s2137_s18 }
 0x25b   : > { %1216 = vrot.lane.b32.xlu0 %v2398_v40, %s2137_s18 }
 0x263   : > { %1212 = vrot.lane.b32.xlu0 %v2390_v42, %s2137_s18 }
 0x26b   : > { %1210 = vrot.lane.b32.xlu0 %v2395_v32, %s2137_s18 }
 0x285   : > { %v764_v52 = vpop.permute.xlu2 %763 }
 0x286   : > { %v793_v58 = vsel %vm767_vm1, %v764_v52, 0 }
 0x28d   : > { %v760_v63 = vpop.permute.xlu2 %759 }
 0x28e   : > { %v787_v3 = vsel %vm767_vm1, %v760_v63, 0 }
 0x295   : > { %v1021_v8 = vpop.permute.xlu2 %1020 }
 0x29d   : > { %v1031_v54 = vpop.permute.xlu1 %1030  ;;  %v1215_v14 = vpop.permute.xlu2 %1214 }
 0x29e   : > { %v1059_v57 = vsel %vm767_vm1, %v1031_v54, 0 }
 0x2a5   : > { %v1033_v38 = vpop.permute.xlu0 %1032 }
 0x2a6   : > { %v766_v48 = vpop.permute.xlu1 %765  ;;  %v1062_v49 = vsel %vm767_vm1, %v1033_v38, 0 }
 0x2a7   : > { %v796_v50 = vsel %vm767_vm1, %v766_v48, 0  ;;  %1067 = vmatpush.bf16.xpose.msra.mxu3 %v1062_v49 }
 0x2a8   : > { %801 = vmatpush.bf16.xpose.msra.mxu1 %v796_v50 }
 0x2ad   : > { %v1027_v53 = vpop.permute.xlu0 %1026 }
 0x2ae   : > { %v762_v56 = vpop.permute.xlu1 %761  ;;  %v1053_v2 = vsel %vm767_vm1, %v1027_v53, 0 }
 0x2af   : > { %1068 = vmatpush.bf16.xpose.msra.mxu3 %v1059_v57  ;;  %v790_v62 = vsel %vm767_vm1, %v762_v56, 0 }
 0x2b0   : > { %802 = vmatpush.bf16.xpose.msra.mxu1 %v793_v58 }
 0x2b5   : > { %v1015_v59 = vpop.permute.xlu0 %1014 }
 0x2b6   : > { %v758_v60 = vpop.permute.xlu1 %757 }
 0x2b7   : > { %1069 = vmatpush.bf16.xpose.msra.mxu3 %v1056_v61  ;;  %v784_v10 = vsel %vm767_vm1, %v758_v60, 0 }
 0x2b8   : > { %803 = vmatpush.bf16.xpose.msra.mxu1 %v790_v62 }
 0x2bd   : > { %v1017_v0 = vpop.permute.xlu0 %1016 }
 0x2be   : > { %v1023_v1 = vpop.permute.xlu1 %1022 }
 0x2bf   : > { %1070 = vmatpush.bf16.xpose.msra.mxu3 %v1053_v2 }
 0x2c0   : > { %804 = vmatpush.bf16.xpose.msra.mxu1 %v787_v3 }
 0x2c5   : > { %v1019_v5 = vpop.permute.xlu0 %1018 }
 0x2c6   : > { %v1219_v6 = vpop.permute.xlu1 %1218 }
 0x2c7   : > { %v1240_v9 = vand.u32 %v1219_v6, %v2428_v4  ;;  %1071 = vmatpush.bf16.xpose.msra.mxu3 %v1050_v7 }
 0x2c8   : > { %805 = vmatpush.bf16.xpose.msra.mxu1 %v784_v10 }
 0x2c9   : > { %1245 = vmatpush.bf16.msrb.mxu0 %v1240_v9 }
 0x2cd   : > { %v1217_v11 = vpop.permute.xlu0 %1216 }
 0x2ce   : > { %1921 = vmatmul.msk.bf16.vlgmr.msra.gmra.mxu3 %vm767_vm1, %v1015_v59  ;;  %1246 = vmatpush.bf16.msrb.mxu0 %v1217_v11 }
 0x2cf   : > { %1911 = vmatmul.msk.bf16.vlgmr.msra.gmra.mxu1 %vm767_vm1, %v2395_v32 }
 0x2d2   : > { %1247 = vmatpush.bf16.msrb.mxu0 %v1215_v14 }
 0x2d5   : > { %v1213_v51 = vpop.permute.xlu0 %1212 }
 0x2d6   : > { %1248 = vmatpush.bf16.msrb.mxu0 %v1213_v51 }
 0x2dd   : > { %v1211_v12 = vpop.permute.xlu0 %1210 }
 0x2de   : > { %1922 = vmatmul.msk.bf16.gmra.mxu3 %vm767_vm1, %v1017_v0  ;;  %1249 = vmatpush.bf16.msrb.mxu0 %v1211_v12 }
 0x2df   : > { %1912 = vmatmul.msk.bf16.gmra.mxu1 %vm767_vm1, %v2390_v42 }
 0x2ee   : > { %1923 = vmatmul.msk.bf16.gmra.mxu3 %vm767_vm1, %v1019_v5 }
 0x2ef   : > { %1913 = vmatmul.msk.bf16.gmra.mxu1 %vm767_vm1, %v2392_v30 }
 0x2fe   : > { %1924 = vmatmul.msk.bf16.gmra.mxu3 %vm767_vm1, %v1021_v8 }
 0x2ff   : > { %1914 = vmatmul.msk.bf16.gmra.mxu1 %vm767_vm1, %v2398_v40 }
 0x30e   : > { %1925 = vmatmul.msk.bf16.gmra.mxu3 %vm767_vm1, %v1023_v1 }
 0x30f   : > { %1915 = vmatmul.msk.bf16.gmra.mxu1 %vm767_vm1, %v2402_v44 }
 0x34c   : > { %v807_v15 = vpop.f32.mrf.mxu1 }
 0x34d   : > { %v2448_v13 = vmul.f32 0.25, %v807_v15 }
 0x34f   : > { %v841_v16 = vsel %vm840_vm4, %v2448_v13, -inf }
 0x350   : > { %842 = vmax.xlane.f32.xlu0 %v841_v16 }
 0x351   : > { %v1073_v17 = vpop.f32.mrf.mxu3 }
 0x352   : > { %v2452_v18 = vmul.f32 0.25, %v1073_v17 }
 0x354   : > { %v809_v19 = vpop.f32.mrf.mxu1  ;;  %v1106_v22 = vsel %vm840_vm4, %v2452_v18, -inf }
 0x355   : > { %v2454_v21 = vmul.f32 0.25, %v809_v19 }
 0x357   : > { %v844_v23 = vsel %vm840_vm4, %v2454_v21, -inf }
 0x358   : > { %1107 = vmax.xlane.f32.xlu0 %v1106_v22  ;;  %845 = vmax.xlane.f32.xlu2 %v844_v23 }
 0x359   : > { %v1075_v24 = vpop.f32.mrf.mxu3 }
 0x35a   : > { %v2460_v26 = vmul.f32 0.25, %v1075_v24 }
 0x35c   : > { %v812_v27 = vpop.f32.mrf.mxu1  ;;  %v1109_v28 = vsel %vm840_vm4, %v2460_v26, -inf }
 0x35d   : > { %v2462_v29 = vmul.f32 0.25, %v812_v27 }
 0x35f   : > { %v847_v36 = vsel %vm840_vm4, %v2462_v29, -inf }
 0x360   : > { %1110 = vmax.xlane.f32.xlu2 %v1109_v28  ;;  %848 = vmax.xlane.f32.xlu0 %v847_v36 }
 0x361   : > { %v1078_v55 = vpop.f32.mrf.mxu3 }
 0x362   : > { %v2468_v25 = vmul.f32 0.25, %v1078_v55 }
 0x364   : > { %v814_v31 = vpop.f32.mrf.mxu1  ;;  %v1112_v33 = vsel %vm840_vm4, %v2468_v25, -inf }
 0x365   : > { %v2472_v34 = vmul.f32 0.25, %v814_v31  ;;  %1113 = vmax.xlane.f32.xlu1 %v1112_v33 }
 0x367   : > { %v850_v35 = vsel %vm840_vm4, %v2472_v34, -inf }
 0x368   : > { %851 = vmax.xlane.f32.xlu2 %v850_v35 }
 0x369   : > { %v1080_v39 = vpop.f32.mrf.mxu3 }
 0x36a   : > { %v2476_v41 = vmul.f32 0.25, %v1080_v39 }
 0x36c   : > { %v817_v43 = vpop.f32.mrf.mxu1  ;;  %v1115_v45 = vsel %vm840_vm4, %v2476_v41, -inf }
 0x36d   : > { %v2480_v46 = vmul.f32 0.25, %v817_v43  ;;  %1116 = vmax.xlane.f32.xlu0 %v1115_v45 }
 0x36f   : > { %v853_v54 = vsel %vm840_vm4, %v2480_v46, -inf }
 0x370   : > { %854 = vmax.xlane.f32.xlu2 %v853_v54 }
 0x371   : > { %v1083_v47 = vpop.f32.mrf.mxu3 }
 0x372   : > { %v2484_v38 = vmul.f32 0.25, %v1083_v47 }
 0x374   : > { %v819_v48 = vpop.f32.mrf.mxu1  ;;  %v1118_v50 = vsel %vm840_vm4, %v2484_v38, -inf }
 0x375   : > { %v2486_v49 = vmul.f32 0.25, %v819_v48 }
 0x377   : > { %v856_v52 = vsel %vm840_vm4, %v2486_v49, -inf }
 0x378   : > { %1119 = vmax.xlane.f32.xlu2 %v1118_v50  ;;  %857 = vmax.xlane.f32.xlu0 %v856_v52 }
 0x379   : > { %v1085_v53 = vpop.f32.mrf.mxu3 }
 0x37a   : > { %v2492_v56 = vmul.f32 0.25, %v1085_v53 }
 0x37c   : > { %v822_v57 = vpop.f32.mrf.mxu1  ;;  %v1121_v58 = vsel %vm840_vm4, %v2492_v56, -inf }
 0x37d   : > { %1122 = vmax.xlane.f32.xlu1 %v1121_v58  ;;  %v2527_v31 = vmul.f32 0.25, %v822_v57 }
 0x37f   : > { %v859_v45 = vsel %vm840_vm4, %v2527_v31, -inf }
 0x381   : > { %v1088_v59 = vpop.f32.mrf.mxu3 }
 0x382   : > { %v2496_v60 = vmul.f32 0.25, %v1088_v59 }
 0x384   : > { %v824_v61 = vpop.f32.mrf.mxu1  ;;  %v1124_v62 = vsel %vm840_vm4, %v2496_v60, -inf }
 0x385   : > { %1125 = vmax.xlane.f32.xlu0 %v1124_v62  ;;  %v2500_v63 = vmul.f32 0.25, %v824_v61 }
 0x387   : > { %v862_v37 = vsel %vm840_vm4, %v2500_v63, -inf }
 0x389   : > { %v1090_v0 = vpop.f32.mrf.mxu3 }
 0x38a   : > { %v2502_v1 = vmul.f32 0.25, %v1090_v0 }
 0x38c   : > { %v2504_v2 = vpop.f32.mrf.mxu1  ;;  %v1127_v3 = vsel %vm840_vm4, %v2502_v1, -inf }
 0x38d   : > { %1128 = vmax.xlane.f32.xlu2 %v1127_v3  ;;  %863 = vmax.xlane.f32.xlu0 %v862_v37 }
 0x391   : > { %v1093_v5 = vpop.f32.mrf.mxu3 }
 0x392   : > { %v2529_v35 = vmul.f32 0.25, %v1093_v5 }
 0x394   : > { %v829_v6 = vpop.f32.mrf.mxu1 }
 0x399   : > { %v1095_v7 = vpop.f32.mrf.mxu3 }
 0x3c3   : > { %v843_v8 = vpop.xlane.xlu0 %842 }
 0x3c4   : > { %v869_v9 = vsub.f32 %v2448_v13, %v843_v8 }
 0x3c6   : > { %v878_v10 = vmul.f32 1.442695, %v869_v9 }
 0x3c8   : > { %2008 = vpow2.f32 %v878_v10 }
 0x3cb   : > { %v1108_v11 = vpop.xlane.xlu0 %1107  ;;  %v846_v14 = vpop.xlane.xlu2 %845 }
 0x3cc   : > { %v1133_v51 = vsub.f32 %v2452_v18, %v1108_v11  ;;  %v870_v12 = vsub.f32 %v2454_v21, %v846_v14 }
 0x3ce   : > { %v2513_v15 = vpop.eup %2008  ;;  %v1142_v16 = vmul.f32 1.442695, %v1133_v51  ;;  %v880_v17 = vmul.f32 1.442695, %v870_v12 }
 0x3cf   : > { %v896_v19 = vsel %vm840_vm4, %v2513_v15, 0.0 }
 0x3d0   : > { %2010 = vpow2.f32 %v1142_v16  ;;  %897 = vadd.xlane.f32.xlu0 %v896_v19 }
 0x3d1   : > { %2012 = vpow2.f32 %v880_v17 }
 0x3d3   : > { %v1111_v22 = vpop.xlane.xlu2 %1110  ;;  %v849_v21 = vpop.xlane.xlu0 %848 }
 0x3d4   : > { %v1134_v13 = vsub.f32 %v2460_v26, %v1111_v22  ;;  %v871_v8 = vsub.f32 %v2462_v29, %v849_v21 }
 0x3d6   : > { %v2518_v23 = vpop.eup %2010  ;;  %v1144_v24 = vmul.f32 1.442695, %v1134_v13  ;;  %v882_v9 = vmul.f32 1.442695, %v871_v8 }
 0x3d7   : > { %v2520_v27 = vpop.eup %2012  ;;  %v1160_v18 = vsel %vm840_vm4, %v2518_v23, 0.0 }
 0x3d8   : > { %2014 = vpow2.f32 %v1144_v24  ;;  %1161 = vadd.xlane.f32.xlu2 %v1160_v18  ;;  %v899_v28 = vsel %vm840_vm4, %v2520_v27, 0.0  ;;  %v1114_v36 = vpop.xlane.xlu1 %1113 }
 0x3d9   : > { %900 = vadd.xlane.f32.xlu0 %v899_v28  ;;  %v1135_v55 = vsub.f32 %v2468_v25, %v1114_v36  ;;  %v1130_v25 = vsel %vm865_vm5, %v2529_v35, -inf }
 0x3db   : > { %v1146_v26 = vmul.f32 1.442695, %v1135_v55  ;;  %v852_v33 = vpop.xlane.xlu2 %851 }
 0x3dd   : > { %2016 = vpow2.f32 %v1146_v26 }
 0x3de   : > { %v2531_v39 = vpop.eup %2014 }
 0x3df   : > { %v1163_v43 = vsel %vm840_vm4, %v2531_v39, 0.0 }
 0x3e0   : > { %1164 = vadd.xlane.f32.xlu1 %v1163_v43  ;;  %860 = vmax.xlane.f32.xlu2 %v859_v45  ;;  %v1117_v54 = vpop.xlane.xlu0 %1116 }
 0x3e1   : > { %1131 = vmax.xlane.f32.xlu0 %v1130_v25  ;;  %v1136_v47 = vsub.f32 %v2476_v41, %v1117_v54 }
 0x3e3   : > { %v1148_v48 = vmul.f32 1.442695, %v1136_v47  ;;  %v855_v50 = vpop.xlane.xlu2 %854  ;;  %v2540_v52 = vpop.eup %2016  ;;  %v2596_v47 = vmul.f32 0.25, %v2504_v2 }
 0x3e4   : > { %v1166_v53 = vsel %vm840_vm4, %v2540_v52, 0.0  ;;  %v873_v12 = vsub.f32 %v2480_v46, %v855_v50 }
 0x3e5   : > { %2018 = vpow2.f32 %v1148_v48 }
 0x3e6   : > { %v886_v17 = vmul.f32 1.442695, %v873_v12 }
 0x3e8   : > { %1167 = vadd.xlane.f32.xlu1 %v1166_v53 }
 0x3eb   : > { %v1120_v57 = vpop.xlane.xlu2 %1119  ;;  %v2544_v58 = vpop.eup %2018 }
 0x3ec   : > { %v1137_v59 = vsub.f32 %v2484_v38, %v1120_v57  ;;  %v1169_v62 = vsel %vm840_vm4, %v2544_v58, 0.0  ;;  %v858_v38 = vpop.xlane.xlu0 %857 }
 0x3ed   : > { %v874_v22 = vsub.f32 %v2486_v49, %v858_v38 }
 0x3ee   : > { %v1150_v61 = vmul.f32 1.442695, %v1137_v59  ;;  %v866_v59 = vsel %vm865_vm5, %v2596_v47, -inf }
 0x3ef   : > { %v888_v18 = vmul.f32 1.442695, %v874_v22 }
 0x3f0   : > { %2020 = vpow2.f32 %v1150_v61  ;;  %1170 = vadd.xlane.f32.xlu1 %v1169_v62  ;;  %v1123_v37 = vpop.xlane.xlu1 %1122 }
 0x3f1   : > { %v1138_v6 = vsub.f32 %v2492_v56, %v1123_v37 }
 0x3f6   : > { %v2549_v41 = vpop.eup %2020 }
 0x3f7   : > { %v1172_v0 = vsel %vm840_vm4, %v2549_v41, 0.0 }
 0x3f8   : > { %952 = vrot.lane.b32.xlu2 %v2398_v40, %s2139_s19  ;;  %1173 = vadd.xlane.f32.xlu0 %v1172_v0  ;;  %v1126_v3 = vpop.xlane.xlu0 %1125  ;;  %v1152_v40 = vmul.f32 1.442695, %v1138_v6 }
 0x3f9   : > { %v1139_v5 = vsub.f32 %v2496_v60, %v1126_v3 }
 0x3fb   : > { %v1154_v7 = vmul.f32 1.442695, %v1139_v5 }
 0x3fd   : > { %2022 = vpow2.f32 %v1154_v7 }
 0x3fe   : > { %2024 = vpow2.f32 %v1152_v40 }
 0x3ff   : > { %2026 = vpow2.f32 %v882_v9 }
 0x400   : > { %950 = vrot.lane.b32.xlu2 %v2392_v30, %s2139_s19  ;;  %v872_v30 = vsub.f32 %v2472_v34, %v852_v33  ;;  %v864_v16 = vpop.xlane.xlu0 %863 }
 0x401   : > { %v876_v26 = vsub.f32 %v2500_v63, %v864_v16 }
 0x403   : > { %v892_v54 = vmul.f32 1.442695, %v876_v26 }
 0x408   : > { %948 = vrot.lane.b32.xlu2 %v2390_v42, %s2139_s19  ;;  %v2562_v42 = vpop.eup %2022 }
 0x409   : > { %954 = vrot.lane.b32.xlu1 %v2402_v44, %s2139_s19  ;;  %v1129_v44 = vpop.xlane.xlu2 %1128  ;;  %v2564_v10 = vpop.eup %2024  ;;  %v1178_v60 = vsel %vm840_vm4, %v2562_v42, 0.0 }
 0x40a   : > { %v1140_v56 = vsub.f32 %v2502_v1, %v1129_v44  ;;  %v2569_v29 = vpop.eup %2026  ;;  %v1175_v34 = vsel %vm840_vm4, %v2564_v10, 0.0 }
 0x40b   : > { %v902_v14 = vsel %vm840_vm4, %v2569_v29, 0.0 }
 0x40c   : > { %946 = vrot.lane.b32.xlu0 %v2395_v32, %s2139_s19  ;;  %v884_v32 = vmul.f32 1.442695, %v872_v30  ;;  %v1156_v11 = vmul.f32 1.442695, %v1140_v56 }
 0x40e   : > { %2028 = vpow2.f32 %v884_v32 }
 0x40f   : > { %2030 = vpow2.f32 %v1156_v11 }
 0x410   : > { %2032 = vpow2.f32 %v886_v17 }
 0x411   : > { %2034 = vpow2.f32 %v888_v18 }
 0x414   : > { %v2575_v51 = vpop.eup %2028 }
 0x415   : > { %v905_v1 = vsel %vm840_vm4, %v2575_v51, 0.0  ;;  %v2580_v19 = vpop.eup %2030 }
 0x416   : > { %v1181_v13 = vsel %vm840_vm4, %v2580_v19, 0.0  ;;  %v2585_v21 = vpop.eup %2032 }
 0x417   : > { %v908_v46 = vsel %vm840_vm4, %v2585_v21, 0.0  ;;  %v2589_v55 = vpop.eup %2034 }
 0x418   : > { %v911_v49 = vsel %vm840_vm4, %v2589_v55, 0.0 }
 0x431   : > { %1179 = vadd.xlane.f32.xlu2 %v1178_v60 }
 0x433   : > { %1176 = vadd.xlane.f32.xlu1 %v1175_v34 }
 0x436   : > { %903 = vadd.xlane.f32.xlu0 %v902_v14 }
 0x43b   : > { %906 = vadd.xlane.f32.xlu1 %v905_v1 }
 0x443   : > { %v898_v24 = vpop.xlane.xlu0 %897  ;;  %1182 = vadd.xlane.f32.xlu1 %v1181_v13 }
 0x44b   : > { %v1162_v28 = vpop.xlane.xlu2 %1161  ;;  %909 = vadd.xlane.f32.xlu1 %v908_v46 }
 0x44c   : > { %v901_v36 = vpop.xlane.xlu0 %900  ;;  %2036 = vrcp.f32 %v1162_v28 }
 0x452   : > { %v2037_v53 = vpop.eup %2036 }
 0x453   : > { %v861_v33 = vpop.xlane.xlu2 %860  ;;  %912 = vadd.xlane.f32.xlu1 %v911_v49  ;;  %v1165_v43 = vpop.xlane.xlu1 %1164  ;;  %v1196_v61 = vmul.f32 %v2037_v53, %v2518_v23 }
 0x454   : > { %v875_v45 = vsub.f32 %v2527_v31, %v861_v33  ;;  %v1132_v25 = vpop.xlane.xlu0 %1131  ;;  %2038 = vrcp.f32 %v1165_v43 }
 0x455   : > { %v1141_v50 = vsub.f32 %v2529_v35, %v1132_v25 }
 0x456   : > { %v890_v48 = vmul.f32 1.442695, %v875_v45 }
 0x457   : > { %v1158_v57 = vmul.f32 1.442695, %v1141_v50 }
 0x458   : > { %2040 = vpow2.f32 %v890_v48 }
 0x459   : > { %2042 = vpow2.f32 %v892_v54 }
 0x45a   : > { %v2039_v63 = vpop.eup %2038  ;;  %2044 = vpow2.f32 %v1158_v57 }
 0x45b   : > { %v1197_v31 = vmul.f32 %v2039_v63, %v2531_v39  ;;  %867 = vmax.xlane.f32.xlu1 %v866_v59  ;;  %v1168_v62 = vpop.xlane.xlu1 %1167  ;;  %v953_v9 = vpop.permute.xlu2 %952 }
 0x45c   : > { %2046 = vrcp.f32 %v1168_v62 }
 0x45d   : > { %v1205_v0 = vpack.c.bf16 %v1197_v31, %v1196_v61 }
 0x45e   : > { %v2603_v2 = vpop.eup %2040 }
 0x45f   : > { %v2605_v38 = vpop.eup %2042  ;;  %1926 = vmatmul.msk.bf16.vlgmr.msrb.gmra.mxu0 %vm840_vm4, %v1205_v0  ;;  %v914_v35 = vsel %vm840_vm4, %v2603_v2, 0.0 }
 0x460   : > { %915 = vadd.xlane.f32.xlu2 %v914_v35  ;;  %v917_v23 = vsel %vm840_vm4, %v2605_v38, 0.0  ;;  %v2612_v3 = vpop.eup %2044 }
 0x461   : > { %v1184_v37 = vsel %vm865_vm5, %v2612_v3, 0.0 }
 0x462   : > { %v2047_v5 = vpop.eup %2046 }
 0x463   : > { %918 = vadd.xlane.f32.xlu1 %v917_v23  ;;  %v1171_v39 = vpop.xlane.xlu1 %1170  ;;  %v1198_v7 = vmul.f32 %v2047_v5, %v2540_v52  ;;  %v951_v44 = vpop.permute.xlu2 %950 }
 0x464   : > { %2048 = vrcp.f32 %v1171_v39 }
 0x465   : > { %2050 = vrcp.f32 %v901_v36 }
 0x466   : > { %2052 = vrcp.f32 %v898_v24 }
 0x468   : > { %1185 = vadd.xlane.f32.xlu2 %v1184_v37 }
 0x46a   : > { %v2049_v6 = vpop.eup %2048 }
 0x46b   : > { %v1199_v8 = vmul.f32 %v2049_v6, %v2544_v58  ;;  %v1174_v60 = vpop.xlane.xlu0 %1173  ;;  %v2051_v56 = vpop.eup %2050 }
 0x46c   : > { %v949_v34 = vpop.permute.xlu2 %948  ;;  %v2053_v11 = vpop.eup %2052  ;;  %v933_v52 = vmul.f32 %v2051_v56, %v2520_v27  ;;  %2054 = vrcp.f32 %v1174_v60 }
 0x46d   : > { %v1206_v40 = vpack.c.bf16 %v1199_v8, %v1198_v7  ;;  %v932_v14 = vmul.f32 %v2053_v11, %v2513_v15 }
 0x46f   : > { %1927 = vmatmul.msk.bf16.gmra.mxu0 %vm840_vm4, %v1206_v40  ;;  %v941_v12 = vpack.c.bf16 %v933_v52, %v932_v14 }
 0x472   : > { %v2055_v16 = vpop.eup %2054 }
 0x473   : > { %v1200_v13 = vmul.f32 %v2055_v16, %v2549_v41 }
 0x47b   : > { %v955_v30 = vpop.permute.xlu1 %954 }
 0x47c   : > { %v979_v32 = vand.u32 %v2428_v4, %v955_v30  ;;  %v1325_v30 = vld [vmem:[%s2955_s5] sm:$0xff] }
 0x47e   : > { %984 = vmatpush.bf16.msra.mxu2 %v979_v32  ;;  %v947_v58 = vpop.permute.xlu0 %946  ;;  %v1326_v32 = vld [vmem:[%s2955_s5 + $0x8] sm:$0xff] }
 0x482   : > { %985 = vmatpush.bf16.msra.mxu2 %v953_v9 }
 0x486   : > { %986 = vmatpush.bf16.msra.mxu2 %v951_v44  ;;  %v1329_v44 = vpack.c.bf16 %v1326_v32, %v1325_v30 }
 0x48a   : > { %987 = vmatpush.bf16.msra.mxu2 %v949_v34 }
 0x48e   : > { %988 = vmatpush.bf16.msra.mxu2 %v947_v58 }
 0x491   : > { %1916 = vmatmul.msk.bf16.vlgmr.msra.gmra.mxu2 %vm840_vm4, %v941_v12 }
 0x4a4   : > { %v1180_v18 = vpop.xlane.xlu2 %1179 }
 0x4a6   : > { %v1177_v4 = vpop.xlane.xlu1 %1176 }
 0x4a7   : > { %2056 = vrcp.f32 %v1177_v4 }
 0x4a9   : > { %v904_v1 = vpop.xlane.xlu0 %903 }
 0x4aa   : > { %2058 = vrcp.f32 %v904_v1 }
 0x4ad   : > { %v2057_v17 = vpop.eup %2056 }
 0x4ae   : > { %v907_v22 = vpop.xlane.xlu1 %906  ;;  %v1201_v24 = vmul.f32 %v2057_v17, %v2564_v10 }
 0x4af   : > { %2060 = vrcp.f32 %v907_v22 }
 0x4b0   : > { %v1207_v27 = vpack.c.bf16 %v1201_v24, %v1200_v13  ;;  %v2059_v15 = vpop.eup %2058  ;;  %2062 = vrcp.f32 %v1180_v18 }
 0x4b1   : > { %v934_v36 = vmul.f32 %v2059_v15, %v2569_v29 }
 0x4b2   : > { %1928 = vmatmul.msk.bf16.gmra.mxu0 %vm840_vm4, %v1207_v27 }
 0x4b5   : > { %v2061_v46 = vpop.eup %2060 }
 0x4b6   : > { %v1183_v28 = vpop.xlane.xlu1 %1182  ;;  %v935_v26 = vmul.f32 %v2061_v46, %v2575_v51  ;;  %v2063_v41 = vpop.eup %2062 }
 0x4b7   : > { %2064 = vrcp.f32 %v1183_v28  ;;  %v1202_v43 = vmul.f32 %v2063_v41, %v2562_v42 }
 0x4b8   : > { %v942_v49 = vpack.c.bf16 %v935_v26, %v934_v36 }
 0x4ba   : > { %1917 = vmatmul.msk.bf16.gmra.mxu2 %vm840_vm4, %v942_v49 }
 0x4bd   : > { %v2065_v33 = vpop.eup %2064 }
 0x4be   : > { %v910_v10 = vpop.xlane.xlu1 %909  ;;  %v1203_v45 = vmul.f32 %v2065_v33, %v2580_v19 }
 0x4bf   : > { %2066 = vrcp.f32 %v910_v10 }
 0x4c0   : > { %v1208_v25 = vpack.c.bf16 %v1203_v45, %v1202_v43 }
 0x4c2   : > { %1929 = vmatmul.msk.bf16.gmra.mxu0 %vm840_vm4, %v1208_v25 }
 0x4c5   : > { %v2067_v29 = vpop.eup %2066 }
 0x4c6   : > { %v913_v54 = vpop.xlane.xlu1 %912  ;;  %v936_v50 = vmul.f32 %v2067_v29, %v2585_v21 }
 0x4c7   : > { %2068 = vrcp.f32 %v913_v54 }
 0x4cd   : > { %v2069_v48 = vpop.eup %2068 }
 0x4ce   : > { %v868_v51 = vpop.xlane.xlu1 %867  ;;  %v937_v53 = vmul.f32 %v2069_v48, %v2589_v55 }
 0x4cf   : > { %v877_v63 = vsub.f32 %v2596_v47, %v868_v51 }
 0x4d0   : > { %v943_v57 = vpack.c.bf16 %v937_v53, %v936_v50 }
 0x4d1   : > { %v894_v59 = vmul.f32 1.442695, %v877_v63 }
 0x4d2   : > { %1918 = vmatmul.msk.bf16.gmra.mxu2 %vm840_vm4, %v943_v57 }
 0x4d3   : > { %2070 = vpow2.f32 %v894_v59  ;;  %v916_v42 = vpop.xlane.xlu2 %915 }
 0x4d4   : > { %2072 = vrcp.f32 %v916_v42 }
 0x4d6   : > { %v919_v19 = vpop.xlane.xlu1 %918 }
 0x4d7   : > { %2074 = vrcp.f32 %v919_v19 }
 0x4d9   : > { %v2071_v61 = vpop.eup %2070 }
 0x4da   : > { %v920_v31 = vsel %vm865_vm5, %v2071_v61, 0.0  ;;  %v2073_v62 = vpop.eup %2072 }
 0x4db   : > { %v1186_v0 = vpop.xlane.xlu2 %1185  ;;  %921 = vadd.xlane.f32.xlu1 %v920_v31  ;;  %v938_v47 = vmul.f32 %v2073_v62, %v2603_v2  ;;  %v1327_v2 = vld [vmem:[%s2955_s5 + $0x10] sm:$0xff] }
 0x4dc   : > { %2076 = vrcp.f32 %v1186_v0  ;;  %v1251_v21 = vpop.f32.mrf.mxu0 }
 0x4dd   : > { %v2075_v55 = vpop.eup %2074 }
 0x4de   : > { %v939_v35 = vmul.f32 %v2075_v55, %v2605_v38  ;;  %v1328_v38 = vld [vmem:[%s2955_s5 + $0x18] sm:$0xff] }
 0x4e0   : > { %v944_v23 = vpack.c.bf16 %v939_v35, %v938_v47 }
 0x4e2   : > { %v2077_v39 = vpop.eup %2076  ;;  %1919 = vmatmul.msk.bf16.gmra.mxu2 %vm840_vm4, %v944_v23 }
 0x4e3   : > { %v1204_v37 = vmul.f32 %v2077_v39, %v2612_v3  ;;  %v1330_v3 = vpack.c.bf16 %v1328_v38, %v1327_v2  ;;  %v1983_v39 = vld [vmem:[%s2956_s6] ss:$0 sm:$0xff]  ;;  %v2117_v38 = vld [vmem:[%s2227_s30 + $0x8] sm:$0xff] }
 0x4e4   : > { %v1253_v5 = vpop.f32.mrf.mxu0 }
 0x4e5   : > { %v1960_v6 = vpack.i.bf16 %v1253_v5, %v1251_v21  ;;  %v1209_v7 = vpack.c.bf16 %v1204_v37, %v1204_v37  ;;  %1356 = vmatpush.bf16.msrb.mxu2 %v1330_v3 }
 0x4e7   : > { %1961 = vrot.lane.b32.xlu0 %v1960_v6, %s2140_s20  ;;  %1930 = vmatmul.msk.bf16.gmra.mxu0 %vm840_vm4, %v1209_v7  ;;  %v2116_v6 = vld [vmem:[%s2227_s30] sm:$0xff] }
 0x4e9   : > { %1357 = vmatpush.bf16.msrb.mxu2 %v1329_v44  ;;  %v2118_v44 = vld [vmem:[%s2227_s30 + $0x10] sm:$0xff] }
 0x4ec   : > { %v1256_v8 = vpop.f32.mrf.mxu0 }
 0x4f4   : > { %v1258_v40 = vpop.f32.mrf.mxu0 }
 0x4f5   : > { %v1965_v9 = vpack.i.bf16 %v1258_v40, %v1256_v8 }
 0x4f7   : > { %1966 = vrot.lane.b32.xlu2 %v1965_v9, %s2140_s20 }
 0x514   : > { %v990_v1 = vpop.f32.mrf.mxu2 }
 0x51c   : > { %v992_v24 = vpop.f32.mrf.mxu2 }
 0x52f   : > { %v1261_v60 = vpop.f32.mrf.mxu0 }
 0x537   : > { %v1263_v56 = vpop.f32.mrf.mxu0 }
 0x538   : > { %v1970_v34 = vpack.i.bf16 %v1263_v56, %v1261_v60 }
 0x53a   : > { %1971 = vrot.lane.b32.xlu1 %v1970_v34, %s2140_s20 }
 0x53d   : > { %v995_v28 = vpop.f32.mrf.mxu2 }
 0x53f   : > { %v1266_v11 = vpop.f32.mrf.mxu0 }
 0x545   : > { %v997_v33 = vpop.f32.mrf.mxu2 }
 0x547   : > { %v1268_v52 = vpop.f32.mrf.mxu0 }
 0x548   : > { %v1975_v58 = vpack.i.bf16 %v1268_v52, %v1266_v11  ;;  %v2119_v52 = vld [vmem:[%s2227_s30 + $0x18] sm:$0xff] }
 0x54a   : > { %1976 = vrot.lane.b32.xlu0 %v1975_v58, %s2140_s20 }
 0x54e   : > { %v922_v14 = vpop.xlane.xlu1 %921 }
 0x54f   : > { %2078 = vrcp.f32 %v922_v14 }
 0x551   : > { %v1967_v26 = vpop.permute.xlu2 %1966 }
 0x552   : > { %v1969_v49 = vunpack.i.h.bf16 %v1967_v26  ;;  %v1968_v41 = vunpack.i.l.bf16 %v1967_v26 }
 0x554   : > { %v1313_v10 = vsel %vm767_vm1, %v995_v28, %v1968_v41  ;;  %v1314_v43 = vsel %vm767_vm1, %v997_v33, %v1969_v49  ;;  %v2122_v28 = vld [vmem:[%s2227_s30 + $0x30] sm:$0xff] }
 0x555   : > { %v2079_v12 = vpop.eup %2078  ;;  %v1321_v45 = vpack.c.bf16 %v1314_v43, %v1313_v10  ;;  %v1000_v25 = vpop.f32.mrf.mxu2 }
 0x556   : > { %v940_v4 = vmul.f32 %v2079_v12, %v2071_v61 }
 0x558   : > { %v945_v16 = vpack.c.bf16 %v940_v4, %v940_v4 }
 0x559   : > { %v1962_v17 = vpop.permute.xlu0 %1961 }
 0x55a   : > { %1920 = vmatmul.msk.bf16.gmra.mxu2 %vm840_vm4, %v945_v16  ;;  %v1964_v22 = vunpack.i.h.bf16 %v1962_v17  ;;  %v1963_v13 = vunpack.i.l.bf16 %v1962_v17 }
 0x55c   : > { %v1311_v18 = vsel %vm767_vm1, %v990_v1, %v1963_v13  ;;  %v1312_v15 = vsel %vm767_vm1, %v992_v24, %v1964_v22  ;;  %v2120_v1 = vld [vmem:[%s2227_s30 + $0x20] sm:$0xff]  ;;  %v2121_v24 = vld [vmem:[%s2227_s30 + $0x28] sm:$0xff] }
 0x55d   : > { %v1320_v46 = vpack.c.bf16 %v1312_v15, %v1311_v18  ;;  %v1002_v54 = vpop.f32.mrf.mxu2 }
 0x564   : > { %v1271_v27 = vpop.f32.mrf.mxu0 }
 0x565   : > { %1300 = vrot.lane.b32.xlu2 %v1271_v27, %s2140_s20  ;;  %v1005_v57 = vpop.f32.mrf.mxu2 }
 0x56a   : > { %1931 = vmatmul.msk.bf16.vlgmr.msrb.gmra.mxu2 %vm451_vm0, %v1320_v46 }
 0x56c   : > { %v1273_v36 = vpop.f32.mrf.mxu0 }
 0x56d   : > { %v1007_v61 = vpop.f32.mrf.mxu2 }
 0x57a   : > { %1932 = vmatmul.msk.bf16.gmra.mxu2 %vm451_vm0, %v1321_v45 }
 0x5ac   : > { %v1972_v29 = vpop.permute.xlu1 %1971 }
 0x5ad   : > { %v1974_v48 = vunpack.i.h.bf16 %v1972_v29  ;;  %v1973_v51 = vunpack.i.l.bf16 %v1972_v29 }
 0x5af   : > { %v1315_v50 = vsel %vm767_vm1, %v1000_v25, %v1973_v51  ;;  %v1316_v53 = vsel %vm767_vm1, %v1002_v54, %v1974_v48 }
 0x5b0   : > { %v1322_v63 = vpack.c.bf16 %v1316_v53, %v1315_v50  ;;  %v2123_v50 = vld [vmem:[%s2227_s30 + $0x38] sm:$0xff] }
 0x5b2   : > { %1933 = vmatmul.msk.bf16.gmra.mxu2 %vm451_vm0, %v1322_v63 }
 0x5bc   : > { %v1977_v59 = vpop.permute.xlu0 %1976 }
 0x5bd   : > { %v1979_v42 = vunpack.i.h.bf16 %v1977_v59  ;;  %v1978_v19 = vunpack.i.l.bf16 %v1977_v59 }
 0x5bf   : > { %v1317_v31 = vsel %vm767_vm1, %v1005_v57, %v1978_v19  ;;  %v1318_v62 = vsel %vm767_vm1, %v1007_v61, %v1979_v42  ;;  %v1301_v21 = vpop.permute.xlu2 %1300 }
 0x5c0   : > { %v1323_v0 = vpack.c.bf16 %v1318_v62, %v1317_v31  ;;  %v2124_v62 = vld [vmem:[%s2227_s30 + $0x40] sm:$0x1] }
 0x5c2   : > { %1934 = vmatmul.msk.bf16.gmra.mxu2 %vm451_vm0, %v1323_v0 }
 0x5dd   : > { %v1010_v55 = vpop.f32.mrf.mxu2 }
 0x5de   : > { %v1319_v47 = vsel %vm767_vm1, %v1010_v55, %v1301_v21 }
 0x5df   : > { %v1324_v35 = vpack.c.bf16 %v1319_v47, %v1319_v47 }
 0x5e1   : > { %1935 = vmatmul.msk.bf16.gmra.mxu2 %vm451_vm0, %v1324_v35 }
 0x5e5   : > { %v1012_v23 = vpop.f32.mrf.mxu2 }
 0x5ed   : > { %v1359_v37 = vpop.f32.mrf.mxu2 }
 0x5ee   : > { %v1360_v5 = vadd.f32 %v1983_v39, %v1359_v37 }
 0x5f0   : > { %v2678_v7 = vadd.f32 %v2116_v6, %v1360_v5 }
 0x5f2   : > { %v1392_v8 = vsel %vm451_vm0, %v2678_v7, 0.0 }
 0x5f3   : > { %1393 = vadd.xlane.f32.xlu0 %v1392_v8 }
 0x5f5   : > { %v1361_v40 = vpop.f32.mrf.mxu2 }
 0x5f6   : > { %v1362_v2 = vadd.f32 %v1983_v39, %v1361_v40 }
 0x5f8   : > { %v2683_v9 = vadd.f32 %v2117_v38, %v1362_v2 }
 0x5fa   : > { %v1395_v3 = vsel %vm451_vm0, %v2683_v9, 0.0 }
 0x5fb   : > { %1396 = vadd.xlane.f32.xlu1 %v1395_v3 }
 0x5fd   : > { %v1364_v30 = vpop.f32.mrf.mxu2 }
 0x5fe   : > { %v1365_v32 = vadd.f32 %v1983_v39, %v1364_v30 }
 0x600   : > { %v2688_v60 = vadd.f32 %v2118_v44, %v1365_v32 }
 0x602   : > { %v1398_v56 = vsel %vm451_vm0, %v2688_v60, 0.0 }
 0x603   : > { %1399 = vadd.xlane.f32.xlu2 %v1398_v56 }
 0x605   : > { %v1366_v34 = vpop.f32.mrf.mxu2 }
 0x606   : > { %v1367_v11 = vadd.f32 %v1983_v39, %v1366_v34 }
 0x608   : > { %v2693_v58 = vadd.f32 %v2119_v52, %v1367_v11 }
 0x60a   : > { %v1401_v14 = vsel %vm451_vm0, %v2693_v58, 0.0 }
 0x60b   : > { %1402 = vadd.xlane.f32.xlu0 %v1401_v14 }
 0x635   : > { %v1369_v12 = vpop.f32.mrf.mxu2 }
 0x636   : > { %v1370_v4 = vadd.f32 %v1983_v39, %v1369_v12 }
 0x638   : > { %v2698_v16 = vadd.f32 %v2120_v1, %v1370_v4  ;;  %v1623_v1 = vld [vmem:[%s2959_s9 + $0x10] sm:$0xff] }
 0x63a   : > { %v1404_v17 = vsel %vm451_vm0, %v2698_v16, 0.0 }
 0x63b   : > { %1405 = vadd.xlane.f32.xlu1 %v1404_v17  ;;  %v1624_v17 = vld [vmem:[%s2959_s9 + $0x18] sm:$0xff] }
 0x63d   : > { %v1371_v22 = vpop.f32.mrf.mxu2 }
 0x63e   : > { %v1372_v13 = vadd.f32 %v1983_v39, %v1371_v22  ;;  %v1626_v22 = vpack.c.bf16 %v1624_v17, %v1623_v1 }
 0x640   : > { %v2703_v27 = vadd.f32 %v2121_v24, %v1372_v13  ;;  %1652 = vmatpush.bf16.msrb.mxu1 %v1626_v22 }
 0x642   : > { %v1407_v18 = vsel %vm451_vm0, %v2703_v27, 0.0 }
 0x643   : > { %1408 = vadd.xlane.f32.xlu2 %v1407_v18  ;;  %v1621_v18 = vld [vmem:[%s2959_s9] sm:$0xff] }
 0x645   : > { %v1374_v15 = vpop.f32.mrf.mxu2 }
 0x646   : > { %v1375_v46 = vadd.f32 %v1983_v39, %v1374_v15  ;;  %v1622_v15 = vld [vmem:[%s2959_s9 + $0x8] sm:$0xff] }
 0x648   : > { %v2708_v36 = vadd.f32 %v2122_v28, %v1375_v46  ;;  %v1625_v28 = vpack.c.bf16 %v1622_v15, %v1621_v18 }
 0x64a   : > { %v1410_v26 = vsel %vm451_vm0, %v2708_v36, 0.0  ;;  %1653 = vmatpush.bf16.msrb.mxu1 %v1625_v28 }
 0x64b   : > { %1411 = vadd.xlane.f32.xlu2 %v1410_v26 }
 0x64d   : > { %v1376_v49 = vpop.f32.mrf.mxu2 }
 0x64e   : > { %v1377_v54 = vadd.f32 %v1983_v39, %v1376_v49 }
 0x650   : > { %v2721_v53 = vadd.f32 %v2123_v50, %v1377_v54 }
 0x652   : > { %v1413_v42 = vsel %vm451_vm0, %v2721_v53, 0.0 }
 0x664   : > { %v1379_v41 = vpop.f32.mrf.mxu2 }
 0x665   : > { %v1380_v59 = vadd.f32 %v1983_v39, %v1379_v41 }
 0x666   : > { %v1394_v33 = vpop.xlane.xlu0 %1393 }
 0x667   : > { %v1419_v10 = vmul.f32 %v1394_v33, %v2246_v20  ;;  %v2733_v0 = vadd.f32 %v2124_v62, %v1380_v59 }
 0x669   : > { %v2714_v43 = vsub.f32 %v2678_v7, %v1419_v10  ;;  %v1416_v47 = vsel %vm476_vm2, %v2733_v0, 0.0 }
 0x66b   : > { %v1437_v45 = vmul.f32 %v2714_v43, %v2714_v43 }
 0x66c   : > { %v1381_v25 = vpop.f32.mrf.mxu2 }
 0x66d   : > { %v1446_v29 = vsel %vm451_vm0, %v1437_v45, 0.0 }
 0x66e   : > { %1447 = vadd.xlane.f32.xlu0 %v1446_v29  ;;  %v1397_v48 = vpop.xlane.xlu1 %1396 }
 0x66f   : > { %v1420_v51 = vmul.f32 %v1397_v48, %v2246_v20 }
 0x671   : > { %v2724_v63 = vsub.f32 %v2683_v9, %v1420_v51 }
 0x673   : > { %v1438_v57 = vmul.f32 %v2724_v63, %v2724_v63 }
 0x675   : > { %v1449_v19 = vsel %vm451_vm0, %v1438_v57, 0.0 }
 0x676   : > { %v1400_v61 = vpop.xlane.xlu2 %1399  ;;  %1414 = vadd.xlane.f32.xlu0 %v1413_v42  ;;  %1450 = vadd.xlane.f32.xlu1 %v1449_v19 }
 0x677   : > { %v1421_v31 = vmul.f32 %v1400_v61, %v2246_v20 }
 0x679   : > { %v2736_v21 = vsub.f32 %v2688_v60, %v1421_v31 }
 0x67b   : > { %v1439_v55 = vmul.f32 %v2736_v21, %v2736_v21 }
 0x67d   : > { %v1452_v35 = vsel %vm451_vm0, %v1439_v55, 0.0 }
 0x67e   : > { %v1403_v23 = vpop.xlane.xlu0 %1402  ;;  %1417 = vadd.xlane.f32.xlu0 %v1416_v47  ;;  %1453 = vadd.xlane.f32.xlu1 %v1452_v35 }
 0x67f   : > { %v1422_v39 = vmul.f32 %v1403_v23, %v2246_v20 }
 0x681   : > { %v2745_v37 = vsub.f32 %v2693_v58, %v1422_v39 }
 0x683   : > { %v1440_v5 = vmul.f32 %v2745_v37, %v2745_v37 }
 0x685   : > { %v1455_v6 = vsel %vm451_vm0, %v1440_v5, 0.0 }
 0x686   : > { %1456 = vadd.xlane.f32.xlu2 %v1455_v6 }
 0x6ae   : > { %v1406_v8 = vpop.xlane.xlu1 %1405 }
 0x6af   : > { %v1423_v40 = vmul.f32 %v1406_v8, %v2246_v20 }
 0x6b1   : > { %v2752_v2 = vsub.f32 %v2698_v16, %v1423_v40 }
 0x6b3   : > { %v1441_v38 = vmul.f32 %v2752_v2, %v2752_v2 }
 0x6b5   : > { %v1458_v3 = vsel %vm451_vm0, %v1441_v38, 0.0 }
 0x6b6   : > { %v1409_v30 = vpop.xlane.xlu2 %1408  ;;  %1459 = vadd.xlane.f32.xlu1 %v1458_v3 }
 0x6b7   : > { %v1424_v32 = vmul.f32 %v1409_v30, %v2246_v20 }
 0x6b9   : > { %v2759_v44 = vsub.f32 %v2703_v27, %v1424_v32 }
 0x6bb   : > { %v1442_v56 = vmul.f32 %v2759_v44, %v2759_v44 }
 0x6bd   : > { %v1461_v34 = vsel %vm451_vm0, %v1442_v56, 0.0 }
 0x6be   : > { %1462 = vadd.xlane.f32.xlu2 %v1461_v34  ;;  %v1412_v11 = vpop.xlane.xlu2 %1411  ;;  %v2805_v34 = vld [vmem:[%s2957_s7] ss:$0 sm:$0xff] }
 0x6bf   : > { %v1425_v52 = vmul.f32 %v1412_v11, %v2246_v20 }
 0x6c1   : > { %v2766_v14 = vsub.f32 %v2708_v36, %v1425_v52 }
 0x6c3   : > { %v1443_v12 = vmul.f32 %v2766_v14, %v2766_v14 }
 0x6c5   : > { %v1464_v4 = vsel %vm451_vm0, %v1443_v12, 0.0 }
 0x6c6   : > { %1465 = vadd.xlane.f32.xlu0 %v1464_v4 }
 0x6e1   : > { %v1448_v13 = vpop.xlane.xlu0 %1447 }
 0x6e2   : > { %v1473_v24 = vmul.f32 %v1448_v13, %v2246_v20 }
 0x6e4   : > { %v1482_v46 = vadd.f32 1e-05, %v1473_v24 }
 0x6e6   : > { %2080 = vrsqrt.f32 %v1482_v46  ;;  %vm1497_vm7 = vweird.f32 %v1482_v46 }
 0x6e9   : > { %v1415_v26 = vpop.xlane.xlu0 %1414  ;;  %v1451_v49 = vpop.xlane.xlu1 %1450 }
 0x6ea   : > { %v1426_v41 = vmul.f32 %v1415_v26, %v2246_v20  ;;  %v1474_v33 = vmul.f32 %v1451_v49, %v2246_v20 }
 0x6ec   : > { %v2081_v10 = vpop.eup %2080  ;;  %v2787_v45 = vsub.f32 %v2721_v53, %v1426_v41  ;;  %v1483_v25 = vadd.f32 1e-05, %v1474_v33 }
 0x6ed   : > { %v1492_v54 = vmul.f32 %v2081_v10, %v1482_v46  ;;  %vm1498_vm6 = vweird.f32 %v2081_v10 }
 0x6ee   : > { %2082 = vrsqrt.f32 %v1483_v25  ;;  %v1444_v29 = vmul.f32 %v2787_v45, %v2787_v45  ;;  %vm1499_vm8 = vmor %vm1497_vm7, %vm1498_vm6  ;;  %vm1507_vm10 = vweird.f32 %v1483_v25 }
 0x6ef   : > { %v1493_v48 = vmul.f32 %v2081_v10, %v1492_v54 }
 0x6f0   : > { %v1467_v51 = vsel %vm451_vm0, %v1444_v29, 0.0 }
 0x6f1   : > { %v1494_v50 = vmul.f32 0.5, %v1493_v48  ;;  %v1418_v57 = vpop.xlane.xlu0 %1417  ;;  %1468 = vadd.xlane.f32.xlu1 %v1467_v51  ;;  %v1454_v59 = vpop.xlane.xlu1 %1453 }
 0x6f2   : > { %v1427_v42 = vmul.f32 %v1418_v57, %v2246_v20  ;;  %v1475_v19 = vmul.f32 %v1454_v59, %v2246_v20 }
 0x6f3   : > { %v1495_v61 = vsub.f32 1.5, %v1494_v50 }
 0x6f4   : > { %v2083_v31 = vpop.eup %2082  ;;  %v2795_v62 = vsub.f32 %v2733_v0, %v1427_v42  ;;  %v1484_v55 = vadd.f32 1e-05, %v1475_v19 }
 0x6f5   : > { %v1496_v47 = vmul.f32 %v2081_v10, %v1495_v61  ;;  %v1502_v35 = vmul.f32 %v2083_v31, %v1483_v25  ;;  %vm1508_vm9 = vweird.f32 %v2083_v31 }
 0x6f6   : > { %2084 = vrsqrt.f32 %v1484_v55  ;;  %v1445_v23 = vmul.f32 %v2795_v62, %v2795_v62  ;;  %vm1509_vm11 = vmor %vm1507_vm10, %vm1508_vm9  ;;  %vm1517_vm13 = vweird.f32 %v1484_v55 }
 0x6f7   : > { %v1503_v39 = vmul.f32 %v2083_v31, %v1502_v35  ;;  %v1500_v6 = vsel %vm1499_vm8, %v2081_v10, %v1496_v47 }
 0x6f8   : > { %v1470_v5 = vsel %vm476_vm2, %v1445_v23, 0.0  ;;  %v1581_v32 = vmul.f32 %v1500_v6, %v2714_v43  ;;  %v2812_v43 = vld [vmem:[%s2958_s8] ss:$0 sm:$0xff] }
 0x6f9   : > { %v1504_v8 = vmul.f32 0.5, %v1503_v39  ;;  %1471 = vadd.xlane.f32.xlu2 %v1470_v5  ;;  %v1457_v40 = vpop.xlane.xlu2 %1456 }
 0x6fa   : > { %v1476_v38 = vmul.f32 %v1457_v40, %v2246_v20  ;;  %v1594_v17 = vmul.f32 %v2805_v34, %v1581_v32 }
 0x6fb   : > { %v1505_v3 = vsub.f32 1.5, %v1504_v8 }
 0x6fc   : > { %v2085_v30 = vpop.eup %2084  ;;  %v1485_v56 = vadd.f32 1e-05, %v1476_v38  ;;  %v1607_v15 = vadd.f32 %v2812_v43, %v1594_v17 }
 0x6fd   : > { %v1506_v11 = vmul.f32 %v2083_v31, %v1505_v3  ;;  %v1512_v52 = vmul.f32 %v2085_v30, %v1484_v55  ;;  %vm1518_vm12 = vweird.f32 %v2085_v30 }
 0x6fe   : > { %2086 = vrsqrt.f32 %v1485_v56  ;;  %vm1519_vm14 = vmor %vm1517_vm13, %vm1518_vm12  ;;  %vm1527_vm1 = vweird.f32 %v1485_v56 }
 0x6ff   : > { %v1510_v12 = vsel %vm1509_vm11, %v2083_v31, %v1506_v11  ;;  %v1513_v4 = vmul.f32 %v2085_v30, %v1512_v52 }
 0x700   : > { %v1582_v1 = vmul.f32 %v1510_v12, %v2724_v63 }
 0x701   : > { %v1514_v22 = vmul.f32 0.5, %v1513_v4 }
 0x702   : > { %v1595_v13 = vmul.f32 %v2805_v34, %v1582_v1 }
 0x703   : > { %v1515_v24 = vsub.f32 1.5, %v1514_v22 }
 0x704   : > { %v2087_v18 = vpop.eup %2086  ;;  %v1608_v46 = vadd.f32 %v2812_v43, %v1595_v13 }
 0x705   : > { %v1516_v28 = vmul.f32 %v2085_v30, %v1515_v24  ;;  %v1522_v26 = vmul.f32 %v2087_v18, %v1485_v56  ;;  %vm1528_vm15 = vweird.f32 %v2087_v18 }
 0x706   : > { %v1616_v63 = vpack.c.bf16 %v1608_v46, %v1607_v15  ;;  %vm1529_vm3 = vmor %vm1527_vm1, %vm1528_vm15 }
 0x707   : > { %v1523_v49 = vmul.f32 %v2087_v18, %v1522_v26  ;;  %v1520_v41 = vsel %vm1519_vm14, %v2085_v30, %v1516_v28 }
 0x708   : > { %1936 = vmatmul.msk.bf16.vlgmr.msrb.gmra.mxu1 %vm451_vm0, %v1616_v63  ;;  %v1583_v25 = vmul.f32 %v1520_v41, %v2736_v21  ;;  %v1779_v41 = vld [vmem:[%s2961_s11 + $0x70] sm:$0xff] }
 0x709   : > { %v1524_v33 = vmul.f32 0.5, %v1523_v49 }
 0x70a   : > { %v1596_v51 = vmul.f32 %v2805_v34, %v1583_v25 }
 0x70b   : > { %v1525_v10 = vsub.f32 1.5, %v1524_v33  ;;  %v1780_v33 = vld [vmem:[%s2961_s11 + $0x78] sm:$0xff] }
 0x70c   : > { %v1609_v57 = vadd.f32 %v2812_v43, %v1596_v51 }
 0x70d   : > { %v1526_v54 = vmul.f32 %v2087_v18, %v1525_v10  ;;  %v1788_v10 = vpack.c.bf16 %v1780_v33, %v1779_v41 }
 0x70f   : > { %v1530_v29 = vsel %vm1529_vm3, %v2087_v18, %v1526_v54  ;;  %1793 = vmatpush.bf16.msrb.mxu3 %v1788_v10 }
 0x710   : > { %v1584_v48 = vmul.f32 %v1530_v29, %v2745_v37  ;;  %v1777_v29 = vld [vmem:[%s2961_s11 + $0x60] sm:$0xff] }
 0x712   : > { %v1597_v50 = vmul.f32 %v2805_v34, %v1584_v48  ;;  %v1778_v48 = vld [vmem:[%s2961_s11 + $0x68] sm:$0xff] }
 0x714   : > { %v1610_v59 = vadd.f32 %v2812_v43, %v1597_v50  ;;  %v1787_v50 = vpack.c.bf16 %v1778_v48, %v1777_v29 }
 0x716   : > { %v1617_v42 = vpack.c.bf16 %v1610_v59, %v1609_v57  ;;  %1794 = vmatpush.bf16.msrb.mxu3 %v1787_v50 }
 0x718   : > { %1937 = vmatmul.msk.bf16.gmra.mxu1 %vm451_vm0, %v1617_v42 }
 0x729   : > { %v1460_v19 = vpop.xlane.xlu1 %1459 }
 0x72a   : > { %v1477_v21 = vmul.f32 %v1460_v19, %v2246_v20 }
 0x72c   : > { %v1486_v61 = vadd.f32 1e-05, %v1477_v21  ;;  %v1775_v21 = vld [vmem:[%s2961_s11 + $0x50] sm:$0xff] }
 0x72e   : > { %2088 = vrsqrt.f32 %v1486_v61  ;;  %vm1537_vm5 = vweird.f32 %v1486_v61 }
 0x731   : > { %v1463_v31 = vpop.xlane.xlu2 %1462 }
 0x732   : > { %v1478_v55 = vmul.f32 %v1463_v31, %v2246_v20 }
 0x734   : > { %v2089_v37 = vpop.eup %2088  ;;  %v1487_v47 = vadd.f32 1e-05, %v1478_v55 }
 0x735   : > { %v1532_v35 = vmul.f32 %v2089_v37, %v1486_v61  ;;  %vm1538_vm4 = vweird.f32 %v2089_v37  ;;  %v1776_v61 = vld [vmem:[%s2961_s11 + $0x58] sm:$0xff] }
 0x736   : > { %2090 = vrsqrt.f32 %v1487_v47  ;;  %vm1539_vm6 = vmor %vm1537_vm5, %vm1538_vm4  ;;  %vm1547_vm8 = vweird.f32 %v1487_v47  ;;  %v1786_v31 = vpack.c.bf16 %v1776_v61, %v1775_v21 }
 0x737   : > { %v1533_v23 = vmul.f32 %v2089_v37, %v1532_v35  ;;  %v1774_v35 = vld [vmem:[%s2961_s11 + $0x48] sm:$0xff] }
 0x738   : > { %1795 = vmatpush.bf16.msrb.mxu3 %v1786_v31 }
 0x739   : > { %v1534_v39 = vmul.f32 0.5, %v1533_v23  ;;  %v1466_v17 = vpop.xlane.xlu0 %1465 }
 0x73a   : > { %v1479_v18 = vmul.f32 %v1466_v17, %v2246_v20 }
 0x73b   : > { %v1535_v5 = vsub.f32 1.5, %v1534_v39 }
 0x73c   : > { %v2091_v6 = vpop.eup %2090 }
 0x73d   : > { %v1536_v8 = vmul.f32 %v2089_v37, %v1535_v5  ;;  %v1542_v40 = vmul.f32 %v2091_v6, %v1487_v47  ;;  %vm1548_vm7 = vweird.f32 %v2091_v6  ;;  %v1773_v47 = vld [vmem:[%s2961_s11 + $0x40] sm:$0xff] }
 0x73e   : > { %vm1549_vm9 = vmor %vm1547_vm8, %vm1548_vm7  ;;  %v1785_v23 = vpack.c.bf16 %v1774_v35, %v1773_v47 }
 0x73f   : > { %v1543_v38 = vmul.f32 %v2091_v6, %v1542_v40  ;;  %v1540_v3 = vsel %vm1539_vm6, %v2089_v37, %v1536_v8 }
 0x740   : > { %v1585_v56 = vmul.f32 %v1540_v3, %v2752_v2  ;;  %v1488_v2 = vadd.f32 1e-05, %v1479_v18  ;;  %1796 = vmatpush.bf16.msrb.mxu3 %v1785_v23  ;;  %v1772_v3 = vld [vmem:[%s2961_s11 + $0x38] sm:$0xff]  ;;  %v1767_v18 = vld [vmem:[%s2961_s11 + $0x10] sm:$0xff] }
 0x741   : > { %v1544_v30 = vmul.f32 0.5, %v1543_v38  ;;  %v1771_v38 = vld [vmem:[%s2961_s11 + $0x30] sm:$0xff] }
 0x742   : > { %v1598_v4 = vmul.f32 %v2805_v34, %v1585_v56  ;;  %2092 = vrsqrt.f32 %v1488_v2  ;;  %vm1557_vm11 = vweird.f32 %v1488_v2 }
 0x743   : > { %v1545_v32 = vsub.f32 1.5, %v1544_v30  ;;  %v1784_v30 = vpack.c.bf16 %v1772_v3, %v1771_v38 }
 0x744   : > { %v1611_v22 = vadd.f32 %v2812_v43, %v1598_v4  ;;  %v1770_v4 = vld [vmem:[%s2961_s11 + $0x28] sm:$0xff] }
 0x745   : > { %v1546_v11 = vmul.f32 %v2091_v6, %v1545_v32  ;;  %1797 = vmatpush.bf16.msrb.mxu3 %v1784_v30 }
 0x747   : > { %v1550_v52 = vsel %vm1549_vm9, %v2091_v6, %v1546_v11 }
 0x748   : > { %v1586_v12 = vmul.f32 %v1550_v52, %v2759_v44  ;;  %v2093_v15 = vpop.eup %2092 }
 0x749   : > { %v1552_v46 = vmul.f32 %v2093_v15, %v1488_v2  ;;  %vm1558_vm10 = vweird.f32 %v2093_v15  ;;  %v1768_v2 = vld [vmem:[%s2961_s11 + $0x18] sm:$0xff] }
 0x74a   : > { %v1599_v1 = vmul.f32 %v2805_v34, %v1586_v12  ;;  %vm1559_vm12 = vmor %vm1557_vm11, %vm1558_vm10  ;;  %v1769_v12 = vld [vmem:[%s2961_s11 + $0x20] sm:$0xff] }
 0x74b   : > { %v1553_v28 = vmul.f32 %v2093_v15, %v1552_v46  ;;  %v1783_v17 = vpack.c.bf16 %v1770_v4, %v1769_v12  ;;  %v1782_v46 = vpack.c.bf16 %v1768_v2, %v1767_v18 }
 0x74c   : > { %v1612_v13 = vadd.f32 %v2812_v43, %v1599_v1 }
 0x74d   : > { %v1554_v49 = vmul.f32 0.5, %v1553_v28  ;;  %1798 = vmatpush.bf16.msrb.mxu3 %v1783_v17 }
 0x74e   : > { %v1618_v24 = vpack.c.bf16 %v1612_v13, %v1611_v22 }
 0x74f   : > { %v1555_v25 = vsub.f32 1.5, %v1554_v49 }
 0x750   : > { %1938 = vmatmul.msk.bf16.gmra.mxu1 %vm451_vm0, %v1618_v24 }
 0x751   : > { %v1556_v42 = vmul.f32 %v2093_v15, %v1555_v25  ;;  %1799 = vmatpush.bf16.msrb.mxu3 %v1782_v46 }
 0x764   : > { %v1469_v44 = vpop.xlane.xlu1 %1468 }
 0x765   : > { %v1480_v26 = vmul.f32 %v1469_v44, %v2246_v20  ;;  %v2888_v44 = vld [vmem:[%s2960_s10] ss:$0 sm:$0xff] }
 0x767   : > { %v1489_v63 = vadd.f32 1e-05, %v1480_v26  ;;  %v1765_v26 = vld [vmem:[%s2961_s11] sm:$0xff] }
 0x769   : > { %2094 = vrsqrt.f32 %v1489_v63  ;;  %vm1567_vm14 = vweird.f32 %v1489_v63 }
 0x76c   : > { %v1472_v54 = vpop.xlane.xlu2 %1471 }
 0x76d   : > { %v1481_v51 = vmul.f32 %v1472_v54, %v2246_v20  ;;  %v1560_v20 = vsel %vm1559_vm12, %v2093_v15, %v1556_v42 }
 0x76e   : > { %v1587_v6 = vmul.f32 %v1560_v20, %v2766_v14 }
 0x76f   : > { %v2095_v57 = vpop.eup %2094  ;;  %v1490_v59 = vadd.f32 1e-05, %v1481_v51 }
 0x770   : > { %v1562_v19 = vmul.f32 %v2095_v57, %v1489_v63  ;;  %vm1568_vm13 = vweird.f32 %v2095_v57  ;;  %v1600_v14 = vmul.f32 %v2805_v34, %v1587_v6  ;;  %v1766_v63 = vld [vmem:[%s2961_s11 + $0x8] sm:$0xff] }
 0x771   : > { %2096 = vrsqrt.f32 %v1490_v59  ;;  %vm1569_vm15 = vmor %vm1567_vm14, %vm1568_vm13  ;;  %vm1577_vm3 = vweird.f32 %v1490_v59  ;;  %v1781_v33 = vpack.c.bf16 %v1766_v63, %v1765_v26 }
 0x772   : > { %v1563_v55 = vmul.f32 %v2095_v57, %v1562_v19  ;;  %v1613_v13 = vadd.f32 %v2812_v43, %v1600_v14 }
 0x773   : > { %1800 = vmatpush.bf16.msrb.mxu3 %v1781_v33 }
 0x774   : > { %v1564_v37 = vmul.f32 0.5, %v1563_v55 }
 0x776   : > { %v1565_v39 = vsub.f32 1.5, %v1564_v37 }
 0x777   : > { %v2097_v5 = vpop.eup %2096 }
 0x778   : > { %v1566_v8 = vmul.f32 %v2095_v57, %v1565_v39  ;;  %v1572_v40 = vmul.f32 %v2097_v5, %v1490_v59  ;;  %vm1578_vm1 = vweird.f32 %v2097_v5 }
 0x779   : > { %vm1579_vm4 = vmor %vm1577_vm3, %vm1578_vm1 }
 0x77a   : > { %v1570_v32 = vsel %vm1569_vm15, %v2095_v57, %v1566_v8  ;;  %v1573_v56 = vmul.f32 %v2097_v5, %v1572_v40 }
 0x77b   : > { %v1588_v11 = vmul.f32 %v1570_v32, %v2787_v45 }
 0x77c   : > { %v1574_v52 = vmul.f32 0.5, %v1573_v56 }
 0x77d   : > { %v1601_v1 = vmul.f32 %v2805_v34, %v1588_v11 }
 0x77e   : > { %v1575_v22 = vsub.f32 1.5, %v1574_v52 }
 0x77f   : > { %v1614_v45 = vadd.f32 %v2812_v43, %v1601_v1 }
 0x780   : > { %v1576_v24 = vmul.f32 %v2097_v5, %v1575_v22 }
 0x781   : > { %v1619_v15 = vpack.c.bf16 %v1614_v45, %v1613_v13 }
 0x782   : > { %v1580_v28 = vsel %vm1579_vm4, %v2097_v5, %v1576_v24 }
 0x783   : > { %1939 = vmatmul.msk.bf16.gmra.mxu1 %vm451_vm0, %v1619_v15  ;;  %v1589_v41 = vmul.f32 %v1580_v28, %v2795_v62 }
 0x785   : > { %v1655_v49 = vpop.f32.mrf.mxu1  ;;  %v1602_v54 = vmul.f32 %v2805_v34, %v1589_v41 }
 0x786   : > { %v1656_v10 = vadd.f32 %v2888_v44, %v1655_v49 }
 0x787   : > { %v1615_v50 = vadd.f32 %v2812_v43, %v1602_v54 }
 0x788   : > { %v1679_v25 = vmul.f32 %v1656_v10, %v1656_v10 }
 0x789   : > { %v1620_v21 = vpack.c.bf16 %v1615_v50, %v1615_v50 }
 0x78a   : > { %v1688_v29 = vmul.f32 %v1679_v25, %v1656_v10 }
 0x78c   : > { %v1697_v48 = vmul.f32 0.044715, %v1688_v29 }
 0x78d   : > { %v1657_v51 = vpop.f32.mrf.mxu1 }
 0x78e   : > { %v1706_v57 = vadd.f32 %v1697_v48, %v1656_v10  ;;  %v1658_v59 = vadd.f32 %v2888_v44, %v1657_v51 }
 0x790   : > { %v1715_v42 = vmul.f32 0.7978846, %v1706_v57  ;;  %v1680_v19 = vmul.f32 %v1658_v59, %v1658_v59 }
 0x792   : > { %v1689_v61 = vmul.f32 %v1680_v19, %v1658_v59  ;;  %2098 = vtanh.f32 %v1715_v42 }
 0x793   : > { %1940 = vmatmul.msk.bf16.gmra.mxu1 %vm451_vm0, %v1620_v21 }
 0x794   : > { %v1698_v62 = vmul.f32 0.044715, %v1689_v61 }
 0x795   : > { %v1660_v31 = vpop.f32.mrf.mxu1 }
 0x796   : > { %v1707_v55 = vadd.f32 %v1698_v62, %v1658_v59  ;;  %v1661_v34 = vadd.f32 %v2888_v44, %v1660_v31 }
 0x798   : > { %v1716_v20 = vmul.f32 0.7978846, %v1707_v55  ;;  %v1681_v37 = vmul.f32 %v1661_v34, %v1661_v34  ;;  %v2099_v47 = vpop.eup %2098 }
 0x799   : > { %v1733_v39 = vadd.f32 1.0, %v2099_v47 }
 0x79a   : > { %2100 = vtanh.f32 %v1716_v20  ;;  %v1690_v43 = vmul.f32 %v1681_v37, %v1661_v34 }
 0x79b   : > { %v1742_v30 = vmul.f32 0.5, %v1733_v39 }
 0x79c   : > { %v1699_v35 = vmul.f32 0.044715, %v1690_v43 }
 0x79d   : > { %v1662_v23 = vpop.f32.mrf.mxu1  ;;  %v1751_v14 = vmul.f32 %v1742_v30, %v1656_v10 }
 0x79e   : > { %v1708_v5 = vadd.f32 %v1699_v35, %v1661_v34  ;;  %v1663_v6 = vadd.f32 %v2888_v44, %v1662_v23 }
 0x7a0   : > { %v2101_v8 = vpop.eup %2100  ;;  %v1682_v40 = vmul.f32 %v1663_v6, %v1663_v6  ;;  %v1717_v38 = vmul.f32 0.7978846, %v1708_v5 }
 0x7a1   : > { %v1734_v3 = vadd.f32 1.0, %v2101_v8 }
 0x7a2   : > { %v1691_v32 = vmul.f32 %v1682_v40, %v1663_v6  ;;  %2102 = vtanh.f32 %v1717_v38 }
 0x7a3   : > { %v1743_v56 = vmul.f32 0.5, %v1734_v3 }
 0x7a4   : > { %v1700_v11 = vmul.f32 0.044715, %v1691_v32 }
 0x7a5   : > { %v1752_v52 = vmul.f32 %v1743_v56, %v1658_v59 }
 0x7a6   : > { %v1709_v12 = vadd.f32 %v1700_v11, %v1663_v6 }
 0x7a7   : > { %v1760_v4 = vpack.c.bf16 %v1752_v52, %v1751_v14 }
 0x7a8   : > { %v1718_v1 = vmul.f32 0.7978846, %v1709_v12  ;;  %v2103_v17 = vpop.eup %2102 }
 0x7a9   : > { %1801 = vmatmul.bf16.vlgmr.msrb.gmra.mxu3 %v1760_v4  ;;  %v1735_v22 = vadd.f32 1.0, %v2103_v17 }
 0x7aa   : > { %2104 = vtanh.f32 %v1718_v1 }
 0x7ab   : > { %v1744_v24 = vmul.f32 0.5, %v1735_v22 }
 0x7ad   : > { %v1753_v2 = vmul.f32 %v1744_v24, %v1661_v34 }
 0x7b0   : > { %v2105_v13 = vpop.eup %2104 }
 0x7b1   : > { %v1736_v45 = vadd.f32 1.0, %v2105_v13 }
 0x7b3   : > { %v1745_v18 = vmul.f32 0.5, %v1736_v45 }
 0x7b5   : > { %v1754_v15 = vmul.f32 %v1745_v18, %v1663_v6 }
 0x7b7   : > { %v1761_v46 = vpack.c.bf16 %v1754_v15, %v1753_v2 }
 0x7b9   : > { %1806 = vmatmul.bf16.gmra.mxu3 %v1761_v46 }
 0x7cd   : > { %v1665_v28 = vpop.f32.mrf.mxu1 }
 0x7ce   : > { %v1666_v26 = vadd.f32 %v2888_v44, %v1665_v28 }
 0x7d0   : > { %v1683_v63 = vmul.f32 %v1666_v26, %v1666_v26 }
 0x7d2   : > { %v1692_v49 = vmul.f32 %v1683_v63, %v1666_v26 }
 0x7d4   : > { %v1701_v41 = vmul.f32 0.044715, %v1692_v49 }
 0x7d5   : > { %v1667_v33 = vpop.f32.mrf.mxu1 }
 0x7d6   : > { %v1710_v10 = vadd.f32 %v1701_v41, %v1666_v26  ;;  %v1668_v25 = vadd.f32 %v2888_v44, %v1667_v33 }
 0x7d8   : > { %v1684_v54 = vmul.f32 %v1668_v25, %v1668_v25  ;;  %v1719_v29 = vmul.f32 0.7978846, %v1710_v10 }
 0x7da   : > { %v1693_v48 = vmul.f32 %v1684_v54, %v1668_v25  ;;  %2106 = vtanh.f32 %v1719_v29 }
 0x7dc   : > { %v1702_v51 = vmul.f32 0.044715, %v1693_v48 }
 0x7de   : > { %v1711_v50 = vadd.f32 %v1702_v51, %v1668_v25 }
 0x7e0   : > { %v1720_v57 = vmul.f32 0.7978846, %v1711_v50  ;;  %v2107_v59 = vpop.eup %2106 }
 0x7e1   : > { %v1737_v42 = vadd.f32 1.0, %v2107_v59 }
 0x7e2   : > { %2108 = vtanh.f32 %v1720_v57 }
 0x7e3   : > { %v1746_v61 = vmul.f32 0.5, %v1737_v42 }
 0x7e5   : > { %v1755_v31 = vmul.f32 %v1746_v61, %v1666_v26  ;;  %v1987_v26 = vld [vmem:[%s2962_s12] ss:$0 sm:$0xff] }
 0x7e8   : > { %v2109_v19 = vpop.eup %2108 }
 0x7e9   : > { %v1738_v21 = vadd.f32 1.0, %v2109_v19 }
 0x7eb   : > { %v1747_v62 = vmul.f32 0.5, %v1738_v21 }
 0x7ed   : > { %v1756_v55 = vmul.f32 %v1747_v62, %v1668_v25 }
 0x7ef   : > { %v1762_v34 = vpack.c.bf16 %v1756_v55, %v1755_v31 }
 0x7f1   : > { %1811 = vmatmul.bf16.gmra.mxu3 %v1762_v34 }
 0x800   : > { %v1670_v20 = vpop.f32.mrf.mxu1 }
 0x801   : > { %v1671_v37 = vadd.f32 %v2888_v44, %v1670_v20 }
 0x803   : > { %v1685_v47 = vmul.f32 %v1671_v37, %v1671_v37 }
 0x805   : > { %v1694_v43 = vmul.f32 %v1685_v47, %v1671_v37 }
 0x807   : > { %v1703_v35 = vmul.f32 0.044715, %v1694_v43 }
 0x808   : > { %v1672_v23 = vpop.f32.mrf.mxu1 }
 0x809   : > { %v1712_v39 = vadd.f32 %v1703_v35, %v1671_v37  ;;  %v1673_v5 = vadd.f32 %v2888_v44, %v1672_v23 }
 0x80b   : > { %v1686_v6 = vmul.f32 %v1673_v5, %v1673_v5  ;;  %v1721_v8 = vmul.f32 0.7978846, %v1712_v39 }
 0x80d   : > { %v1695_v40 = vmul.f32 %v1686_v6, %v1673_v5  ;;  %2110 = vtanh.f32 %v1721_v8 }
 0x80f   : > { %v1704_v38 = vmul.f32 0.044715, %v1695_v40 }
 0x810   : > { %v1675_v3 = vpop.f32.mrf.mxu1 }
 0x811   : > { %v1713_v30 = vadd.f32 %v1704_v38, %v1673_v5  ;;  %v1676_v32 = vadd.f32 %v2888_v44, %v1675_v3 }
 0x813   : > { %v1687_v56 = vmul.f32 %v1676_v32, %v1676_v32  ;;  %v1722_v11 = vmul.f32 0.7978846, %v1713_v30  ;;  %v2111_v14 = vpop.eup %2110 }
 0x814   : > { %v1739_v1 = vadd.f32 1.0, %v2111_v14 }
 0x815   : > { %v1696_v52 = vmul.f32 %v1687_v56, %v1676_v32  ;;  %2112 = vtanh.f32 %v1722_v11 }
 0x816   : > { %v1748_v24 = vmul.f32 0.5, %v1739_v1 }
 0x817   : > { %v1705_v12 = vmul.f32 0.044715, %v1696_v52 }
 0x818   : > { %v1677_v4 = vpop.f32.mrf.mxu1  ;;  %v1757_v2 = vmul.f32 %v1748_v24, %v1671_v37 }
 0x819   : > { %v1714_v17 = vadd.f32 %v1705_v12, %v1676_v32 }
 0x81b   : > { %v2113_v22 = vpop.eup %2112  ;;  %v1723_v13 = vmul.f32 0.7978846, %v1714_v17 }
 0x81c   : > { %v1740_v45 = vadd.f32 1.0, %v2113_v22 }
 0x81d   : > { %2114 = vtanh.f32 %v1723_v13 }
 0x81e   : > { %v1749_v18 = vmul.f32 0.5, %v1740_v45 }
 0x820   : > { %v1758_v15 = vmul.f32 %v1749_v18, %v1673_v5 }
 0x822   : > { %v1763_v46 = vpack.c.bf16 %v1758_v15, %v1757_v2 }
 0x823   : > { %v2115_v44 = vpop.eup %2114 }
 0x824   : > { %1816 = vmatmul.bf16.gmra.mxu3 %v1763_v46  ;;  %v1741_v28 = vadd.f32 1.0, %v2115_v44 }
 0x826   : > { %v1750_v63 = vmul.f32 0.5, %v1741_v28 }
 0x828   : > { %v1759_v33 = vmul.f32 %v1750_v63, %v1676_v32 }
 0x82a   : > { %v1764_v25 = vpack.c.bf16 %v1759_v33, %v1759_v33 }
 0x82c   : > { %v1802_v49 = vpop.f32.mrf.mxu3 }
 0x82d   : > { %v1803_v41 = vadd.f32 %v1987_v26, %v1802_v49 }
 0x82f   : > { %v1826_v10 = vadd.f32 %v1803_v41, %v2678_v7 }
 0x831   : > { %1835 = vst.msk [vmem:[%s2918_s28] sm:$0xff] %vm451_vm0, %v1826_v10 }
 0x834   : > { %v1804_v54 = vpop.f32.mrf.mxu3  ;;  %1821 = vmatmul.bf16.gmra.mxu3 %v1764_v25 }
 0x835   : > { %v1805_v29 = vadd.f32 %v1987_v26, %v1804_v54 }
 0x837   : > { %v1827_v48 = vadd.f32 %v1805_v29, %v2683_v9 }
 0x839   : > { %1836 = vst.msk [vmem:[%s2918_s28 + $0x8] sm:$0xff] %vm451_vm0, %v1827_v48 }
 0x83c   : > { %v1807_v51 = vpop.f32.mrf.mxu3 }
 0x83d   : > { %v1808_v50 = vadd.f32 %v1987_v26, %v1807_v51 }
 0x83f   : > { %v1828_v57 = vadd.f32 %v1808_v50, %v2688_v60 }
 0x841   : > { %1837 = vst.msk [vmem:[%s2918_s28 + $0x10] sm:$0xff] %vm451_vm0, %v1828_v57 }
 0x844   : > { %v1809_v7 = vpop.f32.mrf.mxu3 }
 0x845   : > { %v1810_v59 = vadd.f32 %v1987_v26, %v1809_v7 }
 0x847   : > { %v1829_v42 = vadd.f32 %v1810_v59, %v2693_v58 }
 0x849   : > { %1838 = vst.msk [vmem:[%s2918_s28 + $0x18] sm:$0xff] %vm451_vm0, %v1829_v42 }
 0x874   : > { %v1812_v19 = vpop.f32.mrf.mxu3 }
 0x875   : > { %v1813_v21 = vadd.f32 %v1987_v26, %v1812_v19 }
 0x877   : > { %v1830_v9 = vadd.f32 %v1813_v21, %v2698_v16 }
 0x879   : > { %1839 = vst.msk [vmem:[%s2918_s28 + $0x20] sm:$0xff] %vm451_vm0, %v1830_v9 }
 0x87c   : > { %v1814_v61 = vpop.f32.mrf.mxu3 }
 0x87d   : > { %v1815_v62 = vadd.f32 %v1987_v26, %v1814_v61 }
 0x87f   : > { %v1831_v60 = vadd.f32 %v1815_v62, %v2703_v27 }
 0x881   : > { %1840 = vst.msk [vmem:[%s2918_s28 + $0x28] sm:$0xff] %vm451_vm0, %v1831_v60 }
 0x8a7   : > { %v1817_v31 = vpop.f32.mrf.mxu3 }
 0x8a8   : > { %v1818_v55 = vadd.f32 %v1987_v26, %v1817_v31 }
 0x8aa   : > { %v1832_v58 = vadd.f32 %v1818_v55, %v2708_v36 }
 0x8ac   : > { %1841 = vst.msk [vmem:[%s2918_s28 + $0x30] sm:$0xff] %vm451_vm0, %v1832_v58 }
 0x8af   : > { %v1819_v34 = vpop.f32.mrf.mxu3 }
 0x8b0   : > { %v1820_v20 = vadd.f32 %v1987_v26, %v1819_v34 }
 0x8b2   : > { %v1833_v37 = vadd.f32 %v1820_v20, %v2721_v53 }
 0x8b4   : > { %1842 = vst.msk [vmem:[%s2918_s28 + $0x38] sm:$0xff] %vm451_vm0, %v1833_v37 }
 0x8b7   : > { %v1822_v16 = vpop.f32.mrf.mxu3 }
 0x8b8   : > { %v1823_v47 = vadd.f32 %v1987_v26, %v1822_v16 }
 0x8ba   : > { %v1834_v43 = vadd.f32 %v1823_v47, %v2733_v0 }
 0x8bc   : > { %1843 = vst.msk [vmem:[%s2918_s28 + $0x40] sm:$0x1] %vm476_vm2, %v1834_v43 }
 0x8bf   : > { %v1824_v27 = vpop.f32.mrf.mxu3 }
 0x8c0 PF: > { %s23_s25 = sadd.s32 1, %s2131_s25  }
 0x8c1   : > { %p20_p4 = scmp.ge.s32.totalorder %s23_s25, 4  }
 0x8c3   :  { %22 = sbr.rel (!%p20_p4) target bundleno = 1 (0x1), region = 102 }

// kernel: senpamae_forward.17
= control target key start
LH: loop header
LB: loop body
LE: loop exit
PB: predicated region body
PF: predicated region fallthrough
CT: control target
= control target key end

     0   :  { %s362_s12 = smov 0   ;;  %s406_s0 = inlined_call_operand.vmem [shape: f32[128,32], index: 0, kind: input, shape index: {}]   ;;  %s407_s1 = inlined_call_operand.vmem [shape: f32[32,16], index: 1, kind: input, shape index: {}]   ;;  %s408_s2 = inlined_call_operand.vmem [shape: f32[1,16], index: 2, kind: input, shape index: {}]   ;;  %s409_s3 = inlined_call_operand.vmem [shape: f32[128,16], index: 3, kind: output, shape index: {}]  }
   0x1 LB: > { %s304_s13 = sadd.s32 4294967295, %s340_s12   ;;  %p308_p0 = scmp.ge.s32.totalorder %s340_s12, 1  ;;  %s340_s12 = sphi %s362_s12, %s13_s12  }
   0x2   : > { %p138_p1 = scmp.lt.s32.totalorder %s340_s12, 3 }
   0x4   : > { %p139_p2 = pnand %p308_p0, %p138_p1 }
   0x5   : > { %s309_s20 = sshll.u32 (!%p139_p2), %s304_s13, 3 }
   0x6   : > { %142 = sbr.rel (%p139_p2) target bundleno = 166 (0xa6), region = 32  ;;  %p163_p3 = scmp.lt.s32.totalorder (!%p139_p2), %s309_s20, 15 }
   0xb   : > { %v189_v0 = vld [vmem:[%s407_s1 + $0x10] sm:$0xff]  ;;  %v190_v1 = vld [vmem:[%s407_s1 + $0x18] sm:$0xff]  ;;  %v187_v2 = vld [vmem:[%s407_s1] sm:$0xff]  ;;  %s411_s20 = smov (!%p163_p3, %s309_s20), 15  ;;  %vm197_vm0 = vcmask 261120   ;;  %vm239_vm1 = vcmask 130048  }
   0xc   : > { %v192_v3 = vpack.c.bf16 %v190_v1, %v189_v0  ;;  %v188_v4 = vld [vmem:[%s407_s1 + $0x8] sm:$0xff]  ;;  %s310_s23 = sshll.u32 %s411_s20, 3  ;;  %v333_v18 = vld [vmem:[%s408_s2] ss:$0 sm:$0xff] }
   0xd   : > { %v191_v5 = vpack.c.bf16 %v188_v4, %v187_v2  ;;  %s166_s26 = scalar_lea.vmem %s406_s0, %s310_s23  ;;  %s172_s4 = scalar_lea.vmem %s409_s3, %s310_s23 }
   0xe   : > { %216 = vmatpush.bf16.msra.mxu0 %v192_v3  ;;  %319 = vmatpush.bf16.msra.mxu1 %v192_v3  ;;  %v175_v6 = vld [vmem:[%s166_s26] sm:$0xff]  ;;  %v176_v7 = vld [vmem:[%s166_s26 + $0x8] sm:$0xff]  ;;  %v177_v8 = vld [vmem:[%s166_s26 + $0x10] sm:$0xff] }
   0xf   : > { %320 = vmatpush.bf16.msra.mxu2 %v192_v3  ;;  %321 = vmatpush.bf16.msra.mxu3 %v192_v3  ;;  %v183_v9 = vpack.c.bf16 %v176_v7, %v175_v6  ;;  %v178_v10 = vld [vmem:[%s166_s26 + $0x18] sm:$0xff]  ;;  %v179_v11 = vld [vmem:[%s166_s26 + $0x20] sm:$0xff]  ;;  %v180_v12 = vld [vmem:[%s166_s26 + $0x28] sm:$0xff] }
  0x10   : > { %v184_v13 = vpack.c.bf16 %v178_v10, %v177_v8  ;;  %v185_v14 = vpack.c.bf16 %v180_v12, %v179_v11  ;;  %v181_v15 = vld [vmem:[%s166_s26 + $0x30] sm:$0xff]  ;;  %v182_v16 = vld [vmem:[%s166_s26 + $0x38] sm:$0xff] }
  0x11   : > { %v186_v17 = vpack.c.bf16 %v182_v16, %v181_v15 }
  0x12   : > { %217 = vmatpush.bf16.msra.mxu0 %v191_v5  ;;  %322 = vmatpush.bf16.msra.mxu1 %v191_v5 }
  0x13   : > { %323 = vmatpush.bf16.msra.mxu2 %v191_v5  ;;  %324 = vmatpush.bf16.msra.mxu3 %v191_v5 }
  0x15   : > { %313 = vmatmul.msk.bf16.vlgmr.msra.gmra.mxu0 %vm197_vm0, %v183_v9  ;;  %314 = vmatmul.msk.bf16.vlgmr.msra.gmra.mxu1 %vm197_vm0, %v184_v13 }
  0x16   : > { %315 = vmatmul.msk.bf16.vlgmr.msra.gmra.mxu2 %vm197_vm0, %v185_v14  ;;  %316 = vmatmul.msk.bf16.vlgmr.msra.gmra.mxu3 %vm197_vm0, %v186_v17 }
  0x92   : > { %v219_v19 = vpop.f32.mrf.mxu0  ;;  %v224_v21 = vpop.f32.mrf.mxu1 }
  0x93   : > { %v220_v20 = vadd.f32 %v333_v18, %v219_v19  ;;  %v225_v22 = vadd.f32 %v333_v18, %v224_v21 }
  0x95   : > { %240 = vst.msk [vmem:[%s172_s4] sm:$0xff] %vm239_vm1, %v220_v20 }
  0x96   : > { %242 = vst.msk [vmem:[%s172_s4 + $0x10] sm:$0xff] %vm239_vm1, %v225_v22 }
  0x99   : > { %v229_v23 = vpop.f32.mrf.mxu2  ;;  %v234_v25 = vpop.f32.mrf.mxu3 }
  0x9a   : > { %v230_v24 = vadd.f32 %v333_v18, %v229_v23  ;;  %v221_v26 = vpop.f32.mrf.mxu0  ;;  %v235_v27 = vadd.f32 %v333_v18, %v234_v25  ;;  %v226_v29 = vpop.f32.mrf.mxu1 }
  0x9b   : > { %v222_v28 = vadd.f32 %v333_v18, %v221_v26  ;;  %v227_v30 = vadd.f32 %v333_v18, %v226_v29 }
  0x9c   : > { %244 = vst.msk [vmem:[%s172_s4 + $0x20] sm:$0xff] %vm239_vm1, %v230_v24 }
  0x9d   : > { %246 = vst.msk [vmem:[%s172_s4 + $0x30] sm:$0xff] %vm239_vm1, %v235_v27 }
  0x9e   : > { %241 = vst.msk [vmem:[%s172_s4 + $0x8] sm:$0xff] %vm239_vm1, %v222_v28 }
  0x9f   : > { %243 = vst.msk [vmem:[%s172_s4 + $0x18] sm:$0xff] %vm239_vm1, %v227_v30 }
  0xa1   : > { %v231_v31 = vpop.f32.mrf.mxu2  ;;  %v236_v33 = vpop.f32.mrf.mxu3 }
  0xa2   : > { %v232_v32 = vadd.f32 %v333_v18, %v231_v31  ;;  %v237_v34 = vadd.f32 %v333_v18, %v236_v33 }
  0xa4   : > { %245 = vst.msk [vmem:[%s172_s4 + $0x28] sm:$0xff] %vm239_vm1, %v232_v32 }
  0xa5   : > { %247 = vst.msk [vmem:[%s172_s4 + $0x38] sm:$0xff] %vm239_vm1, %v237_v34 }
  0xa6 PF: > { %s13_s12 = sadd.s32 1, %s340_s12  }
  0xa7   : > { %p10_p4 = scmp.ge.s32.totalorder %s13_s12, 4  }
  0xa9   :  { %12 = sbr.rel (!%p10_p4) target bundleno = 1 (0x1), region = 62 }

</bundles_post_ra>
